<compile_context>
chip_gen: v7x
topology: tpu7x:2x2x1
jax: 0.10.0
libtpu: 0.0.40
codegen_flags: <defaults>
</compile_context>

<pallas_src>
import functools

import jax
import jax.numpy as jnp
from jax.experimental import pallas as pl
from jax.experimental.pallas import tpu as pltpu


_LAYER_KEYS = ("ln1_g", "ln1_b", "wqkv", "bqkv", "wo", "bo",
               "ln2_g", "ln2_b", "w1", "b1", "w2", "b2")
_N_W = len(_LAYER_KEYS)          # 12 weight tensors per DPTViTLayer


def _layer_weight_shapes(D, I):
    return ((1, D), (1, D),          # ln1 gamma / beta          (f32)
            (D, 3 * D), (1, 3 * D),  # fused QKV weight (bf16) / bias (f32)
            (D, D), (1, D),          # wo (bf16) / bo (f32)
            (1, D), (1, D),          # ln2 gamma / beta          (f32)
            (D, I), (1, I),          # w1 (bf16) / b1 (f32)
            (I, D), (1, D))          # w2 (bf16) / b2 (f32)


def _vmem_limit_bytes():
    # Raise the scoped-VMEM limit above the 16/32 MiB defaults so resident
    # bf16 weights (two layers' worth in the fused skip kernel) fit at
    # realistic ViT sizes, while staying well under the smallest physical
    # VMEM (64 MiB on v7x; 128 MiB on v5e/v6e).
    try:
        cap = int(pltpu.get_tpu_info().vmem_capacity_bytes)
        if cap >= 64 * 1024 * 1024:
            return int(min(cap * 3 // 4, 96 * 1024 * 1024))
    except Exception:
        pass
    return 48 * 1024 * 1024


# ----------------------------------------------------------------------------
# Fused pre-LN ViT block on an (S, D) tile held in VMEM.
# `in_kernel=False` gives a pure-jnp reference path (identical math, exact
# divide instead of the EUP approximate reciprocal) used for verification.
# ----------------------------------------------------------------------------
def _vit_block(x, ln1_g, ln1_b, wqkv, bqkv, wo, bo, ln2_g, ln2_b,
               w1, b1, w2, b2, *, num_heads, eps, in_kernel=True):
    f32, bf16 = jnp.float32, jnp.bfloat16
    S, D = x.shape
    head_dim = D // num_heads

    def layernorm(v, g, b):
        mu = jnp.mean(v, axis=-1, keepdims=True)
        var = jnp.mean(jnp.square(v - mu), axis=-1, keepdims=True)
        return (v - mu) * jax.lax.rsqrt(var + eps) * g + b

    # ---- LayerNorm-before + fused multi-head self-attention ----
    xn = layernorm(x, ln1_g, ln1_b).astype(bf16)               # bf16 MXU operand
    qkv = jnp.dot(xn, wqkv, preferred_element_type=f32) + bqkv  # (S, 3D) f32
    # Pre-scale queries once on (S, D) instead of scaling the (H, S, S) scores.
    q = qkv[:, :D] * (1.0 / float(head_dim) ** 0.5)
    k = qkv[:, D:2 * D]
    v = qkv[:, 2 * D:]

    # Head-batched attention: (H, S, dh) batched QK^T / PV, then a single
    # full-width (S, D) @ (D, D) output projection (no per-head loop).
    qh = q.reshape(S, num_heads, head_dim).transpose(1, 0, 2).astype(bf16)
    kh = k.reshape(S, num_heads, head_dim).transpose(1, 0, 2).astype(bf16)
    vh = v.reshape(S, num_heads, head_dim).transpose(1, 0, 2).astype(bf16)

    s = jnp.einsum("hqd,hkd->hqk", qh, kh, preferred_element_type=f32)  # (H,S,S)
    s = s - jnp.max(s, axis=-1, keepdims=True)
    p = jnp.exp(s)
    denom = jnp.sum(p, axis=-1, keepdims=True)
    if in_kernel:
        # Softmax denominator on the EUP reciprocal slot instead of a VPU divide.
        p = p * pl.reciprocal(denom, approx=True)
    else:
        p = p / denom

    ctx = jnp.einsum("hqk,hkd->hqd", p.astype(bf16), vh,
                     preferred_element_type=f32)               # (H, S, dh)
    ctx = ctx.transpose(1, 0, 2).reshape(S, D)                 # (S, D)
    attn = jnp.dot(ctx.astype(bf16), wo, preferred_element_type=f32) + bo

    h1 = x + attn                                              # residual 1

    # ---- LayerNorm-after + MLP ----
    h1n = layernorm(h1, ln2_g, ln2_b).astype(bf16)
    mlp = jnp.dot(h1n, w1, preferred_element_type=f32) + b1
    # TODO(synk): HF DPT "gelu" is exact (erf) GELU; tanh approximation kept
    # because erf lowering inside Mosaic is not guaranteed across versions.
    mlp = jax.nn.gelu(mlp, approximate=True)
    out = jnp.dot(mlp.astype(bf16), w2, preferred_element_type=f32) + b2
    return out + h1                                            # residual 2


# ----------------------------------------------------------------------------
# Pallas kernels: one grid step = one batch element
# ----------------------------------------------------------------------------
def _vit_layer_kernel(x_ref, *refs, num_heads, eps):
    w = [r[...] for r in refs[:_N_W]]
    o_ref = refs[_N_W]
    out = _vit_block(x_ref[0].astype(jnp.float32), *w,
                     num_heads=num_heads, eps=eps)
    o_ref[0] = out.astype(o_ref.dtype)


def _vit_skip_layer_kernel(x_ref, ks_ref, *refs, num_heads, eps):
    w_main = [r[...] for r in refs[:_N_W]]
    w_mid = [r[...] for r in refs[_N_W:2 * _N_W]]
    o_ref, ks_o_ref = refs[2 * _N_W], refs[2 * _N_W + 1]
    n = x_ref.shape[1]
    # Concatenation of hidden + knowledge-source tokens happens in VMEM; the
    # (B, N+M, D) concat / split never hits HBM.
    x = jnp.concatenate([x_ref[0], ks_ref[0]], axis=0).astype(jnp.float32)
    out = _vit_block(x, *w_main, num_heads=num_heads, eps=eps)
    o_ref[0] = out[:n].astype(o_ref.dtype)
    # mid_ks layer fused into the same kernel: ks tokens stay resident in VMEM.
    ks_mid = _vit_block(out[n:], *w_mid, num_heads=num_heads, eps=eps)
    ks_o_ref[0] = ks_mid.astype(ks_o_ref.dtype)


# ----------------------------------------------------------------------------
# pallas_call builders (cached by shape so every layer reuses one executable)
# ----------------------------------------------------------------------------
def _weight_specs(D, I):
    # Constant block index -> the pipeline keeps weights resident across the
    # batch grid instead of re-fetching them.
    return [pl.BlockSpec(s, lambda b: (0, 0)) for s in _layer_weight_shapes(D, I)]


@functools.lru_cache(maxsize=None)
def _build_vit_layer(B, S, D, I, num_heads, eps, out_dtype):
    dt = jnp.dtype(out_dtype)
    in_specs = [pl.BlockSpec((1, S, D), lambda b: (b, 0, 0))] + _weight_specs(D, I)
    kernel = functools.partial(_vit_layer_kernel, num_heads=num_heads, eps=eps)
    return pl.pallas_call(
        kernel,
        out_shape=jax.ShapeDtypeStruct((B, S, D), dt),
        grid=(B,),
        in_specs=in_specs,
        out_specs=pl.BlockSpec((1, S, D), lambda b: (b, 0, 0)),
        compiler_params=pltpu.CompilerParams(
            dimension_semantics=("parallel",),
            vmem_limit_bytes=_vmem_limit_bytes()),
    )


@functools.lru_cache(maxsize=None)
def _build_vit_skip_layer(B, N, M, D, I, num_heads, eps, out_dtype):
    dt = jnp.dtype(out_dtype)
    in_specs = ([pl.BlockSpec((1, N, D), lambda b: (b, 0, 0)),
                 pl.BlockSpec((1, M, D), lambda b: (b, 0, 0))]
                + _weight_specs(D, I)      # main layer weights
                + _weight_specs(D, I))     # mid_ks layer weights
    kernel = functools.partial(_vit_skip_layer_kernel,
                               num_heads=num_heads, eps=eps)
    return pl.pallas_call(
        kernel,
        out_shape=(jax.ShapeDtypeStruct((B, N, D), dt),
                   jax.ShapeDtypeStruct((B, M, D), dt)),
        grid=(B,),
        in_specs=in_specs,
        out_specs=(pl.BlockSpec((1, N, D), lambda b: (b, 0, 0)),
                   pl.BlockSpec((1, M, D), lambda b: (b, 0, 0))),
        compiler_params=pltpu.CompilerParams(
            dimension_semantics=("parallel",),
            vmem_limit_bytes=_vmem_limit_bytes()),
    )


def vit_layer(x, p, *, num_heads, eps=1e-12):
    B, S, D = x.shape
    I = p["w1"].shape[1]
    call = _build_vit_layer(B, S, D, I, num_heads, eps, x.dtype.name)
    return call(x, *[p[k] for k in _LAYER_KEYS])


def vit_skip_layer(x, ks, p_main, p_mid, *, num_heads, eps=1e-12):
    B, N, D = x.shape
    M = ks.shape[1]
    I = p_main["w1"].shape[1]
    call = _build_vit_skip_layer(B, N, M, D, I, num_heads, eps, x.dtype.name)
    return call(x, ks.astype(x.dtype),
                *[p_main[k] for k in _LAYER_KEYS],
                *[p_mid[k] for k in _LAYER_KEYS])


# ----------------------------------------------------------------------------
# Parameter init (deterministic, synthetic) — matmul weights stored in bf16
# ----------------------------------------------------------------------------
def init_layer_params(key, D, I, scale=0.02):
    ks = jax.random.split(key, 4)
    f32, bf16 = jnp.float32, jnp.bfloat16

    def w(k, shape):
        return (jax.random.normal(k, shape, f32) * scale).astype(bf16)

    return dict(
        ln1_g=jnp.ones((1, D), f32), ln1_b=jnp.zeros((1, D), f32),
        wqkv=w(ks[0], (D, 3 * D)), bqkv=jnp.zeros((1, 3 * D), f32),
        wo=w(ks[1], (D, D)), bo=jnp.zeros((1, D), f32),
        ln2_g=jnp.ones((1, D), f32), ln2_b=jnp.zeros((1, D), f32),
        w1=w(ks[2], (D, I)), b1=jnp.zeros((1, I), f32),
        w2=w(ks[3], (I, D)), b2=jnp.zeros((1, D), f32),
    )


# ----------------------------------------------------------------------------
# SkipDPTMultiviewViTEncoder forward (control flow in JAX, compute in Pallas)
# ----------------------------------------------------------------------------
def skip_dpt_multiview_encoder(hidden_states, knowledge_sources, layer_params,
                               mid_ks_params, *, skip_step, num_heads,
                               head_mask=None, output_attentions=False,
                               output_hidden_states=False,
                               output_knowledge_sources=False):
    # TODO(synk): head_mask / output_attentions have no clean equivalent — the
    # fused kernel never materializes per-head attention probabilities in HBM.
    assert head_mask is None
    B, N, D = hidden_states.shape
    all_hidden = [] if output_hidden_states else None
    all_ks = [] if output_knowledge_sources else None

    for i, params in enumerate(layer_params):
        if output_hidden_states:
            all_hidden.append(hidden_states)
        if i % skip_step == 0:
            ks_in = knowledge_sources[i // skip_step]
            # One fused kernel: concat -> layer -> split -> mid_ks layer.
            hidden_states, ks_out = vit_skip_layer(
                hidden_states, ks_in, params, mid_ks_params[i // skip_step],
                num_heads=num_heads)
        else:
            hidden_states = vit_layer(hidden_states, params, num_heads=num_heads)
            ks_out = jnp.zeros((B, 0, D), hidden_states.dtype)  # torch: empty slice
        if output_knowledge_sources:
            all_ks.append(ks_out)

    if output_hidden_states:
        all_hidden.append(hidden_states)

    return {
        "last_hidden_state": hidden_states,
        "hidden_states": tuple(all_hidden) if output_hidden_states else None,
        "attentions": None,
        "knowledge_sources": knowledge_sources,
        "_all_knowledge_sources": tuple(all_ks) if output_knowledge_sources else None,
    }


# ----------------------------------------------------------------------------
# Pure-jnp reference (identical math, exact divide) for verification
# ----------------------------------------------------------------------------
def _encoder_ref(hidden_states, knowledge_sources, layer_params, mid_ks_params,
                 *, skip_step, num_heads, eps=1e-12):
    hs = hidden_states.astype(jnp.float32)
    N = hs.shape[1]
    for i, p in enumerate(layer_params):
        if i % skip_step == 0:
            ks = knowledge_sources[i // skip_step].astype(jnp.float32)
            x = jnp.concatenate([hs, ks], axis=1)
        else:
            x = hs
        w = [p[k] for k in _LAYER_KEYS]
        out = jax.vmap(lambda xb: _vit_block(xb, *w, num_heads=num_heads,
                                             eps=eps, in_kernel=False))(x)
        hs = out[:, :N]
    return hs


# ----------------------------------------------------------------------------
# Demo
# ----------------------------------------------------------------------------
if __name__ == "__main__":
    # Small DPTConfig-like settings (D=128 keeps stores lane-dense).
    B = 2                  # batch
    N = 16                 # patch tokens
    M = 8                  # knowledge-source tokens per skip point
    D = 128                # hidden_size
    H = 4                  # num_attention_heads (head_dim = 32)
    I = 4 * D              # intermediate_size
    num_hidden_layers = 8
    skip_step = 4
    n_ks = num_hidden_layers // skip_step

    root = jax.random.PRNGKey(0)
    k_x, k_ks, k_layers, k_mid = jax.random.split(root, 4)

    hidden_states = jax.random.normal(k_x, (B, N, D), jnp.float32)
    knowledge_sources = tuple(
        jax.random.normal(k, (B, M, D), jnp.float32)
        for k in jax.random.split(k_ks, n_ks)
    )

    layer_params = [init_layer_params(k, D, I)
                    for k in jax.random.split(k_layers, num_hidden_layers)]
    mid_ks_params = [init_layer_params(k, D, I)
                     for k in jax.random.split(k_mid, n_ks)]

    out = skip_dpt_multiview_encoder(
        hidden_states, knowledge_sources, layer_params, mid_ks_params,
        skip_step=skip_step, num_heads=H, output_knowledge_sources=True)

    last = jax.block_until_ready(out["last_hidden_state"])
    assert last.shape == (B, N, D)
    assert not bool(jnp.any(jnp.isnan(last)))
    assert out["_all_knowledge_sources"][0].shape == (B, M, D)
    assert out["_all_knowledge_sources"][1].shape == (B, 0, D)

    # Verify the fused Pallas pipeline against the pure-jnp reference.
    ref = _encoder_ref(hidden_states, knowledge_sources, layer_params,
                       mid_ks_params, skip_step=skip_step, num_heads=H)
    err = float(jnp.max(jnp.abs(last - ref)))
    assert err < 5e-2, f"kernel vs reference mismatch: {err}"

    print("KERNEL_OK")
</pallas_src>

<mosaic_0001>
module attributes {stable_mosaic.version = 11 : i64} {
  func.func @_vit_skip_layer_kernel(%arg0: i32, %arg1: memref<1x16x128xf32, #tpu.memory_space<vmem>>, %arg2: memref<1x8x128xf32, #tpu.memory_space<vmem>>, %arg3: memref<1x128xf32, #tpu.memory_space<vmem>>, %arg4: memref<1x128xf32, #tpu.memory_space<vmem>>, %arg5: memref<128x384xbf16, #tpu.memory_space<vmem>>, %arg6: memref<1x384xf32, #tpu.memory_space<vmem>>, %arg7: memref<128x128xbf16, #tpu.memory_space<vmem>>, %arg8: memref<1x128xf32, #tpu.memory_space<vmem>>, %arg9: memref<1x128xf32, #tpu.memory_space<vmem>>, %arg10: memref<1x128xf32, #tpu.memory_space<vmem>>, %arg11: memref<128x512xbf16, #tpu.memory_space<vmem>>, %arg12: memref<1x512xf32, #tpu.memory_space<vmem>>, %arg13: memref<512x128xbf16, #tpu.memory_space<vmem>>, %arg14: memref<1x128xf32, #tpu.memory_space<vmem>>, %arg15: memref<1x128xf32, #tpu.memory_space<vmem>>, %arg16: memref<1x128xf32, #tpu.memory_space<vmem>>, %arg17: memref<128x384xbf16, #tpu.memory_space<vmem>>, %arg18: memref<1x384xf32, #tpu.memory_space<vmem>>, %arg19: memref<128x128xbf16, #tpu.memory_space<vmem>>, %arg20: memref<1x128xf32, #tpu.memory_space<vmem>>, %arg21: memref<1x128xf32, #tpu.memory_space<vmem>>, %arg22: memref<1x128xf32, #tpu.memory_space<vmem>>, %arg23: memref<128x512xbf16, #tpu.memory_space<vmem>>, %arg24: memref<1x512xf32, #tpu.memory_space<vmem>>, %arg25: memref<512x128xbf16, #tpu.memory_space<vmem>>, %arg26: memref<1x128xf32, #tpu.memory_space<vmem>>, %arg27: memref<1x16x128xf32, #tpu.memory_space<vmem>>, %arg28: memref<1x8x128xf32, #tpu.memory_space<vmem>>) attributes {dimension_semantics = [#tpu.dimension_semantics<parallel>], iteration_bounds = array<i64: 2>, scalar_prefetch = 0 : i64, scratch_operands = 0 : i64, tpu.core_type = #tpu.core_type<tc>, window_params = [{transform_indices = @transform_0, window_bounds = array<i64: 1, 16, 128>}, {transform_indices = @transform_1, window_bounds = array<i64: 1, 8, 128>}, {pipeline_mode = #tpu.pipeline_mode<synchronous>, transform_indices = @transform_2, window_bounds = array<i64: 1, 128>}, {pipeline_mode = #tpu.pipeline_mode<synchronous>, transform_indices = @transform_3, window_bounds = array<i64: 1, 128>}, {pipeline_mode = #tpu.pipeline_mode<synchronous>, transform_indices = @transform_4, window_bounds = array<i64: 128, 384>}, {pipeline_mode = #tpu.pipeline_mode<synchronous>, transform_indices = @transform_5, window_bounds = array<i64: 1, 384>}, {pipeline_mode = #tpu.pipeline_mode<synchronous>, transform_indices = @transform_6, window_bounds = array<i64: 128, 128>}, {pipeline_mode = #tpu.pipeline_mode<synchronous>, transform_indices = @transform_7, window_bounds = array<i64: 1, 128>}, {pipeline_mode = #tpu.pipeline_mode<synchronous>, transform_indices = @transform_8, window_bounds = array<i64: 1, 128>}, {pipeline_mode = #tpu.pipeline_mode<synchronous>, transform_indices = @transform_9, window_bounds = array<i64: 1, 128>}, {pipeline_mode = #tpu.pipeline_mode<synchronous>, transform_indices = @transform_10, window_bounds = array<i64: 128, 512>}, {pipeline_mode = #tpu.pipeline_mode<synchronous>, transform_indices = @transform_11, window_bounds = array<i64: 1, 512>}, {pipeline_mode = #tpu.pipeline_mode<synchronous>, transform_indices = @transform_12, window_bounds = array<i64: 512, 128>}, {pipeline_mode = #tpu.pipeline_mode<synchronous>, transform_indices = @transform_13, window_bounds = array<i64: 1, 128>}, {pipeline_mode = #tpu.pipeline_mode<synchronous>, transform_indices = @transform_14, window_bounds = array<i64: 1, 128>}, {pipeline_mode = #tpu.pipeline_mode<synchronous>, transform_indices = @transform_15, window_bounds = array<i64: 1, 128>}, {pipeline_mode = #tpu.pipeline_mode<synchronous>, transform_indices = @transform_16, window_bounds = array<i64: 128, 384>}, {pipeline_mode = #tpu.pipeline_mode<synchronous>, transform_indices = @transform_17, window_bounds = array<i64: 1, 384>}, {pipeline_mode = #tpu.pipeline_mode<synchronous>, transform_indices = @transform_18, window_bounds = array<i64: 128, 128>}, {pipeline_mode = #tpu.pipeline_mode<synchronous>, transform_indices = @transform_19, window_bounds = array<i64: 1, 128>}, {pipeline_mode = #tpu.pipeline_mode<synchronous>, transform_indices = @transform_20, window_bounds = array<i64: 1, 128>}, {pipeline_mode = #tpu.pipeline_mode<synchronous>, transform_indices = @transform_21, window_bounds = array<i64: 1, 128>}, {pipeline_mode = #tpu.pipeline_mode<synchronous>, transform_indices = @transform_22, window_bounds = array<i64: 128, 512>}, {pipeline_mode = #tpu.pipeline_mode<synchronous>, transform_indices = @transform_23, window_bounds = array<i64: 1, 512>}, {pipeline_mode = #tpu.pipeline_mode<synchronous>, transform_indices = @transform_24, window_bounds = array<i64: 512, 128>}, {pipeline_mode = #tpu.pipeline_mode<synchronous>, transform_indices = @transform_25, window_bounds = array<i64: 1, 128>}, {transform_indices = @transform_26, window_bounds = array<i64: 1, 16, 128>}, {transform_indices = @transform_27, window_bounds = array<i64: 1, 8, 128>}]} {
    %c0 = arith.constant 0 : index
    %c0_0 = arith.constant 0 : index
    %0 = vector.load %arg3[%c0, %c0_0] : memref<1x128xf32, #tpu.memory_space<vmem>>, vector<1x128xf32>
    %c0_1 = arith.constant 0 : index
    %c0_2 = arith.constant 0 : index
    %1 = vector.load %arg4[%c0_1, %c0_2] : memref<1x128xf32, #tpu.memory_space<vmem>>, vector<1x128xf32>
    %c0_3 = arith.constant 0 : index
    %c0_4 = arith.constant 0 : index
    %2 = vector.load %arg5[%c0_3, %c0_4] : memref<128x384xbf16, #tpu.memory_space<vmem>>, vector<128x384xbf16>
    %c0_5 = arith.constant 0 : index
    %c0_6 = arith.constant 0 : index
    %3 = vector.load %arg6[%c0_5, %c0_6] : memref<1x384xf32, #tpu.memory_space<vmem>>, vector<1x384xf32>
    %c0_7 = arith.constant 0 : index
    %c0_8 = arith.constant 0 : index
    %4 = vector.load %arg7[%c0_7, %c0_8] : memref<128x128xbf16, #tpu.memory_space<vmem>>, vector<128x128xbf16>
    %c0_9 = arith.constant 0 : index
    %c0_10 = arith.constant 0 : index
    %5 = vector.load %arg8[%c0_9, %c0_10] : memref<1x128xf32, #tpu.memory_space<vmem>>, vector<1x128xf32>
    %c0_11 = arith.constant 0 : index
    %c0_12 = arith.constant 0 : index
    %6 = vector.load %arg9[%c0_11, %c0_12] : memref<1x128xf32, #tpu.memory_space<vmem>>, vector<1x128xf32>
    %c0_13 = arith.constant 0 : index
    %c0_14 = arith.constant 0 : index
    %7 = vector.load %arg10[%c0_13, %c0_14] : memref<1x128xf32, #tpu.memory_space<vmem>>, vector<1x128xf32>
    %c0_15 = arith.constant 0 : index
    %c0_16 = arith.constant 0 : index
    %8 = vector.load %arg11[%c0_15, %c0_16] : memref<128x512xbf16, #tpu.memory_space<vmem>>, vector<128x512xbf16>
    %c0_17 = arith.constant 0 : index
    %c0_18 = arith.constant 0 : index
    %9 = vector.load %arg12[%c0_17, %c0_18] : memref<1x512xf32, #tpu.memory_space<vmem>>, vector<1x512xf32>
    %c0_19 = arith.constant 0 : index
    %c0_20 = arith.constant 0 : index
    %10 = vector.load %arg13[%c0_19, %c0_20] : memref<512x128xbf16, #tpu.memory_space<vmem>>, vector<512x128xbf16>
    %c0_21 = arith.constant 0 : index
    %c0_22 = arith.constant 0 : index
    %11 = vector.load %arg14[%c0_21, %c0_22] : memref<1x128xf32, #tpu.memory_space<vmem>>, vector<1x128xf32>
    %c0_23 = arith.constant 0 : index
    %c0_24 = arith.constant 0 : index
    %12 = vector.load %arg15[%c0_23, %c0_24] : memref<1x128xf32, #tpu.memory_space<vmem>>, vector<1x128xf32>
    %c0_25 = arith.constant 0 : index
    %c0_26 = arith.constant 0 : index
    %13 = vector.load %arg16[%c0_25, %c0_26] : memref<1x128xf32, #tpu.memory_space<vmem>>, vector<1x128xf32>
    %c0_27 = arith.constant 0 : index
    %c0_28 = arith.constant 0 : index
    %14 = vector.load %arg17[%c0_27, %c0_28] : memref<128x384xbf16, #tpu.memory_space<vmem>>, vector<128x384xbf16>
    %c0_29 = arith.constant 0 : index
    %c0_30 = arith.constant 0 : index
    %15 = vector.load %arg18[%c0_29, %c0_30] : memref<1x384xf32, #tpu.memory_space<vmem>>, vector<1x384xf32>
    %c0_31 = arith.constant 0 : index
    %c0_32 = arith.constant 0 : index
    %16 = vector.load %arg19[%c0_31, %c0_32] : memref<128x128xbf16, #tpu.memory_space<vmem>>, vector<128x128xbf16>
    %c0_33 = arith.constant 0 : index
    %c0_34 = arith.constant 0 : index
    %17 = vector.load %arg20[%c0_33, %c0_34] : memref<1x128xf32, #tpu.memory_space<vmem>>, vector<1x128xf32>
    %c0_35 = arith.constant 0 : index
    %c0_36 = arith.constant 0 : index
    %18 = vector.load %arg21[%c0_35, %c0_36] : memref<1x128xf32, #tpu.memory_space<vmem>>, vector<1x128xf32>
    %c0_37 = arith.constant 0 : index
    %c0_38 = arith.constant 0 : index
    %19 = vector.load %arg22[%c0_37, %c0_38] : memref<1x128xf32, #tpu.memory_space<vmem>>, vector<1x128xf32>
    %c0_39 = arith.constant 0 : index
    %c0_40 = arith.constant 0 : index
    %20 = vector.load %arg23[%c0_39, %c0_40] : memref<128x512xbf16, #tpu.memory_space<vmem>>, vector<128x512xbf16>
    %c0_41 = arith.constant 0 : index
    %c0_42 = arith.constant 0 : index
    %21 = vector.load %arg24[%c0_41, %c0_42] : memref<1x512xf32, #tpu.memory_space<vmem>>, vector<1x512xf32>
    %c0_43 = arith.constant 0 : index
    %c0_44 = arith.constant 0 : index
    %22 = vector.load %arg25[%c0_43, %c0_44] : memref<512x128xbf16, #tpu.memory_space<vmem>>, vector<512x128xbf16>
    %c0_45 = arith.constant 0 : index
    %c0_46 = arith.constant 0 : index
    %23 = vector.load %arg26[%c0_45, %c0_46] : memref<1x128xf32, #tpu.memory_space<vmem>>, vector<1x128xf32>
    %c0_47 = arith.constant 0 : index
    %c0_48 = arith.constant 0 : index
    %c0_49 = arith.constant 0 : index
    %24 = vector.load %arg1[%c0_47, %c0_48, %c0_49] : memref<1x16x128xf32, #tpu.memory_space<vmem>>, vector<1x16x128xf32>
    %25 = vector.shape_cast %24 : vector<1x16x128xf32> to vector<16x128xf32>
    %c0_50 = arith.constant 0 : index
    %c0_51 = arith.constant 0 : index
    %c0_52 = arith.constant 0 : index
    %26 = vector.load %arg2[%c0_50, %c0_51, %c0_52] : memref<1x8x128xf32, #tpu.memory_space<vmem>>, vector<1x8x128xf32>
    %27 = vector.shape_cast %26 : vector<1x8x128xf32> to vector<8x128xf32>
    %28 = tpu.concatenate %25, %27 in 0 : vector<16x128xf32>, vector<8x128xf32> -> vector<24x128xf32>
    %cst = arith.constant dense<0.000000e+00> : vector<24xf32>
    %29 = vector.multi_reduction <add>, %28, %cst [1] : vector<24x128xf32> to vector<24xf32>
    %30 = vector.shape_cast %29 : vector<24xf32> to vector<24x1xf32>
    %cst_53 = arith.constant 1.280000e+02 : f32
    %31 = vector.broadcast %cst_53 : f32 to vector<24x1xf32>
    %32 = arith.divf %30, %31 : vector<24x1xf32>
    %33 = vector.broadcast %32 : vector<24x1xf32> to vector<24x128xf32>
    %34 = arith.subf %28, %33 : vector<24x128xf32>
    %35 = arith.mulf %34, %34 : vector<24x128xf32>
    %cst_54 = arith.constant dense<0.000000e+00> : vector<24xf32>
    %36 = vector.multi_reduction <add>, %35, %cst_54 [1] : vector<24x128xf32> to vector<24xf32>
    %37 = vector.shape_cast %36 : vector<24xf32> to vector<24x1xf32>
    %cst_55 = arith.constant 1.280000e+02 : f32
    %38 = vector.broadcast %cst_55 : f32 to vector<24x1xf32>
    %39 = arith.divf %37, %38 : vector<24x1xf32>
    %40 = vector.broadcast %32 : vector<24x1xf32> to vector<24x128xf32>
    %41 = arith.subf %28, %40 : vector<24x128xf32>
    %cst_56 = arith.constant 9.99999996E-13 : f32
    %42 = vector.broadcast %cst_56 : f32 to vector<24x1xf32>
    %43 = arith.addf %39, %42 : vector<24x1xf32>
    %44 = math.rsqrt %43 : vector<24x1xf32>
    %45 = vector.broadcast %44 : vector<24x1xf32> to vector<24x128xf32>
    %46 = arith.mulf %41, %45 : vector<24x128xf32>
    %47 = vector.broadcast %0 : vector<1x128xf32> to vector<24x128xf32>
    %48 = arith.mulf %46, %47 : vector<24x128xf32>
    %49 = vector.broadcast %1 : vector<1x128xf32> to vector<24x128xf32>
    %50 = arith.addf %48, %49 : vector<24x128xf32>
    %51 = arith.truncf %50 : vector<24x128xf32> to vector<24x128xbf16>
    %cst_57 = arith.constant dense<0.000000e+00> : vector<24x384xf32>
    %52 = tpu.matmul %51, %2, %cst_57 {dimension_numbers = #tpu.dot_dimension_numbers<[1], [0], [0], [1], [0, 0, 1, 1], [], []>} : vector<24x128xbf16>, vector<128x384xbf16>, vector<24x384xf32> -> vector<24x384xf32>
    %53 = vector.broadcast %3 : vector<1x384xf32> to vector<24x384xf32>
    %54 = arith.addf %52, %53 : vector<24x384xf32>
    %55 = vector.extract_strided_slice %54 {offsets = [0, 0], sizes = [24, 128], strides = [1, 1]} : vector<24x384xf32> to vector<24x128xf32>
    %cst_58 = arith.constant 0.176776692 : f32
    %56 = vector.broadcast %cst_58 : f32 to vector<24x128xf32>
    %57 = arith.mulf %55, %56 : vector<24x128xf32>
    %58 = vector.extract_strided_slice %54 {offsets = [0, 128], sizes = [24, 128], strides = [1, 1]} : vector<24x384xf32> to vector<24x128xf32>
    %59 = vector.extract_strided_slice %54 {offsets = [0, 256], sizes = [24, 128], strides = [1, 1]} : vector<24x384xf32> to vector<24x128xf32>
    %60 = vector.shape_cast %57 : vector<24x128xf32> to vector<24x4x32xf32>
    %61 = tpu.transpose %60, [1, 0, 2] : vector<24x4x32xf32> -> vector<4x24x32xf32>
    %62 = arith.truncf %61 : vector<4x24x32xf32> to vector<4x24x32xbf16>
    %63 = vector.shape_cast %58 : vector<24x128xf32> to vector<24x4x32xf32>
    %64 = tpu.transpose %63, [1, 0, 2] : vector<24x4x32xf32> -> vector<4x24x32xf32>
    %65 = arith.truncf %64 : vector<4x24x32xf32> to vector<4x24x32xbf16>
    %66 = vector.shape_cast %59 : vector<24x128xf32> to vector<24x4x32xf32>
    %67 = tpu.transpose %66, [1, 0, 2] : vector<24x4x32xf32> -> vector<4x24x32xf32>
    %68 = arith.truncf %67 : vector<4x24x32xf32> to vector<4x24x32xbf16>
    "tpu.trace_start"() <{level = 10 : i32, message = "hqd,hkd->hqk"}> : () -> ()
    %cst_59 = arith.constant dense<0.000000e+00> : vector<4x24x24xf32>
    %69 = tpu.matmul %62, %65, %cst_59 {dimension_numbers = #tpu.dot_dimension_numbers<[2], [2], [1], [1], [0, 0, 0, 1, 1, 1], [0], [0]>} : vector<4x24x32xbf16>, vector<4x24x32xbf16>, vector<4x24x24xf32> -> vector<4x24x24xf32>
    "tpu.trace_stop"() : () -> ()
    %cst_60 = arith.constant dense<0xFF800000> : vector<4x24xf32>
    %70 = vector.multi_reduction <maximumf>, %69, %cst_60 [2] : vector<4x24x24xf32> to vector<4x24xf32>
    %71 = vector.shape_cast %70 : vector<4x24xf32> to vector<4x24x1xf32>
    %72 = vector.broadcast %71 : vector<4x24x1xf32> to vector<4x24x24xf32>
    %73 = arith.subf %69, %72 : vector<4x24x24xf32>
    %74 = math.exp %73 : vector<4x24x24xf32>
    %cst_61 = arith.constant dense<0.000000e+00> : vector<4x24xf32>
    %75 = vector.multi_reduction <add>, %74, %cst_61 [2] : vector<4x24x24xf32> to vector<4x24xf32>
    %76 = vector.shape_cast %75 : vector<4x24xf32> to vector<4x24x1xf32>
    %77 = tpu.reciprocal %76 {approx = true} : vector<4x24x1xf32> -> vector<4x24x1xf32>
    %78 = vector.broadcast %77 : vector<4x24x1xf32> to vector<4x24x24xf32>
    %79 = arith.mulf %74, %78 : vector<4x24x24xf32>
    %80 = arith.truncf %79 : vector<4x24x24xf32> to vector<4x24x24xbf16>
    "tpu.trace_start"() <{level = 10 : i32, message = "hqk,hkd->hqd"}> : () -> ()
    %cst_62 = arith.constant dense<0.000000e+00> : vector<4x24x32xf32>
    %81 = tpu.matmul %80, %68, %cst_62 {dimension_numbers = #tpu.dot_dimension_numbers<[2], [1], [1], [2], [0, 0, 0, 1, 1, 2], [0], [0]>} : vector<4x24x24xbf16>, vector<4x24x32xbf16>, vector<4x24x32xf32> -> vector<4x24x32xf32>
    "tpu.trace_stop"() : () -> ()
    %82 = tpu.transpose %81, [1, 0, 2] : vector<4x24x32xf32> -> vector<24x4x32xf32>
    %83 = vector.shape_cast %82 : vector<24x4x32xf32> to vector<24x128xf32>
    %84 = arith.truncf %83 : vector<24x128xf32> to vector<24x128xbf16>
    %cst_63 = arith.constant dense<0.000000e+00> : vector<24x128xf32>
    %85 = tpu.matmul %84, %4, %cst_63 {dimension_numbers = #tpu.dot_dimension_numbers<[1], [0], [0], [1], [0, 0, 1, 1], [], []>} : vector<24x128xbf16>, vector<128x128xbf16>, vector<24x128xf32> -> vector<24x128xf32>
    %86 = vector.broadcast %5 : vector<1x128xf32> to vector<24x128xf32>
    %87 = arith.addf %85, %86 : vector<24x128xf32>
    %88 = arith.addf %28, %87 : vector<24x128xf32>
    %cst_64 = arith.constant dense<0.000000e+00> : vector<24xf32>
    %89 = vector.multi_reduction <add>, %88, %cst_64 [1] : vector<24x128xf32> to vector<24xf32>
    %90 = vector.shape_cast %89 : vector<24xf32> to vector<24x1xf32>
    %cst_65 = arith.constant 1.280000e+02 : f32
    %91 = vector.broadcast %cst_65 : f32 to vector<24x1xf32>
    %92 = arith.divf %90, %91 : vector<24x1xf32>
    %93 = vector.broadcast %92 : vector<24x1xf32> to vector<24x128xf32>
    %94 = arith.subf %88, %93 : vector<24x128xf32>
    %95 = arith.mulf %94, %94 : vector<24x128xf32>
    %cst_66 = arith.constant dense<0.000000e+00> : vector<24xf32>
    %96 = vector.multi_reduction <add>, %95, %cst_66 [1] : vector<24x128xf32> to vector<24xf32>
    %97 = vector.shape_cast %96 : vector<24xf32> to vector<24x1xf32>
    %cst_67 = arith.constant 1.280000e+02 : f32
    %98 = vector.broadcast %cst_67 : f32 to vector<24x1xf32>
    %99 = arith.divf %97, %98 : vector<24x1xf32>
    %100 = vector.broadcast %92 : vector<24x1xf32> to vector<24x128xf32>
    %101 = arith.subf %88, %100 : vector<24x128xf32>
    %cst_68 = arith.constant 9.99999996E-13 : f32
    %102 = vector.broadcast %cst_68 : f32 to vector<24x1xf32>
    %103 = arith.addf %99, %102 : vector<24x1xf32>
    %104 = math.rsqrt %103 : vector<24x1xf32>
    %105 = vector.broadcast %104 : vector<24x1xf32> to vector<24x128xf32>
    %106 = arith.mulf %101, %105 : vector<24x128xf32>
    %107 = vector.broadcast %6 : vector<1x128xf32> to vector<24x128xf32>
    %108 = arith.mulf %106, %107 : vector<24x128xf32>
    %109 = vector.broadcast %7 : vector<1x128xf32> to vector<24x128xf32>
    %110 = arith.addf %108, %109 : vector<24x128xf32>
    %111 = arith.truncf %110 : vector<24x128xf32> to vector<24x128xbf16>
    %cst_69 = arith.constant dense<0.000000e+00> : vector<24x512xf32>
    %112 = tpu.matmul %111, %8, %cst_69 {dimension_numbers = #tpu.dot_dimension_numbers<[1], [0], [0], [1], [0, 0, 1, 1], [], []>} : vector<24x128xbf16>, vector<128x512xbf16>, vector<24x512xf32> -> vector<24x512xf32>
    %113 = vector.broadcast %9 : vector<1x512xf32> to vector<24x512xf32>
    %114 = arith.addf %112, %113 : vector<24x512xf32>
    %115 = arith.mulf %114, %114 : vector<24x512xf32>
    %116 = arith.mulf %114, %115 : vector<24x512xf32>
    %cst_70 = arith.constant 4.471500e-02 : f32
    %117 = vector.broadcast %cst_70 : f32 to vector<24x512xf32>
    %118 = arith.mulf %117, %116 : vector<24x512xf32>
    %119 = arith.addf %114, %118 : vector<24x512xf32>
    %cst_71 = arith.constant 0.797884583 : f32
    %120 = vector.broadcast %cst_71 : f32 to vector<24x512xf32>
    %121 = arith.mulf %120, %119 : vector<24x512xf32>
    %122 = math.tanh %121 : vector<24x512xf32>
    %cst_72 = arith.constant 1.000000e+00 : f32
    %123 = vector.broadcast %cst_72 : f32 to vector<24x512xf32>
    %124 = arith.addf %123, %122 : vector<24x512xf32>
    %cst_73 = arith.constant 5.000000e-01 : f32
    %125 = vector.broadcast %cst_73 : f32 to vector<24x512xf32>
    %126 = arith.mulf %125, %124 : vector<24x512xf32>
    %127 = arith.mulf %114, %126 : vector<24x512xf32>
    %128 = arith.truncf %127 : vector<24x512xf32> to vector<24x512xbf16>
    %cst_74 = arith.constant dense<0.000000e+00> : vector<24x128xf32>
    %129 = tpu.matmul %128, %10, %cst_74 {dimension_numbers = #tpu.dot_dimension_numbers<[1], [0], [0], [1], [0, 0, 1, 1], [], []>} : vector<24x512xbf16>, vector<512x128xbf16>, vector<24x128xf32> -> vector<24x128xf32>
    %130 = vector.broadcast %11 : vector<1x128xf32> to vector<24x128xf32>
    %131 = arith.addf %129, %130 : vector<24x128xf32>
    %132 = arith.addf %131, %88 : vector<24x128xf32>
    %133 = vector.extract_strided_slice %132 {offsets = [0, 0], sizes = [16, 128], strides = [1, 1]} : vector<24x128xf32> to vector<16x128xf32>
    %c0_75 = arith.constant 0 : index
    %c0_76 = arith.constant 0 : index
    %c0_77 = arith.constant 0 : index
    %134 = vector.load %arg27[%c0_75, %c0_76, %c0_77] : memref<1x16x128xf32, #tpu.memory_space<vmem>>, vector<1x16x128xf32>
    %135 = vector.shape_cast %134 : vector<1x16x128xf32> to vector<16x128xf32>
    %136 = vector.shape_cast %133 : vector<16x128xf32> to vector<1x16x128xf32>
    tpu.vector_store %arg27[%c0_75, %c0_76, %c0_77], %136 {strides = array<i32>} : memref<1x16x128xf32, #tpu.memory_space<vmem>>, vector<1x16x128xf32>,
    %137 = vector.extract_strided_slice %132 {offsets = [16, 0], sizes = [8, 128], strides = [1, 1]} : vector<24x128xf32> to vector<8x128xf32>
    %cst_78 = arith.constant dense<0.000000e+00> : vector<8xf32>
    %138 = vector.multi_reduction <add>, %137, %cst_78 [1] : vector<8x128xf32> to vector<8xf32>
    %139 = vector.shape_cast %138 : vector<8xf32> to vector<8x1xf32>
    %cst_79 = arith.constant 1.280000e+02 : f32
    %140 = vector.broadcast %cst_79 : f32 to vector<8x1xf32>
    %141 = arith.divf %139, %140 : vector<8x1xf32>
    %142 = vector.broadcast %141 : vector<8x1xf32> to vector<8x128xf32>
    %143 = arith.subf %137, %142 : vector<8x128xf32>
    %144 = arith.mulf %143, %143 : vector<8x128xf32>
    %cst_80 = arith.constant dense<0.000000e+00> : vector<8xf32>
    %145 = vector.multi_reduction <add>, %144, %cst_80 [1] : vector<8x128xf32> to vector<8xf32>
    %146 = vector.shape_cast %145 : vector<8xf32> to vector<8x1xf32>
    %cst_81 = arith.constant 1.280000e+02 : f32
    %147 = vector.broadcast %cst_81 : f32 to vector<8x1xf32>
    %148 = arith.divf %146, %147 : vector<8x1xf32>
    %149 = vector.broadcast %141 : vector<8x1xf32> to vector<8x128xf32>
    %150 = arith.subf %137, %149 : vector<8x128xf32>
    %cst_82 = arith.constant 9.99999996E-13 : f32
    %151 = vector.broadcast %cst_82 : f32 to vector<8x1xf32>
    %152 = arith.addf %148, %151 : vector<8x1xf32>
    %153 = math.rsqrt %152 : vector<8x1xf32>
    %154 = vector.broadcast %153 : vector<8x1xf32> to vector<8x128xf32>
    %155 = arith.mulf %150, %154 : vector<8x128xf32>
    %156 = vector.broadcast %12 : vector<1x128xf32> to vector<8x128xf32>
    %157 = arith.mulf %155, %156 : vector<8x128xf32>
    %158 = vector.broadcast %13 : vector<1x128xf32> to vector<8x128xf32>
    %159 = arith.addf %157, %158 : vector<8x128xf32>
    %160 = arith.truncf %159 : vector<8x128xf32> to vector<8x128xbf16>
    %cst_83 = arith.constant dense<0.000000e+00> : vector<8x384xf32>
    %161 = tpu.matmul %160, %14, %cst_83 {dimension_numbers = #tpu.dot_dimension_numbers<[1], [0], [0], [1], [0, 0, 1, 1], [], []>} : vector<8x128xbf16>, vector<128x384xbf16>, vector<8x384xf32> -> vector<8x384xf32>
    %162 = vector.broadcast %15 : vector<1x384xf32> to vector<8x384xf32>
    %163 = arith.addf %161, %162 : vector<8x384xf32>
    %164 = vector.extract_strided_slice %163 {offsets = [0, 0], sizes = [8, 128], strides = [1, 1]} : vector<8x384xf32> to vector<8x128xf32>
    %cst_84 = arith.constant 0.176776692 : f32
    %165 = vector.broadcast %cst_84 : f32 to vector<8x128xf32>
    %166 = arith.mulf %164, %165 : vector<8x128xf32>
    %167 = vector.extract_strided_slice %163 {offsets = [0, 128], sizes = [8, 128], strides = [1, 1]} : vector<8x384xf32> to vector<8x128xf32>
    %168 = vector.extract_strided_slice %163 {offsets = [0, 256], sizes = [8, 128], strides = [1, 1]} : vector<8x384xf32> to vector<8x128xf32>
    %169 = vector.shape_cast %166 : vector<8x128xf32> to vector<8x4x32xf32>
    %170 = tpu.transpose %169, [1, 0, 2] : vector<8x4x32xf32> -> vector<4x8x32xf32>
    %171 = arith.truncf %170 : vector<4x8x32xf32> to vector<4x8x32xbf16>
    %172 = vector.shape_cast %167 : vector<8x128xf32> to vector<8x4x32xf32>
    %173 = tpu.transpose %172, [1, 0, 2] : vector<8x4x32xf32> -> vector<4x8x32xf32>
    %174 = arith.truncf %173 : vector<4x8x32xf32> to vector<4x8x32xbf16>
    %175 = vector.shape_cast %168 : vector<8x128xf32> to vector<8x4x32xf32>
    %176 = tpu.transpose %175, [1, 0, 2] : vector<8x4x32xf32> -> vector<4x8x32xf32>
    %177 = arith.truncf %176 : vector<4x8x32xf32> to vector<4x8x32xbf16>
    "tpu.trace_start"() <{level = 10 : i32, message = "hqd,hkd->hqk"}> : () -> ()
    %cst_85 = arith.constant dense<0.000000e+00> : vector<4x8x8xf32>
    %178 = tpu.matmul %171, %174, %cst_85 {dimension_numbers = #tpu.dot_dimension_numbers<[2], [2], [1], [1], [0, 0, 0, 1, 1, 1], [0], [0]>} : vector<4x8x32xbf16>, vector<4x8x32xbf16>, vector<4x8x8xf32> -> vector<4x8x8xf32>
    "tpu.trace_stop"() : () -> ()
    %cst_86 = arith.constant dense<0xFF800000> : vector<4x8xf32>
    %179 = vector.multi_reduction <maximumf>, %178, %cst_86 [2] : vector<4x8x8xf32> to vector<4x8xf32>
    %180 = vector.shape_cast %179 : vector<4x8xf32> to vector<4x8x1xf32>
    %181 = vector.broadcast %180 : vector<4x8x1xf32> to vector<4x8x8xf32>
    %182 = arith.subf %178, %181 : vector<4x8x8xf32>
    %183 = math.exp %182 : vector<4x8x8xf32>
    %cst_87 = arith.constant dense<0.000000e+00> : vector<4x8xf32>
    %184 = vector.multi_reduction <add>, %183, %cst_87 [2] : vector<4x8x8xf32> to vector<4x8xf32>
    %185 = vector.shape_cast %184 : vector<4x8xf32> to vector<4x8x1xf32>
    %186 = tpu.reciprocal %185 {approx = true} : vector<4x8x1xf32> -> vector<4x8x1xf32>
    %187 = vector.broadcast %186 : vector<4x8x1xf32> to vector<4x8x8xf32>
    %188 = arith.mulf %183, %187 : vector<4x8x8xf32>
    %189 = arith.truncf %188 : vector<4x8x8xf32> to vector<4x8x8xbf16>
    "tpu.trace_start"() <{level = 10 : i32, message = "hqk,hkd->hqd"}> : () -> ()
    %cst_88 = arith.constant dense<0.000000e+00> : vector<4x8x32xf32>
    %190 = tpu.matmul %189, %177, %cst_88 {dimension_numbers = #tpu.dot_dimension_numbers<[2], [1], [1], [2], [0, 0, 0, 1, 1, 2], [0], [0]>} : vector<4x8x8xbf16>, vector<4x8x32xbf16>, vector<4x8x32xf32> -> vector<4x8x32xf32>
    "tpu.trace_stop"() : () -> ()
    %191 = tpu.transpose %190, [1, 0, 2] : vector<4x8x32xf32> -> vector<8x4x32xf32>
    %192 = vector.shape_cast %191 : vector<8x4x32xf32> to vector<8x128xf32>
    %193 = arith.truncf %192 : vector<8x128xf32> to vector<8x128xbf16>
    %cst_89 = arith.constant dense<0.000000e+00> : vector<8x128xf32>
    %194 = tpu.matmul %193, %16, %cst_89 {dimension_numbers = #tpu.dot_dimension_numbers<[1], [0], [0], [1], [0, 0, 1, 1], [], []>} : vector<8x128xbf16>, vector<128x128xbf16>, vector<8x128xf32> -> vector<8x128xf32>
    %195 = vector.broadcast %17 : vector<1x128xf32> to vector<8x128xf32>
    %196 = arith.addf %194, %195 : vector<8x128xf32>
    %197 = arith.addf %137, %196 : vector<8x128xf32>
    %cst_90 = arith.constant dense<0.000000e+00> : vector<8xf32>
    %198 = vector.multi_reduction <add>, %197, %cst_90 [1] : vector<8x128xf32> to vector<8xf32>
    %199 = vector.shape_cast %198 : vector<8xf32> to vector<8x1xf32>
    %cst_91 = arith.constant 1.280000e+02 : f32
    %200 = vector.broadcast %cst_91 : f32 to vector<8x1xf32>
    %201 = arith.divf %199, %200 : vector<8x1xf32>
    %202 = vector.broadcast %201 : vector<8x1xf32> to vector<8x128xf32>
    %203 = arith.subf %197, %202 : vector<8x128xf32>
    %204 = arith.mulf %203, %203 : vector<8x128xf32>
    %cst_92 = arith.constant dense<0.000000e+00> : vector<8xf32>
    %205 = vector.multi_reduction <add>, %204, %cst_92 [1] : vector<8x128xf32> to vector<8xf32>
    %206 = vector.shape_cast %205 : vector<8xf32> to vector<8x1xf32>
    %cst_93 = arith.constant 1.280000e+02 : f32
    %207 = vector.broadcast %cst_93 : f32 to vector<8x1xf32>
    %208 = arith.divf %206, %207 : vector<8x1xf32>
    %209 = vector.broadcast %201 : vector<8x1xf32> to vector<8x128xf32>
    %210 = arith.subf %197, %209 : vector<8x128xf32>
    %cst_94 = arith.constant 9.99999996E-13 : f32
    %211 = vector.broadcast %cst_94 : f32 to vector<8x1xf32>
    %212 = arith.addf %208, %211 : vector<8x1xf32>
    %213 = math.rsqrt %212 : vector<8x1xf32>
    %214 = vector.broadcast %213 : vector<8x1xf32> to vector<8x128xf32>
    %215 = arith.mulf %210, %214 : vector<8x128xf32>
    %216 = vector.broadcast %18 : vector<1x128xf32> to vector<8x128xf32>
    %217 = arith.mulf %215, %216 : vector<8x128xf32>
    %218 = vector.broadcast %19 : vector<1x128xf32> to vector<8x128xf32>
    %219 = arith.addf %217, %218 : vector<8x128xf32>
    %220 = arith.truncf %219 : vector<8x128xf32> to vector<8x128xbf16>
    %cst_95 = arith.constant dense<0.000000e+00> : vector<8x512xf32>
    %221 = tpu.matmul %220, %20, %cst_95 {dimension_numbers = #tpu.dot_dimension_numbers<[1], [0], [0], [1], [0, 0, 1, 1], [], []>} : vector<8x128xbf16>, vector<128x512xbf16>, vector<8x512xf32> -> vector<8x512xf32>
    %222 = vector.broadcast %21 : vector<1x512xf32> to vector<8x512xf32>
    %223 = arith.addf %221, %222 : vector<8x512xf32>
    %224 = arith.mulf %223, %223 : vector<8x512xf32>
    %225 = arith.mulf %223, %224 : vector<8x512xf32>
    %cst_96 = arith.constant 4.471500e-02 : f32
    %226 = vector.broadcast %cst_96 : f32 to vector<8x512xf32>
    %227 = arith.mulf %226, %225 : vector<8x512xf32>
    %228 = arith.addf %223, %227 : vector<8x512xf32>
    %cst_97 = arith.constant 0.797884583 : f32
    %229 = vector.broadcast %cst_97 : f32 to vector<8x512xf32>
    %230 = arith.mulf %229, %228 : vector<8x512xf32>
    %231 = math.tanh %230 : vector<8x512xf32>
    %cst_98 = arith.constant 1.000000e+00 : f32
    %232 = vector.broadcast %cst_98 : f32 to vector<8x512xf32>
    %233 = arith.addf %232, %231 : vector<8x512xf32>
    %cst_99 = arith.constant 5.000000e-01 : f32
    %234 = vector.broadcast %cst_99 : f32 to vector<8x512xf32>
    %235 = arith.mulf %234, %233 : vector<8x512xf32>
    %236 = arith.mulf %223, %235 : vector<8x512xf32>
    %237 = arith.truncf %236 : vector<8x512xf32> to vector<8x512xbf16>
    %cst_100 = arith.constant dense<0.000000e+00> : vector<8x128xf32>
    %238 = tpu.matmul %237, %22, %cst_100 {dimension_numbers = #tpu.dot_dimension_numbers<[1], [0], [0], [1], [0, 0, 1, 1], [], []>} : vector<8x512xbf16>, vector<512x128xbf16>, vector<8x128xf32> -> vector<8x128xf32>
    %239 = vector.broadcast %23 : vector<1x128xf32> to vector<8x128xf32>
    %240 = arith.addf %238, %239 : vector<8x128xf32>
    %241 = arith.addf %240, %197 : vector<8x128xf32>
    %c0_101 = arith.constant 0 : index
    %c0_102 = arith.constant 0 : index
    %c0_103 = arith.constant 0 : index
    %242 = vector.load %arg28[%c0_101, %c0_102, %c0_103] : memref<1x8x128xf32, #tpu.memory_space<vmem>>, vector<1x8x128xf32>
    %243 = vector.shape_cast %242 : vector<1x8x128xf32> to vector<8x128xf32>
    %244 = vector.shape_cast %241 : vector<8x128xf32> to vector<1x8x128xf32>
    tpu.vector_store %arg28[%c0_101, %c0_102, %c0_103], %244 {strides = array<i32>} : memref<1x8x128xf32, #tpu.memory_space<vmem>>, vector<1x8x128xf32>,
    return
  }
  func.func @transform_0(%arg0: i32) -> (i32, i32, i32) {
    %c0_i32 = arith.constant 0 : i32
    %c0_i32_0 = arith.constant 0 : i32
    %c0_i32_1 = arith.constant 0 : i32
    return %arg0, %c0_i32, %c0_i32_0 : i32, i32, i32
  }
  func.func @transform_1(%arg0: i32) -> (i32, i32, i32) {
    %c0_i32 = arith.constant 0 : i32
    %c0_i32_0 = arith.constant 0 : i32
    %c0_i32_1 = arith.constant 0 : i32
    return %arg0, %c0_i32, %c0_i32_0 : i32, i32, i32
  }
  func.func @transform_2(%arg0: i32) -> (i32, i32) {
    %c0_i32 = arith.constant 0 : i32
    %c0_i32_0 = arith.constant 0 : i32
    %c0_i32_1 = arith.constant 0 : i32
    return %c0_i32, %c0_i32_0 : i32, i32
  }
  func.func @transform_3(%arg0: i32) -> (i32, i32) {
    %c0_i32 = arith.constant 0 : i32
    %c0_i32_0 = arith.constant 0 : i32
    %c0_i32_1 = arith.constant 0 : i32
    return %c0_i32, %c0_i32_0 : i32, i32
  }
  func.func @transform_4(%arg0: i32) -> (i32, i32) {
    %c0_i32 = arith.constant 0 : i32
    %c0_i32_0 = arith.constant 0 : i32
    %c0_i32_1 = arith.constant 0 : i32
    return %c0_i32, %c0_i32_0 : i32, i32
  }
  func.func @transform_5(%arg0: i32) -> (i32, i32) {
    %c0_i32 = arith.constant 0 : i32
    %c0_i32_0 = arith.constant 0 : i32
    %c0_i32_1 = arith.constant 0 : i32
    return %c0_i32, %c0_i32_0 : i32, i32
  }
  func.func @transform_6(%arg0: i32) -> (i32, i32) {
    %c0_i32 = arith.constant 0 : i32
    %c0_i32_0 = arith.constant 0 : i32
    %c0_i32_1 = arith.constant 0 : i32
    return %c0_i32, %c0_i32_0 : i32, i32
  }
  func.func @transform_7(%arg0: i32) -> (i32, i32) {
    %c0_i32 = arith.constant 0 : i32
    %c0_i32_0 = arith.constant 0 : i32
    %c0_i32_1 = arith.constant 0 : i32
    return %c0_i32, %c0_i32_0 : i32, i32
  }
  func.func @transform_8(%arg0: i32) -> (i32, i32) {
    %c0_i32 = arith.constant 0 : i32
    %c0_i32_0 = arith.constant 0 : i32
    %c0_i32_1 = arith.constant 0 : i32
    return %c0_i32, %c0_i32_0 : i32, i32
  }
  func.func @transform_9(%arg0: i32) -> (i32, i32) {
    %c0_i32 = arith.constant 0 : i32
    %c0_i32_0 = arith.constant 0 : i32
    %c0_i32_1 = arith.constant 0 : i32
    return %c0_i32, %c0_i32_0 : i32, i32
  }
  func.func @transform_10(%arg0: i32) -> (i32, i32) {
    %c0_i32 = arith.constant 0 : i32
    %c0_i32_0 = arith.constant 0 : i32
    %c0_i32_1 = arith.constant 0 : i32
    return %c0_i32, %c0_i32_0 : i32, i32
  }
  func.func @transform_11(%arg0: i32) -> (i32, i32) {
    %c0_i32 = arith.constant 0 : i32
    %c0_i32_0 = arith.constant 0 : i32
    %c0_i32_1 = arith.constant 0 : i32
    return %c0_i32, %c0_i32_0 : i32, i32
  }
  func.func @transform_12(%arg0: i32) -> (i32, i32) {
    %c0_i32 = arith.constant 0 : i32
    %c0_i32_0 = arith.constant 0 : i32
    %c0_i32_1 = arith.constant 0 : i32
    return %c0_i32, %c0_i32_0 : i32, i32
  }
  func.func @transform_13(%arg0: i32) -> (i32, i32) {
    %c0_i32 = arith.constant 0 : i32
    %c0_i32_0 = arith.constant 0 : i32
    %c0_i32_1 = arith.constant 0 : i32
    return %c0_i32, %c0_i32_0 : i32, i32
  }
  func.func @transform_14(%arg0: i32) -> (i32, i32) {
    %c0_i32 = arith.constant 0 : i32
    %c0_i32_0 = arith.constant 0 : i32
    %c0_i32_1 = arith.constant 0 : i32
    return %c0_i32, %c0_i32_0 : i32, i32
  }
  func.func @transform_15(%arg0: i32) -> (i32, i32) {
    %c0_i32 = arith.constant 0 : i32
    %c0_i32_0 = arith.constant 0 : i32
    %c0_i32_1 = arith.constant 0 : i32
    return %c0_i32, %c0_i32_0 : i32, i32
  }
  func.func @transform_16(%arg0: i32) -> (i32, i32) {
    %c0_i32 = arith.constant 0 : i32
    %c0_i32_0 = arith.constant 0 : i32
    %c0_i32_1 = arith.constant 0 : i32
    return %c0_i32, %c0_i32_0 : i32, i32
  }
  func.func @transform_17(%arg0: i32) -> (i32, i32) {
    %c0_i32 = arith.constant 0 : i32
    %c0_i32_0 = arith.constant 0 : i32
    %c0_i32_1 = arith.constant 0 : i32
    return %c0_i32, %c0_i32_0 : i32, i32
  }
  func.func @transform_18(%arg0: i32) -> (i32, i32) {
    %c0_i32 = arith.constant 0 : i32
    %c0_i32_0 = arith.constant 0 : i32
    %c0_i32_1 = arith.constant 0 : i32
    return %c0_i32, %c0_i32_0 : i32, i32
  }
  func.func @transform_19(%arg0: i32) -> (i32, i32) {
    %c0_i32 = arith.constant 0 : i32
    %c0_i32_0 = arith.constant 0 : i32
    %c0_i32_1 = arith.constant 0 : i32
    return %c0_i32, %c0_i32_0 : i32, i32
  }
  func.func @transform_20(%arg0: i32) -> (i32, i32) {
    %c0_i32 = arith.constant 0 : i32
    %c0_i32_0 = arith.constant 0 : i32
    %c0_i32_1 = arith.constant 0 : i32
    return %c0_i32, %c0_i32_0 : i32, i32
  }
  func.func @transform_21(%arg0: i32) -> (i32, i32) {
    %c0_i32 = arith.constant 0 : i32
    %c0_i32_0 = arith.constant 0 : i32
    %c0_i32_1 = arith.constant 0 : i32
    return %c0_i32, %c0_i32_0 : i32, i32
  }
  func.func @transform_22(%arg0: i32) -> (i32, i32) {
    %c0_i32 = arith.constant 0 : i32
    %c0_i32_0 = arith.constant 0 : i32
    %c0_i32_1 = arith.constant 0 : i32
    return %c0_i32, %c0_i32_0 : i32, i32
  }
  func.func @transform_23(%arg0: i32) -> (i32, i32) {
    %c0_i32 = arith.constant 0 : i32
    %c0_i32_0 = arith.constant 0 : i32
    %c0_i32_1 = arith.constant 0 : i32
    return %c0_i32, %c0_i32_0 : i32, i32
  }
  func.func @transform_24(%arg0: i32) -> (i32, i32) {
    %c0_i32 = arith.constant 0 : i32
    %c0_i32_0 = arith.constant 0 : i32
    %c0_i32_1 = arith.constant 0 : i32
    return %c0_i32, %c0_i32_0 : i32, i32
  }
  func.func @transform_25(%arg0: i32) -> (i32, i32) {
    %c0_i32 = arith.constant 0 : i32
    %c0_i32_0 = arith.constant 0 : i32
    %c0_i32_1 = arith.constant 0 : i32
    return %c0_i32, %c0_i32_0 : i32, i32
  }
  func.func @transform_26(%arg0: i32) -> (i32, i32, i32) {
    %c0_i32 = arith.constant 0 : i32
    %c0_i32_0 = arith.constant 0 : i32
    %c0_i32_1 = arith.constant 0 : i32
    return %arg0, %c0_i32, %c0_i32_0 : i32, i32, i32
  }
  func.func @transform_27(%arg0: i32) -> (i32, i32, i32) {
    %c0_i32 = arith.constant 0 : i32
    %c0_i32_0 = arith.constant 0 : i32
    %c0_i32_1 = arith.constant 0 : i32
    return %arg0, %c0_i32, %c0_i32_0 : i32, i32, i32
  }
}

</mosaic_0001>

<bundles_post_ra>
// kernel: tpu_custom_call.1
= control target key start
LH: loop header
LB: loop body
LE: loop exit
PB: predicated region body
PF: predicated region fallthrough
CT: control target
= control target key end

     0   :  { %s11184_s0 = inlined_call_operand.hbm [shape: f32[2,16,128], index: 0, kind: input, shape index: {}]   ;;  %s11185_s1 = inlined_call_operand.hbm [shape: f32[2,8,128], index: 1, kind: input, shape index: {}]   ;;  %s11186_s2 = inlined_call_operand.hbm [shape: f32[1,128], index: 2, kind: input, shape index: {}]   ;;  %s11187_s3 = inlined_call_operand.hbm [shape: f32[1,128], index: 3, kind: input, shape index: {}]   ;;  %s11188_s4 = inlined_call_operand.hbm [shape: bf16[128,384], index: 4, kind: input, shape index: {}]   ;;  %s11189_s5 = inlined_call_operand.hbm [shape: f32[1,384], index: 5, kind: input, shape index: {}]   ;;  %s11190_s6 = inlined_call_operand.hbm [shape: bf16[128,128], index: 6, kind: input, shape index: {}]   ;;  %s11191_s7 = inlined_call_operand.hbm [shape: f32[1,128], index: 7, kind: input, shape index: {}]   ;;  %s11192_s8 = inlined_call_operand.hbm [shape: f32[1,128], index: 8, kind: input, shape index: {}]   ;;  %s11193_s9 = inlined_call_operand.hbm [shape: f32[1,128], index: 9, kind: input, shape index: {}]   ;;  %s11194_s10 = inlined_call_operand.hbm [shape: bf16[128,512], index: 10, kind: input, shape index: {}]   ;;  %s11195_s11 = inlined_call_operand.vmem [shape: f32[1,512], index: 11, kind: input, shape index: {}]   ;;  %s11196_s12 = inlined_call_operand.hbm [shape: bf16[512,128], index: 12, kind: input, shape index: {}]   ;;  %s11197_s13 = inlined_call_operand.hbm [shape: f32[1,128], index: 13, kind: input, shape index: {}]   ;;  %s11198_s14 = inlined_call_operand.hbm [shape: f32[1,128], index: 14, kind: input, shape index: {}]   ;;  %s11199_s15 = inlined_call_operand.hbm [shape: f32[1,128], index: 15, kind: input, shape index: {}]   ;;  %s11200_s16 = inlined_call_operand.hbm [shape: bf16[128,384], index: 16, kind: input, shape index: {}]   ;;  %s11201_s17 = inlined_call_operand.hbm [shape: f32[1,384], index: 17, kind: input, shape index: {}]   ;;  %s11202_s18 = inlined_call_operand.vmem [shape: bf16[128,128], index: 18, kind: input, shape index: {}]   ;;  %s11203_s19 = inlined_call_operand.vmem [shape: f32[1,128], index: 19, kind: input, shape index: {}]   ;;  %s11204_s20 = inlined_call_operand.vmem [shape: f32[1,128], index: 20, kind: input, shape index: {}]   ;;  %s11205_s21 = inlined_call_operand.vmem [shape: f32[1,128], index: 21, kind: input, shape index: {}]   ;;  %s11206_s22 = inlined_call_operand.hbm [shape: bf16[128,512], index: 22, kind: input, shape index: {}]   ;;  %s11207_s23 = inlined_call_operand.vmem [shape: f32[1,512], index: 23, kind: input, shape index: {}]   ;;  %s11208_s24 = inlined_call_operand.hbm [shape: bf16[512,128], index: 24, kind: input, shape index: {}]   ;;  %s11209_s25 = inlined_call_operand.vmem [shape: f32[1,128], index: 25, kind: input, shape index: {}]   ;;  %s11210_s26 = inlined_call_operand.hbm [shape: f32[2,16,128], index: 26, kind: output, shape index: {0}]   ;;  %s11211_s27 = inlined_call_operand.hbm [shape: f32[2,8,128], index: 27, kind: output, shape index: {1}]  }
   0x1   :  { %11247 = sst [smem:[#allocation48_spill]] %s11184_s0 }
   0x2   :  { %11248 = sst [smem:[#allocation49_spill]] %s11185_s1 }
   0x3   :  { %11249 = sst [smem:[#allocation50_spill]] %s11186_s2 }
   0x4   :  { %11250 = sst [smem:[#allocation51_spill]] %s11187_s3 }
   0x5   :  { %11251 = sst [smem:[#allocation52_spill]] %s11188_s4 }
   0x6   :  { %11252 = sst [smem:[#allocation53_spill]] %s11189_s5 }
   0x7   :  { %11253 = sst [smem:[#allocation54_spill]] %s11190_s6 }
   0x8   :  { %11254 = sst [smem:[#allocation55_spill]] %s11191_s7 }
   0x9   :  { %11255 = sst [smem:[#allocation56_spill]] %s11192_s8 }
   0xa   :  { %11256 = sst [smem:[#allocation57_spill]] %s11193_s9 }
   0xb   :  { %11257 = sst [smem:[#allocation58_spill]] %s11194_s10 }
   0xc   :  { %11258 = sst [smem:[#allocation59_spill]] %s11195_s11 }
   0xd   :  { %11259 = sst [smem:[#allocation60_spill]] %s11196_s12 }
   0xe   :  { %11260 = sst [smem:[#allocation61_spill]] %s11197_s13 }
   0xf   :  { %11261 = sst [smem:[#allocation62_spill]] %s11198_s14 }
  0x10   :  { %11262 = sst [smem:[#allocation63_spill]] %s11199_s15 }
  0x11   :  { %11263 = sst [smem:[#allocation64_spill]] %s11200_s16 }
  0x12   :  { %11264 = sst [smem:[#allocation65_spill]] %s11201_s17 }
  0x13   :  { %11265 = sst [smem:[#allocation66_spill]] %s11202_s18 }
  0x14   :  { %11266 = sst [smem:[#allocation67_spill]] %s11203_s19 }
  0x15   :  { %11267 = sst [smem:[#allocation68_spill]] %s11204_s20 }
  0x16   :  { %11268 = sst [smem:[#allocation69_spill]] %s11205_s21 }
  0x17   :  { %11269 = sst [smem:[#allocation70_spill]] %s11206_s22 }
  0x18   :  { %11270 = sst [smem:[#allocation71_spill]] %s11207_s23 }
  0x19   :  { %11271 = sst [smem:[#allocation72_spill]] %s11209_s25 }
  0x1a   :  { %11272 = sst [smem:[#allocation73_spill]] %s11210_s26 }
  0x1b   :  { %11273 = sst [smem:[#allocation74_spill]] %s11211_s27 }
  0x1c   :  { %33 = vsyncpa [#allocation3], 0 }
  0x1d   :  { %35 = vsyncpa [#allocation3 + $0x1], 0 }
  0x1e   :  { %36 = vsyncpa [#allocation6], 0 }
  0x1f   :  { %38 = vsyncpa [#allocation6 + $0x1], 0 }
  0x20   :  { %39 = vsyncpa [#allocation9], 0 }
  0x21   :  { %40 = vsyncpa [#allocation12], 0 }
  0x22   :  { %41 = vsyncpa [#allocation15], 0 }
  0x23   :  { %42 = vsyncpa [#allocation18], 0 }
  0x24   :  { %43 = vsyncpa [#allocation21], 0 }
  0x25   :  { %44 = vsyncpa [#allocation24], 0 }
  0x26   :  { %45 = vsyncpa [#allocation27], 0 }
  0x27   :  { %46 = vsyncpa [#allocation30], 0 }
  0x28   :  { %47 = vsyncpa [#allocation4], 0 }
  0x29   :  { %49 = vsyncpa [#allocation4 + $0x1], 0 }
  0x2a   :  { %50 = vsyncpa [#allocation34], 0 }
  0x2b   :  { %52 = vsyncpa [#allocation34 + $0x1], 0  ;;  %s9453_s7 = smov 0   ;;  %s9455_s4 = smov 0  }
  0x2c   :  { %s9457_s8 = smov 0   ;;  %s9459_s30 = smov 0  }
  0x2d LB: > { %s9274_s9 = smov [#allocation7]   ;;  %s9474_s28 = sadd.s32 4294967295, %s9272_s30   ;;  %s9272_s30 = sphi %s9459_s30, %s11342_s30   ;;  %s9268_s8 = sphi %s9457_s8, %s11341_s8   ;;  %s9264_s4 = sphi %s9455_s4, %s11340_s4   ;;  %s9260_s7 = sphi %s9453_s7, %s11339_s7  }
  0x2e   : > { %s684_s5 = sshll.u32 %s9274_s9, 4  ;;  %p7278_p0 = scmp.ge.s32.totalorder %s9272_s30, 1  ;;  %s9479_s5 = int_to_ptr.vmem [resolvable:$true] %s684_s5 }
  0x2f   : > { %p11228_p1 = scmp.eq.s32.totalorder %s9474_s28, 0  ;;  %p671_p2 = scmp.lt.s32.totalorder %s9272_s30, 3 }
  0x30   : > { %s9275_s10 = smov [#allocation8]   ;;  %s9276_s1 = smov [#allocation11]  }
  0x31   : > { %p9481_p3 = pnand %p7278_p0, %p671_p2  ;;  %s695_s29 = sshll.u32 %s9275_s10, 4  ;;  %s9488_s29 = int_to_ptr.vmem [resolvable:$true] %s695_s29 }
  0x32   : > { %s719_s6 = sshll.u32 %s9276_s1, 4  ;;  %s9277_s2 = smov [#allocation14]   ;;  %s9496_s6 = int_to_ptr.vmem [resolvable:$true] %s719_s6 }
  0x33   : > { %s11274_s0 = scalar_select %p9481_p3, 1, 0 }
  0x34   : > { %p8059_p5 = pneg %p9481_p3  ;;  %s9498_s3 = sshll.u32 %s9277_s2, 4  ;;  %s744_s3 = int_to_ptr.vmem [resolvable:$true] %s9498_s3 }
  0x35   : > { %s11276_s25 = sld [smem:[#allocation50_spill]] }
  0x36   : > { %p9492_p6 = pnand %p8059_p5, %p11228_p1 }
  0x38   : > { %p9508_p8 = pneg %p9492_p6 }
  0x3b   : > { %s8598_s26 = scalar_lea.hbm %s11276_s25, 16 }
  0x3c   : > { %p8599_p7 = scmp.ne.s32.totalorder %s11276_s25, %s8598_s26  ;;  %p8605_p11 = scmp.lt.u32.totalorder %s8598_s26, %s11276_s25 }
  0x3e   : > { %p8601_p9 = pnand %p9508_p8, %p8599_p7 }
  0x40   : > { %p8602_p10 = pneg %p8601_p9 }
  0x42   : > { %p8607_p12 = pnand %p8605_p11, %p8602_p10 }
  0x44   : > { %8610 = shalt.err (!%p8607_p12)
}
  0x45   : > { %s8611_s23 = scalar_lea.vmem %s9479_s5, 16  ;;  %s8618_s27 = scalar_lea.vmem %s9479_s5, 32 }
  0x46   : > { %p8612_p13 = scmp.ne.s32.totalorder %s9479_s5, %s8611_s23  ;;  %p8619_p5 = scmp.lt.s32.totalorder %s9479_s5, %s9479_s5 }
  0x47   : > { %p8620_p7 = scmp.lt.s32.totalorder %s8618_s27, %s8611_s23 }
  0x48   : > { %p8614_p0 = pnand %p8612_p13, %p9508_p8 }
  0x49   : > { %p8621_p9 = por %p8620_p7, %p8619_p5 }
  0x4a   : > { %p8615_p2 = pneg %p8614_p0 }
  0x4c   : > { %p8622_p4 = pnand %p8621_p9, %p8615_p2 }
  0x4e   : > { %8625 = shalt.err (!%p8622_p4)
}
  0x4f   : > { %8062 = dma.hbm_to_vmem [thread:$0]  (!%p9492_p6), %s11276_s25, 16, %s9479_s5, [#allocation6]  }
  0x50   : > { %s11278_s2 = sld [smem:[#allocation51_spill]] }
  0x56   : > { %s8626_s20 = scalar_lea.hbm %s11278_s2, 16 }
  0x57   : > { %p8627_p10 = scmp.ne.s32.totalorder %s11278_s2, %s8626_s20  ;;  %p8633_p4 = scmp.lt.u32.totalorder %s8626_s20, %s11278_s2 }
  0x59   : > { %p8629_p11 = pnand %p8627_p10, %p9508_p8 }
  0x5b   : > { %p8630_p12 = pneg %p8629_p11 }
  0x5d   : > { %p8635_p13 = pnand %p8633_p4, %p8630_p12 }
  0x5f   : > { %8638 = shalt.err (!%p8635_p13)
}
  0x60   : > { %s8639_s5 = scalar_lea.vmem %s9488_s29, 16  ;;  %s8646_s18 = scalar_lea.vmem %s9488_s29, 32 }
  0x61   : > { %p8640_p0 = scmp.ne.s32.totalorder %s9488_s29, %s8639_s5  ;;  %p8647_p7 = scmp.lt.s32.totalorder %s9488_s29, %s9488_s29 }
  0x62   : > { %p8648_p9 = scmp.lt.s32.totalorder %s8646_s18, %s8639_s5 }
  0x63   : > { %p8642_p2 = pnand %p8640_p0, %p9508_p8 }
  0x64   : > { %p8649_p10 = por %p8648_p9, %p8647_p7 }
  0x65   : > { %p8643_p5 = pneg %p8642_p2 }
  0x67   : > { %p8650_p11 = pnand %p8649_p10, %p8643_p5 }
  0x69   : > { %8653 = shalt.err (!%p8650_p11)
}
  0x6a   : > { %8065 = dma.hbm_to_vmem [thread:$0]  (!%p9492_p6), %s11278_s2, 16, %s9488_s29, [#allocation9]  }
  0x6b   : > { %s11279_s9 = sld [smem:[#allocation53_spill]] }
  0x71   : > { %s8654_s10 = scalar_lea.hbm %s11279_s9, 48 }
  0x72   : > { %p8655_p12 = scmp.ne.s32.totalorder %s11279_s9, %s8654_s10  ;;  %p8661_p0 = scmp.lt.u32.totalorder %s8654_s10, %s11279_s9 }
  0x74   : > { %p8657_p4 = pnand %p8655_p12, %p9508_p8 }
  0x76   : > { %p8658_p13 = pneg %p8657_p4 }
  0x78   : > { %p8663_p2 = pnand %p8661_p0, %p8658_p13 }
  0x7a   : > { %8666 = shalt.err (!%p8663_p2)
}
  0x7b   : > { %s8667_s29 = scalar_lea.vmem %s9496_s6, 48  ;;  %s8674_s19 = scalar_lea.vmem %s9496_s6, 64 }
  0x7c   : > { %p8668_p5 = scmp.ne.s32.totalorder %s9496_s6, %s8667_s29  ;;  %p8675_p10 = scmp.lt.s32.totalorder %s9496_s6, %s9496_s6 }
  0x7d   : > { %p8676_p11 = scmp.lt.s32.totalorder %s8674_s19, %s8667_s29 }
  0x7e   : > { %p8670_p7 = pnand %p8668_p5, %p9508_p8 }
  0x7f   : > { %p8677_p12 = por %p8676_p11, %p8675_p10 }
  0x80   : > { %p8671_p9 = pneg %p8670_p7 }
  0x82   : > { %p8678_p4 = pnand %p8677_p12, %p8671_p9 }
  0x84   : > { %8681 = shalt.err (!%p8678_p4)
}
  0x85   : > { %8071 = dma.hbm_to_vmem [thread:$0]  (!%p9492_p6), %s11279_s9, 48, %s9496_s6, [#allocation12]  }
  0x86   : > { %s9278_s26 = smov [#allocation17]   ;;  %s11280_s5 = sld [smem:[#allocation55_spill]] }
  0x87   : > { %s765_s10 = sshll.u32 %s9278_s26, 4  ;;  %s766_s10 = int_to_ptr.vmem [resolvable:$true] %s765_s10 }
  0x8c   : > { %s8682_s18 = scalar_lea.hbm %s11280_s5, 16 }
  0x8d   : > { %p8683_p13 = scmp.ne.s32.totalorder %s11280_s5, %s8682_s18  ;;  %p8689_p5 = scmp.lt.u32.totalorder %s8682_s18, %s11280_s5 }
  0x8f   : > { %p8685_p0 = pnand %p8683_p13, %p9508_p8 }
  0x91   : > { %p8686_p2 = pneg %p8685_p0 }
  0x93   : > { %p8691_p7 = pnand %p8689_p5, %p8686_p2 }
  0x95   : > { %8694 = shalt.err (!%p8691_p7)
}
  0x96   : > { %s8695_s6 = scalar_lea.vmem %s744_s3, 16  ;;  %s8702_s20 = scalar_lea.vmem %s744_s3, 32 }
  0x97   : > { %p8696_p9 = scmp.ne.s32.totalorder %s744_s3, %s8695_s6  ;;  %p8703_p12 = scmp.lt.s32.totalorder %s744_s3, %s744_s3 }
  0x98   : > { %p8704_p4 = scmp.lt.s32.totalorder %s8702_s20, %s8695_s6 }
  0x99   : > { %p8698_p10 = pnand %p8696_p9, %p9508_p8 }
  0x9a   : > { %p8705_p1 = por %p8704_p4, %p8703_p12 }
  0x9b   : > { %p8699_p11 = pneg %p8698_p10 }
  0x9d   : > { %p8706_p3 = pnand %p8705_p1, %p8699_p11 }
  0x9f   : > { %8709 = shalt.err (!%p8706_p3)
}
  0xa0   : > { %8077 = dma.hbm_to_vmem [thread:$0]  (!%p9492_p6), %s11280_s5, 16, %s744_s3, [#allocation15]  }
  0xa1   : > { %s11281_s23 = sld [smem:[#allocation57_spill]] }
  0xa7   : > { %s8710_s27 = scalar_lea.hbm %s11281_s23, 16 }
  0xa8   : > { %p8711_p13 = scmp.ne.s32.totalorder %s11281_s23, %s8710_s27  ;;  %p8717_p3 = scmp.lt.u32.totalorder %s8710_s27, %s11281_s23 }
  0xaa   : > { %p8713_p0 = pnand %p8711_p13, %p9508_p8 }
  0xac   : > { %p8714_p1 = pneg %p8713_p0 }
  0xae   : > { %p8719_p2 = pnand %p8717_p3, %p8714_p1 }
  0xb0   : > { %8722 = shalt.err (!%p8719_p2)
}
  0xb1   : > { %s8723_s20 = scalar_lea.vmem %s766_s10, 16  ;;  %s8730_s3 = scalar_lea.vmem %s766_s10, 32 }
  0xb2   : > { %p8724_p5 = scmp.ne.s32.totalorder %s766_s10, %s8723_s20  ;;  %p8731_p10 = scmp.lt.s32.totalorder %s766_s10, %s766_s10 }
  0xb3   : > { %p8732_p11 = scmp.lt.s32.totalorder %s8730_s3, %s8723_s20 }
  0xb4   : > { %p8726_p7 = pnand %p8724_p5, %p9508_p8 }
  0xb5   : > { %p8733_p12 = por %p8732_p11, %p8731_p10 }
  0xb6   : > { %p8727_p9 = pneg %p8726_p7 }
  0xb8   : > { %p8734_p4 = pnand %p8733_p12, %p8727_p9 }
  0xba   : > { %8737 = shalt.err (!%p8734_p4)
}
  0xbb   : > { %8083 = dma.hbm_to_vmem [thread:$0]  (!%p9492_p6), %s11281_s23, 16, %s766_s10, [#allocation18]  }
  0xbc   : > { %s9279_s25 = smov [#allocation20]   ;;  %s9280_s27 = smov [#allocation23]  }
  0xbd   : > { %s791_s2 = sshll.u32 %s9279_s25, 4  ;;  %s816_s18 = sshll.u32 %s9280_s27, 4  ;;  %s792_s2 = int_to_ptr.vmem [resolvable:$true] %s791_s2  ;;  %s817_s18 = int_to_ptr.vmem [resolvable:$true] %s816_s18 }
  0xbe   : > { %s11282_s12 = sld [smem:[#allocation60_spill]] }
  0xc4   : > { %s8738_s6 = scalar_lea.hbm %s11282_s12, 4096 }
  0xc5   : > { %p8739_p13 = scmp.ne.s32.totalorder %s11282_s12, %s8738_s6  ;;  %p8745_p3 = scmp.lt.u32.totalorder %s8738_s6, %s11282_s12 }
  0xc7   : > { %p8741_p0 = pnand %p8739_p13, %p9508_p8 }
  0xc9   : > { %p8742_p1 = pneg %p8741_p0 }
  0xcb   : > { %p8747_p2 = pnand %p8745_p3, %p8742_p1 }
  0xcd   : > { %8750 = shalt.err (!%p8747_p2)
}
  0xce   : > { %s8751_s10 = scalar_lea.vmem %s792_s2, 4096  ;;  %p8759_p10 = scmp.lt.s32.totalorder %s792_s2, %s792_s2 }
  0xcf   : > { %p8752_p5 = scmp.ne.s32.totalorder %s792_s2, %s8751_s10  ;;  %p8760_p11 = scmp.lt.s32.totalorder %s8751_s10, %s8751_s10 }
  0xd1   : > { %p8754_p7 = pnand %p8752_p5, %p9508_p8  ;;  %p8761_p12 = por %p8760_p11, %p8759_p10 }
  0xd3   : > { %p8755_p9 = pneg %p8754_p7 }
  0xd5   : > { %p8762_p4 = pnand %p8761_p12, %p8755_p9 }
  0xd7   : > { %8765 = shalt.err (!%p8762_p4)
}
  0xd8   : > { %s11231_s26 = smov 64   ;;  %s11233_s25 = smov 4  }
  0xd9   : > { %8089 = dma.hbm_to_vmem [thread:$0]  (!%p9492_p6), %s11282_s12, 4096, %s792_s2, [#allocation21], %s11231_s26, %s11231_s26, %s11233_s25  }
  0xda   : > { %s11283_s14 = sld [smem:[#allocation62_spill]] }
  0xe0   : > { %s8766_s6 = scalar_lea.hbm %s11283_s14, 16 }
  0xe1   : > { %p8767_p13 = scmp.ne.s32.totalorder %s11283_s14, %s8766_s6  ;;  %p8773_p3 = scmp.lt.u32.totalorder %s8766_s6, %s11283_s14 }
  0xe3   : > { %p8769_p0 = pnand %p8767_p13, %p9508_p8 }
  0xe5   : > { %p8770_p1 = pneg %p8769_p0 }
  0xe7   : > { %p8775_p2 = pnand %p8773_p3, %p8770_p1 }
  0xe9   : > { %8778 = shalt.err (!%p8775_p2)
}
  0xea   : > { %s8779_s5 = scalar_lea.vmem %s817_s18, 16  ;;  %s8786_s2 = scalar_lea.vmem %s817_s18, 32 }
  0xeb   : > { %p8780_p5 = scmp.ne.s32.totalorder %s817_s18, %s8779_s5  ;;  %p8787_p10 = scmp.lt.s32.totalorder %s817_s18, %s817_s18 }
  0xec   : > { %p8788_p11 = scmp.lt.s32.totalorder %s8786_s2, %s8779_s5 }
  0xed   : > { %p8782_p7 = pnand %p8780_p5, %p9508_p8 }
  0xee   : > { %p8789_p12 = por %p8788_p11, %p8787_p10 }
  0xef   : > { %p8783_p9 = pneg %p8782_p7 }
  0xf1   : > { %p8790_p4 = pnand %p8789_p12, %p8783_p9 }
  0xf3   : > { %8793 = shalt.err (!%p8790_p4)
}
  0xf4   : > { %8095 = dma.hbm_to_vmem [thread:$0]  (!%p9492_p6), %s11283_s14, 16, %s817_s18, [#allocation24]  }
  0xf5   : > { %s9283_s19 = smov [#allocation26]   ;;  %s11284_s16 = sld [smem:[#allocation64_spill]] }
  0xf6   : > { %s837_s6 = sshll.u32 %s9283_s19, 4  ;;  %s838_s6 = int_to_ptr.vmem [resolvable:$true] %s837_s6 }
  0xfb   : > { %s8794_s21 = scalar_lea.hbm %s11284_s16, 3072 }
  0xfc   : > { %p8795_p13 = scmp.ne.s32.totalorder %s11284_s16, %s8794_s21  ;;  %p8801_p3 = scmp.lt.u32.totalorder %s8794_s21, %s11284_s16 }
  0xfe   : > { %p8797_p0 = pnand %p8795_p13, %p9508_p8 }
 0x100   : > { %p8798_p1 = pneg %p8797_p0 }
 0x102   : > { %p8803_p2 = pnand %p8801_p3, %p8798_p1 }
 0x104   : > { %8806 = shalt.err (!%p8803_p2)
}
 0x105   : > { %s8807_s18 = scalar_lea.vmem %s838_s6, 3072  ;;  %p8815_p10 = scmp.lt.s32.totalorder %s838_s6, %s838_s6 }
 0x106   : > { %p8808_p5 = scmp.ne.s32.totalorder %s838_s6, %s8807_s18  ;;  %p8816_p11 = scmp.lt.s32.totalorder %s8807_s18, %s8807_s18 }
 0x108   : > { %p8810_p7 = pnand %p8808_p5, %p9508_p8  ;;  %p8817_p12 = por %p8816_p11, %p8815_p10 }
 0x10a   : > { %p8811_p9 = pneg %p8810_p7 }
 0x10c   : > { %p8818_p4 = pnand %p8817_p12, %p8811_p9 }
 0x10e   : > { %8821 = shalt.err (!%p8818_p4)
}
 0x10f   : > { %s11236_s26 = smov 192   ;;  %s11237_s27 = smov 12  }
 0x110   : > { %8101 = dma.hbm_to_vmem [thread:$0]  (!%p9492_p6), %s11284_s16, 3072, %s838_s6, [#allocation27], %s11236_s26, %s11236_s26, %s11237_s27  }
 0x111   : > { %s9286_s20 = smov [#allocation29]   ;;  %s9287_s21 = smov [#allocation10]  }
 0x112   : > { %s873_s3 = sshll.u32 %s9286_s20, 4  ;;  %s705_s10 = sshll.u32 %s9287_s21, 4  ;;  %s874_s3 = int_to_ptr.vmem [resolvable:$true] %s873_s3  ;;  %s9675_s10 = int_to_ptr.vmem [resolvable:$true] %s705_s10 }
 0x113   : > { %s11285_s22 = sld [smem:[#allocation70_spill]] }
 0x119   : > { %s8822_s18 = scalar_lea.hbm %s11285_s22, 4096 }
 0x11a   : > { %p8823_p13 = scmp.ne.s32.totalorder %s11285_s22, %s8822_s18  ;;  %p8829_p3 = scmp.lt.u32.totalorder %s8822_s18, %s11285_s22 }
 0x11c   : > { %p8825_p0 = pnand %p8823_p13, %p9508_p8 }
 0x11e   : > { %p8826_p1 = pneg %p8825_p0 }
 0x120   : > { %p8831_p2 = pnand %p8829_p3, %p8826_p1 }
 0x122   : > { %8834 = shalt.err (!%p8831_p2)
}
 0x123   : > { %s8835_s19 = scalar_lea.vmem %s874_s3, 4096  ;;  %p8843_p10 = scmp.lt.s32.totalorder %s874_s3, %s874_s3 }
 0x124   : > { %p8836_p5 = scmp.ne.s32.totalorder %s874_s3, %s8835_s19  ;;  %p8844_p11 = scmp.lt.s32.totalorder %s8835_s19, %s8835_s19 }
 0x126   : > { %p8838_p7 = pnand %p8836_p5, %p9508_p8  ;;  %p8845_p12 = por %p8844_p11, %p8843_p10 }
 0x128   : > { %p8839_p9 = pneg %p8838_p7 }
 0x12a   : > { %p8846_p4 = pnand %p8845_p12, %p8839_p9 }
 0x12c   : > { %8849 = shalt.err (!%p8846_p4)
}
 0x12d   : > { %s11238_s9 = smov 256   ;;  %s11239_s25 = smov 16  }
 0x12e   : > { %8107 = dma.hbm_to_vmem [thread:$0]  (!%p9492_p6), %s11285_s22, 4096, %s874_s3, [#allocation30], %s11238_s9, %s11238_s9, %s11239_s25  }
 0x12f   : > { %s11286_s18 = sld [smem:[#allocation52_spill]] }
 0x135   : > { %s8850_s29 = scalar_lea.hbm %s11286_s18, 3072 }
 0x136   : > { %p8851_p13 = scmp.ne.s32.totalorder %s11286_s18, %s8850_s29  ;;  %p8857_p3 = scmp.lt.u32.totalorder %s8850_s29, %s11286_s18 }
 0x138   : > { %p8853_p0 = pnand %p8851_p13, %p9508_p8 }
 0x13a   : > { %p8854_p1 = pneg %p8853_p0 }
 0x13c   : > { %p8859_p2 = pnand %p8857_p3, %p8854_p1 }
 0x13e   : > { %8862 = shalt.err (!%p8859_p2)
}
 0x13f   : > { %s8863_s3 = scalar_lea.vmem %s9675_s10, 3072  ;;  %p8871_p10 = scmp.lt.s32.totalorder %s9675_s10, %s9675_s10 }
 0x140   : > { %p8864_p5 = scmp.ne.s32.totalorder %s9675_s10, %s8863_s3  ;;  %p8872_p11 = scmp.lt.s32.totalorder %s8863_s3, %s8863_s3 }
 0x142   : > { %p8866_p7 = pnand %p8864_p5, %p9508_p8  ;;  %p8873_p12 = por %p8872_p11, %p8871_p10 }
 0x144   : > { %p8867_p9 = pneg %p8866_p7 }
 0x146   : > { %p8874_p4 = pnand %p8873_p12, %p8867_p9 }
 0x148   : > { %8877 = shalt.err (!%p8874_p4)
}
 0x149   : > { %s11287_s26 = smov 12   ;;  %s11288_s27 = smov 192  }
 0x14a   : > { %8068 = dma.hbm_to_vmem [thread:$0]  (!%p9492_p6), %s11286_s18, 3072, %s9675_s10, [#allocation9], %s11288_s27, %s11288_s27, %s11287_s26  }
 0x14b   : > { %s9290_s5 = smov [#allocation13]   ;;  %s9291_s29 = smov [#allocation16]  }
 0x14c   : > { %s729_s2 = sshll.u32 %s9290_s5, 4  ;;  %s754_s6 = sshll.u32 %s9291_s29, 4  ;;  %s730_s2 = int_to_ptr.vmem [resolvable:$true] %s729_s2  ;;  %s9724_s6 = int_to_ptr.vmem [resolvable:$true] %s754_s6 }
 0x14d   : > { %s11289_s9 = sld [smem:[#allocation54_spill]] }
 0x153   : > { %s8878_s25 = scalar_lea.hbm %s11289_s9, 1024 }
 0x154   : > { %p8879_p13 = scmp.ne.s32.totalorder %s11289_s9, %s8878_s25  ;;  %p8885_p3 = scmp.lt.u32.totalorder %s8878_s25, %s11289_s9 }
 0x156   : > { %p8881_p0 = pnand %p8879_p13, %p9508_p8 }
 0x158   : > { %p8882_p1 = pneg %p8881_p0 }
 0x15a   : > { %p8887_p2 = pnand %p8885_p3, %p8882_p1 }
 0x15c   : > { %8890 = shalt.err (!%p8887_p2)
}
 0x15d   : > { %s8891_s26 = scalar_lea.vmem %s730_s2, 1024  ;;  %p8899_p10 = scmp.lt.s32.totalorder %s730_s2, %s730_s2 }
 0x15e   : > { %p8892_p5 = scmp.ne.s32.totalorder %s730_s2, %s8891_s26  ;;  %p8900_p11 = scmp.lt.s32.totalorder %s8891_s26, %s8891_s26 }
 0x160   : > { %p8894_p7 = pnand %p8892_p5, %p9508_p8  ;;  %p8901_p12 = por %p8900_p11, %p8899_p10 }
 0x162   : > { %p8895_p9 = pneg %p8894_p7 }
 0x164   : > { %p8902_p4 = pnand %p8901_p12, %p8895_p9 }
 0x166   : > { %8905 = shalt.err (!%p8902_p4)
}
 0x167   : > { %s11290_s12 = smov 4   ;;  %s11291_s14 = smov 64  }
 0x168   : > { %8074 = dma.hbm_to_vmem [thread:$0]  (!%p9492_p6), %s11289_s9, 1024, %s730_s2, [#allocation12], %s11291_s14, %s11291_s14, %s11290_s12  }
 0x169   : > { %s11292_s29 = sld [smem:[#allocation56_spill]] }
 0x16f   : > { %s8906_s19 = scalar_lea.hbm %s11292_s29, 16 }
 0x170   : > { %p8907_p13 = scmp.ne.s32.totalorder %s11292_s29, %s8906_s19  ;;  %p8913_p3 = scmp.lt.u32.totalorder %s8906_s19, %s11292_s29 }
 0x172   : > { %p8909_p0 = pnand %p8907_p13, %p9508_p8 }
 0x174   : > { %p8910_p1 = pneg %p8909_p0 }
 0x176   : > { %p8915_p2 = pnand %p8913_p3, %p8910_p1 }
 0x178   : > { %8918 = shalt.err (!%p8915_p2)
}
 0x179   : > { %s8919_s2 = scalar_lea.vmem %s9724_s6, 16  ;;  %s8926_s27 = scalar_lea.vmem %s9724_s6, 32 }
 0x17a   : > { %p8920_p5 = scmp.ne.s32.totalorder %s9724_s6, %s8919_s2  ;;  %p8927_p10 = scmp.lt.s32.totalorder %s9724_s6, %s9724_s6 }
 0x17b   : > { %p8928_p11 = scmp.lt.s32.totalorder %s8926_s27, %s8919_s2 }
 0x17c   : > { %p8922_p7 = pnand %p8920_p5, %p9508_p8 }
 0x17d   : > { %p8929_p12 = por %p8928_p11, %p8927_p10 }
 0x17e   : > { %p8923_p9 = pneg %p8922_p7 }
 0x180   : > { %p8930_p4 = pnand %p8929_p12, %p8923_p9 }
 0x182   : > { %8933 = shalt.err (!%p8930_p4)
}
 0x183   : > { %8080 = dma.hbm_to_vmem [thread:$0]  (!%p9492_p6), %s11292_s29, 16, %s9724_s6, [#allocation15]  }
 0x184   : > { %s9292_s5 = smov [#allocation19]   ;;  %s9293_s3 = smov [#allocation22]  }
 0x185   : > { %s775_s19 = sshll.u32 %s9292_s5, 4  ;;  %s805_s20 = sshll.u32 %s9293_s3, 4  ;;  %s776_s19 = int_to_ptr.vmem [resolvable:$true] %s775_s19  ;;  %s9771_s20 = int_to_ptr.vmem [resolvable:$true] %s805_s20 }
 0x186   : > { %s11293_s2 = sld [smem:[#allocation58_spill]] }
 0x18c   : > { %s8934_s27 = scalar_lea.hbm %s11293_s2, 4096 }
 0x18d   : > { %p8935_p13 = scmp.ne.s32.totalorder %s11293_s2, %s8934_s27  ;;  %p8941_p3 = scmp.lt.u32.totalorder %s8934_s27, %s11293_s2 }
 0x18f   : > { %p8937_p0 = pnand %p8935_p13, %p9508_p8 }
 0x191   : > { %p8938_p1 = pneg %p8937_p0 }
 0x193   : > { %p8943_p2 = pnand %p8941_p3, %p8938_p1 }
 0x195   : > { %8946 = shalt.err (!%p8943_p2)
}
 0x196   : > { %s8947_s21 = scalar_lea.vmem %s776_s19, 4096  ;;  %p8955_p10 = scmp.lt.s32.totalorder %s776_s19, %s776_s19 }
 0x197   : > { %p8948_p5 = scmp.ne.s32.totalorder %s776_s19, %s8947_s21  ;;  %p8956_p11 = scmp.lt.s32.totalorder %s8947_s21, %s8947_s21 }
 0x199   : > { %p8950_p7 = pnand %p8948_p5, %p9508_p8  ;;  %p8957_p12 = por %p8956_p11, %p8955_p10 }
 0x19b   : > { %p8951_p9 = pneg %p8950_p7 }
 0x19d   : > { %p8958_p4 = pnand %p8957_p12, %p8951_p9 }
 0x19f   : > { %8961 = shalt.err (!%p8958_p4)
}
 0x1a0   : > { %s11294_s16 = smov 16   ;;  %s11295_s9 = smov 256  }
 0x1a1   : > { %8086 = dma.hbm_to_vmem [thread:$0]  (!%p9492_p6), %s11293_s2, 4096, %s776_s19, [#allocation18], %s11295_s9, %s11295_s9, %s11294_s16  }
 0x1a2   : > { %s11296_s13 = sld [smem:[#allocation61_spill]] }
 0x1a8   : > { %s8962_s27 = scalar_lea.hbm %s11296_s13, 16 }
 0x1a9   : > { %p8963_p13 = scmp.ne.s32.totalorder %s11296_s13, %s8962_s27  ;;  %p8969_p3 = scmp.lt.u32.totalorder %s8962_s27, %s11296_s13 }
 0x1ab   : > { %p8965_p0 = pnand %p8963_p13, %p9508_p8 }
 0x1ad   : > { %p8966_p1 = pneg %p8965_p0 }
 0x1af   : > { %p8971_p2 = pnand %p8969_p3, %p8966_p1 }
 0x1b1   : > { %8974 = shalt.err (!%p8971_p2)
}
 0x1b2   : > { %s8975_s19 = scalar_lea.vmem %s9771_s20, 16  ;;  %s8982_s16 = scalar_lea.vmem %s9771_s20, 32 }
 0x1b3   : > { %p8976_p5 = scmp.ne.s32.totalorder %s9771_s20, %s8975_s19  ;;  %p8983_p10 = scmp.lt.s32.totalorder %s9771_s20, %s9771_s20 }
 0x1b4   : > { %p8984_p11 = scmp.lt.s32.totalorder %s8982_s16, %s8975_s19 }
 0x1b5   : > { %p8978_p7 = pnand %p8976_p5, %p9508_p8 }
 0x1b6   : > { %p8985_p12 = por %p8984_p11, %p8983_p10 }
 0x1b7   : > { %p8979_p9 = pneg %p8978_p7 }
 0x1b9   : > { %p8986_p4 = pnand %p8985_p12, %p8979_p9 }
 0x1bb   : > { %8989 = shalt.err (!%p8986_p4)
}
 0x1bc   : > { %8092 = dma.hbm_to_vmem [thread:$0]  (!%p9492_p6), %s11296_s13, 16, %s9771_s20, [#allocation21]  }
 0x1bd   : > { %s9294_s5 = smov [#allocation25]   ;;  %s9295_s10 = smov [#allocation28]  }
 0x1be   : > { %s827_s3 = sshll.u32 %s9294_s5, 4  ;;  %s851_s26 = sshll.u32 %s9295_s10, 4  ;;  %s828_s3 = int_to_ptr.vmem [resolvable:$true] %s827_s3  ;;  %s9818_s26 = int_to_ptr.vmem [resolvable:$true] %s851_s26 }
 0x1bf   : > { %s11297_s15 = sld [smem:[#allocation63_spill]] }
 0x1c5   : > { %s8990_s6 = scalar_lea.hbm %s11297_s15, 16 }
 0x1c6   : > { %p8991_p13 = scmp.ne.s32.totalorder %s11297_s15, %s8990_s6  ;;  %p8997_p3 = scmp.lt.u32.totalorder %s8990_s6, %s11297_s15 }
 0x1c8   : > { %p8993_p0 = pnand %p8991_p13, %p9508_p8 }
 0x1ca   : > { %p8994_p1 = pneg %p8993_p0 }
 0x1cc   : > { %p8999_p2 = pnand %p8997_p3, %p8994_p1 }
 0x1ce   : > { %9002 = shalt.err (!%p8999_p2)
}
 0x1cf   : > { %s9003_s18 = scalar_lea.vmem %s828_s3, 16  ;;  %s9010_s9 = scalar_lea.vmem %s828_s3, 32 }
 0x1d0   : > { %p9004_p5 = scmp.ne.s32.totalorder %s828_s3, %s9003_s18  ;;  %p9011_p10 = scmp.lt.s32.totalorder %s828_s3, %s828_s3 }
 0x1d1   : > { %p9012_p11 = scmp.lt.s32.totalorder %s9010_s9, %s9003_s18 }
 0x1d2   : > { %p9006_p7 = pnand %p9004_p5, %p9508_p8 }
 0x1d3   : > { %p9013_p12 = por %p9012_p11, %p9011_p10 }
 0x1d4   : > { %p9007_p9 = pneg %p9006_p7 }
 0x1d6   : > { %p9014_p4 = pnand %p9013_p12, %p9007_p9 }
 0x1d8   : > { %9017 = shalt.err (!%p9014_p4)
}
 0x1d9   : > { %8098 = dma.hbm_to_vmem [thread:$0]  (!%p9492_p6), %s11297_s15, 16, %s828_s3, [#allocation24]  }
 0x1da   : > { %s11298_s17 = sld [smem:[#allocation65_spill]] }
 0x1e0   : > { %s9018_s6 = scalar_lea.hbm %s11298_s17, 48 }
 0x1e1   : > { %p9019_p13 = scmp.ne.s32.totalorder %s11298_s17, %s9018_s6  ;;  %p9025_p3 = scmp.lt.u32.totalorder %s9018_s6, %s11298_s17 }
 0x1e3   : > { %p9021_p0 = pnand %p9019_p13, %p9508_p8 }
 0x1e5   : > { %p9022_p1 = pneg %p9021_p0 }
 0x1e7   : > { %p9027_p2 = pnand %p9025_p3, %p9022_p1 }
 0x1e9   : > { %9030 = shalt.err (!%p9027_p2)
}
 0x1ea   : > { %s9031_s3 = scalar_lea.vmem %s9818_s26, 48  ;;  %s9038_s18 = scalar_lea.vmem %s9818_s26, 64 }
 0x1eb   : > { %p9032_p5 = scmp.ne.s32.totalorder %s9818_s26, %s9031_s3  ;;  %p9039_p10 = scmp.lt.s32.totalorder %s9818_s26, %s9818_s26 }
 0x1ec   : > { %p9040_p11 = scmp.lt.s32.totalorder %s9038_s18, %s9031_s3 }
 0x1ed   : > { %p9034_p7 = pnand %p9032_p5, %p9508_p8 }
 0x1ee   : > { %p9041_p12 = por %p9040_p11, %p9039_p10 }
 0x1ef   : > { %p9035_p9 = pneg %p9034_p7 }
 0x1f1   : > { %p9042_p4 = pnand %p9041_p12, %p9035_p9 }
 0x1f3   : > { %9045 = shalt.err (!%p9042_p4)
}
 0x1f4   : > { %8104 = dma.hbm_to_vmem [thread:$0]  (!%p9492_p6), %s11298_s17, 48, %s9818_s26, [#allocation27]  }
 0x1f5   : > { %s9296_s10 = smov [#allocation31]   ;;  %s9046_s21 = scalar_lea.hbm %s11208_s24, 4096 }
 0x1f6   : > { %s889_s27 = sshll.u32 %s9296_s10, 4  ;;  %p9047_p13 = scmp.ne.s32.totalorder %s11208_s24, %s9046_s21  ;;  %s890_s27 = int_to_ptr.vmem [resolvable:$true] %s889_s27 }
 0x1f7   : > { %p9053_p3 = scmp.lt.u32.totalorder %s9046_s21, %s11208_s24 }
 0x1f8   : > { %p9049_p0 = pnand %p9047_p13, %p9508_p8 }
 0x1fa   : > { %p9050_p1 = pneg %p9049_p0 }
 0x1fc   : > { %p9055_p2 = pnand %p9053_p3, %p9050_p1 }
 0x1fe   : > { %9058 = shalt.err (!%p9055_p2)
}
 0x1ff   : > { %s9059_s26 = scalar_lea.vmem %s890_s27, 4096  ;;  %p9067_p10 = scmp.lt.s32.totalorder %s890_s27, %s890_s27 }
 0x200   : > { %p9060_p5 = scmp.ne.s32.totalorder %s890_s27, %s9059_s26  ;;  %p9068_p11 = scmp.lt.s32.totalorder %s9059_s26, %s9059_s26 }
 0x202   : > { %p9062_p7 = pnand %p9060_p5, %p9508_p8  ;;  %p9069_p12 = por %p9068_p11, %p9067_p10 }
 0x204   : > { %p9063_p9 = pneg %p9062_p7 }
 0x206   : > { %p9070_p4 = pnand %p9069_p12, %p9063_p9 }
 0x208   : > { %9073 = shalt.err (!%p9070_p4)
}
 0x209   : > { %8110 = dma.hbm_to_vmem [thread:$0]  (!%p9492_p6), %s11208_s24, 4096, %s890_s27, [#allocation30], %s11291_s14, %s11291_s14, %s11290_s12  }
 0x20a   : > { %s7277_s11 = sadd.s32 4294967294, %s9272_s30   ;;  %s9885_s1 = sadd.s32 1, %s9272_s30  }
 0x20b   : > { %s65_s5 = sadd.s32 1, %s9268_s8  ;;  %s62_s10 = ssub.s32 %s9272_s30, %s9885_s1 }
 0x20c   : > { %p72_p8 = scmp.ne.s32.totalorder %s9268_s8, %s9264_s4  ;;  %p63_p13 = scmp.eq.s32.totalorder %s62_s10, 0 }
 0x20d   : > { %p73_p0 = scmp.eq.s32.totalorder %s9272_s30, 0  ;;  %p78_p1 = scmp.ne.s32.totalorder %s9264_s4, %s9260_s7 }
 0x20e   : > { %p632_p3 = scmp.eq.s32.totalorder %s9474_s28, 1  ;;  %p11299_p5 = scmp.eq.s32.totalorder %s9474_s28, 0 }
 0x20f   : > { %s9897_s25 = scalar_select %p63_p13, %s9268_s8, %s65_s5  }
 0x210   : > { %p74_p2 = por %p73_p0, %p72_p8  ;;  %p9901_p7 = por %p11299_p5, %p78_p1 }
 0x211   : > { %p9905_p6 = por %p632_p3, %p72_p8  ;;  %p638_p9 = scmp.eq.s32.totalorder %s7277_s11, 1 }
 0x212   : > { %s11300_s6 = scalar_select %p9901_p7, 1, 0 }
 0x213   : > { %s11301_s12 = scalar_select %p9905_p6, 1, 0 }
 0x214   : > { %p8142_p10 = scmp.lt.s32.totalorder %s9272_s30, 2  ;;  %s9911_s14 = sand.u32 1, %s9268_s8  }
 0x215   : > { %p9913_p11 = por %p638_p9, %p78_p1  ;;  %s7297_s21 = sshll.u32 %s9911_s14, 4 }
 0x216   : > { %s7591_s19 = sshll.u32 %s9272_s30, 8  ;;  %s11303_s3 = sld [smem:[#allocation48_spill]] }
 0x217   : > { %s11302_s27 = scalar_select %p9913_p11, 1, 0 }
 0x218   : > { %s910_s18 = scalar_lea.vmem [#allocation2], %s7297_s21  ;;  %p9924_p12 = pnand %p8142_p10, %p74_p2 }
 0x219   : > { %s917_s9 = sshll.u32 %s910_s18, 4  ;;  %s9928_s9 = int_to_ptr.vmem [resolvable:$true] %s917_s9 }
 0x21a   : > { %p9076_p8 = pneg %p9924_p12 }
 0x21c   : > { %s9922_s26 = scalar_lea.hbm %s11303_s3, %s7591_s19  ;;  %s9079_s16 = scalar_lea.hbm %s11303_s3, 512 }
 0x21d   : > { %s9074_s10 = scalar_lea.hbm %s9922_s26, 256  ;;  %p9080_p1 = scmp.lt.u32.totalorder %s9922_s26, %s11303_s3 }
 0x21e   : > { %p9075_p4 = scmp.ne.s32.totalorder %s9922_s26, %s9074_s10  ;;  %p9081_p3 = scmp.lt.u32.totalorder %s9079_s16, %s9074_s10 }
 0x21f   : > { %p9083_p5 = scmp.lt.u32.totalorder %s9074_s10, %s9922_s26 }
 0x220   : > { %p9077_p13 = pnand %p9076_p8, %p9075_p4  ;;  %p9082_p2 = por %p9081_p3, %p9080_p1 }
 0x222   : > { %p9078_p0 = pneg %p9077_p13  ;;  %p9084_p9 = por %p9083_p5, %p9082_p2 }
 0x224   : > { %p9085_p10 = pnand %p9084_p9, %p9078_p0 }
 0x226   : > { %9088 = shalt.err (!%p9085_p10)
}
 0x227   : > { %s9089_s5 = scalar_lea.vmem %s9928_s9, 256  ;;  %s9297_s19 = smov [#allocation2]  }
 0x228   : > { %p9090_p4 = scmp.ne.s32.totalorder %s9928_s9, %s9089_s5  ;;  %s9094_s21 = sshll.u32 %s9297_s19, 4  ;;  %s9095_s21 = int_to_ptr.vmem [resolvable:$false] %s9094_s21 }
 0x229   : > { %s9096_s20 = scalar_lea.vmem %s9095_s21, 512  ;;  %p9097_p6 = scmp.lt.s32.totalorder %s9928_s9, %s9095_s21 }
 0x22a   : > { %p9092_p13 = pnand %p9090_p4, %p9076_p8  ;;  %p9098_p1 = scmp.lt.s32.totalorder %s9096_s20, %s9089_s5 }
 0x22c   : > { %p9093_p11 = pneg %p9092_p13  ;;  %p9099_p3 = por %p9098_p1, %p9097_p6 }
 0x22e   : > { %p9100_p2 = pnand %p9099_p3, %p9093_p11 }
 0x230   : > { %9103 = shalt.err (!%p9100_p2)
}
 0x231   : > { %s9298_s10 = smov 128   ;;  %s9299_s16 = smov 8  }
 0x232   : > { %s11305_s18 = scalar_lea.sflag [#allocation3], %s9911_s14  ;;  %s927_s19 = sand.u32 1, %s9272_s30  }
 0x233   : > { %8114 = dma.hbm_to_vmem [thread:$0]  (!%p9924_p12), %s9922_s26, 256, %s9928_s9, %s11305_s18, %s9298_s10, %s9298_s10, %s9299_s16  }
 0x234   : > { %s7300_s2 = sshll.u32 %s9911_s14, 3  ;;  %s7301_s21 = sshll.u32 %s9272_s30, 7 }
 0x235   : > { %s931_s5 = scalar_lea.vmem [#allocation5], %s7300_s2  ;;  %s11306_s15 = sld [smem:[#allocation49_spill]] }
 0x236   : > { %s938_s20 = sshll.u32 %s931_s5, 4  ;;  %s928_s22 = scalar_lea.sflag [#allocation6], %s927_s19  ;;  %s939_s20 = int_to_ptr.vmem [resolvable:$true] %s938_s20 }
 0x23b   : > { %s9964_s17 = scalar_lea.hbm %s11306_s15, %s7301_s21  ;;  %s9109_s26 = scalar_lea.hbm %s11306_s15, 256 }
 0x23c   : > { %s9104_s23 = scalar_lea.hbm %s9964_s17, 128  ;;  %p9110_p5 = scmp.lt.u32.totalorder %s9964_s17, %s11306_s15 }
 0x23d   : > { %p9105_p6 = scmp.ne.s32.totalorder %s9964_s17, %s9104_s23  ;;  %p9111_p9 = scmp.lt.u32.totalorder %s9109_s26, %s9104_s23 }
 0x23e   : > { %p9113_p4 = scmp.lt.u32.totalorder %s9104_s23, %s9964_s17 }
 0x23f   : > { %p9107_p11 = pnand %p9105_p6, %p9076_p8  ;;  %p9112_p10 = por %p9111_p9, %p9110_p5 }
 0x241   : > { %p9108_p0 = pneg %p9107_p11  ;;  %p9114_p13 = por %p9113_p4, %p9112_p10 }
 0x243   : > { %p9115_p1 = pnand %p9114_p13, %p9108_p0 }
 0x245   : > { %9118 = shalt.err (!%p9115_p1)
}
 0x246   : > { %s9119_s3 = scalar_lea.vmem %s939_s20, 128  ;;  %s9300_s10 = smov [#allocation5]  }
 0x247   : > { %p9120_p3 = scmp.ne.s32.totalorder %s939_s20, %s9119_s3  ;;  %s9124_s16 = sshll.u32 %s9300_s10, 4  ;;  %s9125_s16 = int_to_ptr.vmem [resolvable:$false] %s9124_s16 }
 0x248   : > { %s9126_s18 = scalar_lea.vmem %s9125_s16, 256  ;;  %p9127_p11 = scmp.lt.s32.totalorder %s939_s20, %s9125_s16 }
 0x249   : > { %p9122_p2 = pnand %p9120_p3, %p9076_p8  ;;  %p9128_p7 = scmp.lt.s32.totalorder %s9126_s18, %s9119_s3 }
 0x24b   : > { %p9123_p6 = pneg %p9122_p2  ;;  %p9129_p5 = por %p9128_p7, %p9127_p11 }
 0x24d   : > { %p9130_p9 = pnand %p9129_p5, %p9123_p6 }
 0x24f   : > { %9133 = shalt.err (!%p9130_p9)
}
 0x250   : > { %8117 = dma.hbm_to_vmem [thread:$0]  (!%p9924_p12), %s9964_s17, 128, %s939_s20, %s928_s22  }
 0x251   : > { %p11307_p0 = scmp.ne.s32.totalorder %s11274_s0, 0 }
 0x252   : > { %s9988_s23 = sand.u32 (!%p11307_p0), 1, %s9264_s4   ;;  %p11308_p7 = scmp.ne.s32.totalorder (!%p11307_p0), %s11300_s6, 0 }
 0x253   : > { %947 = sbr.rel (%p11307_p0) target bundleno = 5972 (0x1754), region = 124  ;;  %s7303_s19 = sshll.u32 (!%p11307_p0), %s9988_s23, 4 }
 0x254   : > { %s950_s21 = scalar_lea.sflag (!%p11307_p0), [#allocation3], %s9988_s23  ;;  %s9994_s5 = scalar_lea.vmem (!%p11307_p0), [#allocation2], %s7303_s19 }
 0x25a   : > { %9207 = dma.done.wait (%p11308_p7), %s950_s21, 256  }
 0x25b   : > { %9209 = vsyncadd (%p11308_p7), %s950_s21, 4294967040  ;;  %s958_s17 = sand.u32 1, %s9474_s28   ;;  %s7304_s22 = sshll.u32 %s9988_s23, 3 }
 0x25c   : > { %s959_s0 = scalar_lea.sflag [#allocation6], %s958_s17  ;;  %s10004_s11 = scalar_lea.vmem [#allocation5], %s7304_s22 }
 0x25d   : > { %9211 = dma.done.wait (%p11308_p7), %s959_s0, 128  }
 0x25e   : > { %9213 = vsyncadd (%p11308_p7), %s959_s0, 4294967168  ;;  %p11309_p12 = scmp.eq.s32.totalorder %s9474_s28, 0 }
 0x260   : > { %9215 = dma.done.wait (%p11309_p12), [#allocation6], 16   ;;  %p11310_p8 = pmov %p11309_p12 }
 0x262   : > { %9217 = vsyncadd (%p11310_p8), [#allocation6], 4294967280  ;;  %p11311_p10 = pmov %p11310_p8 }
 0x263   : > { %p11312_p4 = pmov %p11310_p8 }
 0x264   : > { %9219 = dma.done.wait (%p11311_p10), [#allocation9], 3088  }
 0x265   : > { %9221 = vsyncadd (%p11312_p4), [#allocation9], 4294964208  ;;  %p11313_p13 = pmov %p11312_p4 }
 0x266   : > { %p11314_p1 = pmov %p11312_p4 }
 0x267   : > { %9223 = dma.done.wait (%p11313_p13), [#allocation12], 1072  }
 0x268   : > { %9225 = vsyncadd (%p11314_p1), [#allocation12], 4294966224  ;;  %p11315_p3 = pmov %p11314_p1 }
 0x269   : > { %p11316_p2 = pmov %p11314_p1 }
 0x26a   : > { %9227 = dma.done.wait (%p11315_p3), [#allocation15], 32  }
 0x26b   : > { %9229 = vsyncadd (%p11316_p2), [#allocation15], 4294967264  ;;  %p11317_p6 = pmov %p11314_p1 }
 0x26c   : > { %p11318_p11 = pmov %p11314_p1 }
 0x26d   : > { %9231 = dma.done.wait (%p11317_p6), [#allocation18], 4112  }
 0x26e   : > { %9233 = vsyncadd (%p11318_p11), [#allocation18], 4294963184  ;;  %p11319_p5 = pmov %p11314_p1 }
 0x26f   : > { %p11320_p9 = pmov %p11314_p1 }
 0x270   : > { %9235 = dma.done.wait (%p11319_p5), [#allocation21], 4112  }
 0x271   : > { %9237 = vsyncadd (%p11320_p9), [#allocation21], 4294963184  ;;  %p11321_p0 = pmov %p11314_p1 }
 0x273   : > { %9239 = dma.done.wait (%p11321_p0), [#allocation24], 32   ;;  %p11322_p7 = pmov %p11321_p0 }
 0x274   : > { %p11323_p12 = pmov %p11321_p0 }
 0x275   : > { %9241 = vsyncadd (%p11322_p7), [#allocation24], 4294967264 }
 0x276   : > { %9243 = dma.done.wait (%p11323_p12), [#allocation27], 3120   ;;  %p11324_p8 = pmov %p11321_p0 }
 0x277   : > { %p11325_p10 = pmov %p11321_p0 }
 0x278   : > { %9245 = vsyncadd (%p11324_p8), [#allocation27], 4294964176 }
 0x279   : > { %9247 = dma.done.wait (%p11325_p10), [#allocation30], 8192   ;;  %p11326_p4 = pmov %p11321_p0 }
 0x27a   : > { %v1416_v0 = vld [vmem:[%s9994_s5] sm:$0xff]  ;;  %v1417_v2 = vld [vmem:[%s9994_s5 + $0x8] sm:$0xff]  ;;  %v9301_v35 = vmov 0   ;;  %s9302_s6 = smov 64   ;;  %s9303_s20 = smov 96   ;;  %vm3057_vm0 = vcmask 261120  }
 0x27b   : > { %9249 = vsyncadd (%p11326_p4), [#allocation30], 4294959104  ;;  %v1418_v1 = vld [vmem:[%s10004_s11] sm:$0xff]  ;;  %1419 = vadd.xlane.f32.xlu0 %v1416_v0  ;;  %v8247_v18 = vld [vmem:[#allocation10 + $0x1c] ss:$12 sps:$4 sm:$0xff]   ;;  %1649 = vmatprep.mubr.bf16.mxu0 %v9301_v35  ;;  %s9304_s14 = smov 32  }
 0x27c   : > { %1423 = vadd.xlane.f32.xlu1 %v1418_v1  ;;  %v8243_v3 = vld [vmem:[#allocation10 + $0x4] ss:$12 sps:$4 sm:$0xff]   ;;  %v8245_v4 = vld [vmem:[#allocation10] ss:$12 sps:$4 sm:$0xff]   ;;  %v8246_v5 = vld [vmem:[#allocation10 + $0x8] ss:$12 sps:$4 sm:$0xff]  }
 0x27d   : > { %1617 = vmatprep.subr.bf16.mxu0 %v8243_v3  ;;  %7779 = vmatprep.subr.bf16.mxu1 %v8246_v5  ;;  %v8249_v19 = vld [vmem:[#allocation10 + $0x18] ss:$12 sps:$4 sm:$0xff]   ;;  %v8250_v20 = vld [vmem:[#allocation10 + $0x20] ss:$12 sps:$4 sm:$0xff]   ;;  %v8253_v22 = vld [vmem:[#allocation10 + $0x30] ss:$12 sps:$4 sm:$0xff]  }
 0x27e   : > { %1618 = vmatpush1.bf16.msra.mxu0 %v8245_v4  ;;  %7780 = vmatpush3.bf16.msra.mxu1 %v8246_v5  ;;  %v8251_v21 = vld [vmem:[#allocation10 + $0x34] ss:$12 sps:$4 sm:$0xff]   ;;  %v8254_v23 = vld [vmem:[#allocation10 + $0x38] ss:$12 sps:$4 sm:$0xff]   ;;  %v8258_v26 = vld [vmem:[#allocation10 + $0x50] ss:$12 sps:$4 sm:$0xff]  }
 0x27f   : > { %1421 = vadd.xlane.f32.xlu0 %v1417_v2  ;;  %1619 = vmatprep.subr.bf16.mxu0 %v8247_v18  ;;  %v8255_v24 = vld [vmem:[#allocation10 + $0x4c] ss:$12 sps:$4 sm:$0xff]   ;;  %v8257_v25 = vld [vmem:[#allocation10 + $0x48] ss:$12 sps:$4 sm:$0xff]   ;;  %v8259_v27 = vld [vmem:[#allocation10 + $0x64] ss:$12 sps:$4 sm:$0xff]  }
 0x280   : > { %7781 = vmatprep.subr.bf16.mxu1 %v8250_v20  ;;  %v8261_v28 = vld [vmem:[#allocation10 + $0x60] ss:$12 sps:$4 sm:$0xff]   ;;  %v8262_v29 = vld [vmem:[#allocation10 + $0x68] ss:$12 sps:$4 sm:$0xff]   ;;  %v8265_v32 = vld [vmem:[#allocation10 + $0x78] ss:$12 sps:$4 sm:$0xff]  }
 0x281   : > { %v8263_v30 = vld [vmem:[#allocation10 + $0x7c] ss:$12 sps:$4 sm:$0xff]   ;;  %v8266_v31 = vld [vmem:[#allocation10 + $0x80] ss:$12 sps:$4 sm:$0xff]   ;;  %v8270_v34 = vld [vmem:[#allocation10 + $0x98] ss:$12 sps:$4 sm:$0xff]  }
 0x282   : > { %1620 = vmatpush1.bf16.msra.mxu0 %v8249_v19  ;;  %7782 = vmatpush3.bf16.msra.mxu1 %v8250_v20  ;;  %v8267_v33 = vld [vmem:[#allocation10 + $0x94] ss:$12 sps:$4 sm:$0xff]   ;;  %v8269_v36 = vld [vmem:[#allocation10 + $0x90] ss:$12 sps:$4 sm:$0xff]   ;;  %v8271_v37 = vld [vmem:[#allocation10 + $0xac] ss:$12 sps:$4 sm:$0xff]  }
 0x283   : > { %1621 = vmatprep.subr.bf16.mxu0 %v8251_v21  ;;  %7783 = vmatprep.subr.bf16.mxu1 %v8254_v23  ;;  %v8274_v38 = vld [vmem:[#allocation10 + $0xb0] ss:$12 sps:$4 sm:$0xff]   ;;  %v8273_v39 = vld [vmem:[#allocation10 + $0xa8] ss:$12 sps:$4 sm:$0xff]   ;;  %vm3298_vm1 = vcmask 195584   ;;  %vm3445_vm2 = vcmask 1043456  }
 0x284   : > { %v7324_v51 = vld [vmem:[#allocation7] ss:$0 sm:$0xff]  ;;  %v7325_v57 = vld [vmem:[#allocation8] ss:$0 sm:$0xff]  ;;  %vm4115_vm3 = vcmask 523264   ;;  %vm4119_vm4 = vcmask 785408  }
 0x285   : > { %s11327_s9 = sld [smem:[#allocation59_spill]]  ;;  %s10865_s13 = scalar_lea.vmem [#allocation32], %s7303_s19  ;;  %vm9308_vm5 = vmmov 0   ;;  %vm5867_vm6 = vcmask 64512  }
 0x286   : > { %1622 = vmatpush1.bf16.msra.mxu0 %v8253_v22  ;;  %7784 = vmatpush3.bf16.msra.mxu1 %v8254_v23  ;;  %s11328_s16 = sld [smem:[#allocation66_spill]]  ;;  %s11330_s17 = sld [smem:[#allocation68_spill]] }
 0x287   : > { %1623 = vmatprep.subr.bf16.mxu0 %v8255_v24  ;;  %7785 = vmatprep.subr.bf16.mxu1 %v8258_v26  ;;  %s11331_s2 = sld [smem:[#allocation69_spill]]  ;;  %s11332_s3 = sld [smem:[#allocation71_spill]] }
 0x288   : > { %s6975_s10 = sshll.u32 %s10865_s13, 4  ;;  %s7592_s18 = sshll.u32 %s9474_s28, 8  ;;  %s11098_s10 = int_to_ptr.vmem [resolvable:$true] %s6975_s10 }
 0x289   : > { %p11334_p1 = scmp.ne.s32.totalorder %s11301_s12, 0 }
 0x28a   : > { %1624 = vmatpush1.bf16.msra.mxu0 %v8257_v25  ;;  %7786 = vmatpush3.bf16.msra.mxu1 %v8258_v26 }
 0x28b   : > { %1625 = vmatprep.subr.bf16.mxu0 %v8259_v27  ;;  %7787 = vmatprep.subr.bf16.mxu1 %v8262_v29 }
 0x28e   : > { %1626 = vmatpush1.bf16.msra.mxu0 %v8261_v28  ;;  %7788 = vmatpush3.bf16.msra.mxu1 %v8262_v29 }
 0x28f   : > { %1627 = vmatprep.subr.bf16.mxu0 %v8263_v30  ;;  %7789 = vmatprep.subr.bf16.mxu1 %v8266_v31 }
 0x292   : > { %1628 = vmatpush1.bf16.msra.mxu0 %v8265_v32  ;;  %7790 = vmatpush3.bf16.msra.mxu1 %v8266_v31 }
 0x293   : > { %1629 = vmatprep.subr.bf16.mxu0 %v8267_v33  ;;  %7791 = vmatprep.subr.bf16.mxu1 %v8270_v34 }
 0x296   : > { %1630 = vmatpush1.bf16.msra.mxu0 %v8269_v36  ;;  %7792 = vmatpush3.bf16.msra.mxu1 %v8270_v34  ;;  %v9305_v34 = vmov 1983009808  }
 0x297   : > { %1631 = vmatprep.subr.bf16.mxu0 %v8271_v37  ;;  %7793 = vmatprep.subr.bf16.mxu1 %v8274_v38  ;;  %v1752_v36 = vunpack.c.l.s4 %v9305_v34  ;;  %v9306_v37 = vmov 1934713408  }
 0x29a   : > { %1632 = vmatpush1.bf16.msra.mxu0 %v8273_v39  ;;  %7794 = vmatpush3.bf16.msra.mxu1 %v8274_v38  ;;  %v1784_v38 = vunpack.c.l.s4 %v9306_v37  ;;  %v1753_v39 = vunpack.c.0.s8 %v1752_v36 }
 0x308   : > { %v1420_v6 = vpop.xlane.xlu0 %1419 }
 0x309   : > { %v1424_v7 = vpop.xlane.xlu1 %1423  ;;  %v1426_v8 = vmul.f32 0.0078125, %v1420_v6  ;;  %v1146_v6 = vld [vmem:[#allocation11] sm:$0x7] }
 0x30a   : > { %v1428_v9 = vmul.f32 0.0078125, %v1424_v7 }
 0x30b   : > { %v10049_v10 = vsub.f32 %v1416_v0, %v1426_v8 }
 0x30c   : > { %v10051_v11 = vsub.f32 %v1418_v1, %v1428_v9  ;;  %v1422_v12 = vpop.xlane.xlu0 %1421  ;;  %v1474_v1 = vlaneseq }
 0x30d   : > { %v1427_v13 = vmul.f32 0.0078125, %v1422_v12  ;;  %v1432_v14 = vmul.f32 %v10049_v10, %v10049_v10 }
 0x30e   : > { %v1434_v16 = vmul.f32 %v10051_v11, %v10051_v11 }
 0x30f   : > { %v10055_v15 = vsub.f32 %v1417_v2, %v1427_v13  ;;  %1435 = vadd.xlane.f32.xlu1 %v1432_v14  ;;  %v10066_v2 = vshrl.u32 %v1474_v1, 7 }
 0x311   : > { %v1433_v17 = vmul.f32 %v10055_v15, %v10055_v15  ;;  %v10069_v3 = vsub.s32 0, %v10066_v2  ;;  %v10072_v4 = vsub.s32 1, %v10066_v2  ;;  %v10075_v5 = vsub.s32 2, %v10066_v2 }
 0x313   : > { %1439 = vadd.xlane.f32.xlu1 %v1434_v16  ;;  %1437 = vadd.xlane.f32.xlu0 %v1433_v17  ;;  %v1477_v7 = vrot.slane %v1146_v6, %v10069_v3  ;;  %v1481_v8 = vrot.slane %v1146_v6, %v10072_v4  ;;  %v1485_v9 = vrot.slane %v1146_v6, %v10075_v5 }
 0x39c   : > { %v1436_v40 = vpop.xlane.xlu1 %1435 }
 0x39d   : > { %v1441_v41 = vmul.f32 0.0078125, %v1436_v40 }
 0x39f   : > { %v1444_v42 = vadd.f32 1e-12, %v1441_v41 }
 0x3a0   : > { %v1440_v43 = vpop.xlane.xlu1 %1439  ;;  %v1438_v44 = vpop.xlane.xlu0 %1437 }
 0x3a1   : > { %8483 = vrsqrt.f32 %v1444_v42  ;;  %v1443_v45 = vmul.f32 0.0078125, %v1440_v43  ;;  %v1442_v46 = vmul.f32 0.0078125, %v1438_v44  ;;  %v1785_v42 = vunpack.c.0.s8 %v1784_v38 }
 0x3a2   : > { %v10145_v43 = vsub.s32 %v1753_v39, %v10066_v2 }
 0x3a3   : > { %v1446_v47 = vadd.f32 1e-12, %v1443_v45  ;;  %v1445_v48 = vadd.f32 1e-12, %v1442_v46 }
 0x3a5   : > { %8485 = vrsqrt.f32 %v1446_v47 }
 0x3a6   : > { %8487 = vrsqrt.f32 %v1445_v48 }
 0x3ab   : > { %v8484_v49 = vpop.eup %8483 }
 0x3ac   : > { %v1450_v50 = vmul.f32 %v8484_v49, %v10049_v10 }
 0x3ae   : > { %v1459_v56 = vmul.f32 %v7324_v51, %v1450_v50  ;;  %v10152_v50 = vsub.s32 %v1785_v42, %v10066_v2 }
 0x3af   : > { %v8486_v52 = vpop.eup %8485 }
 0x3b0   : > { %v8488_v53 = vpop.eup %8487  ;;  %v1452_v54 = vmul.f32 %v8486_v52, %v10051_v11  ;;  %v1468_v61 = vadd.f32 %v7325_v57, %v1459_v56 }
 0x3b1   : > { %v1451_v55 = vmul.f32 %v8488_v53, %v10055_v15 }
 0x3b2   : > { %v1461_v58 = vmul.f32 %v7324_v51, %v1452_v54 }
 0x3b3   : > { %v1460_v59 = vmul.f32 %v7324_v51, %v1451_v55 }
 0x3b4   : > { %v1470_v60 = vadd.f32 %v7325_v57, %v1461_v58 }
 0x3b5   : > { %v1469_v62 = vadd.f32 %v7325_v57, %v1460_v59 }
 0x3b6   : > { %v1472_v63 = vpack.c.bf16 %v1470_v60, %v1470_v60 }
 0x3b7   : > { %v1471_v0 = vpack.c.bf16 %v1469_v62, %v1468_v61 }
 0x3b9   : > { %1650 = vmatmul.mubr.bf16.vlgmr.msra.gmra.mrb[0].mxu0 %v1471_v0  ;;  %7795 = vmatprep.mubr.bf16.mxu1 %v1471_v0 }
 0x3ba   : > { %7796 = vmatmul.mubr.bf16.vlgmr.msra.gmra.mrb[0].mxu1 %v1472_v63  ;;  %1659 = vmatprep.mubr.bf16.mxu0 %v9301_v35 }
 0x3c1   : > { %1660 = vmatmul.mubr.bf16.gmra.mrb[4].mxu0 %v1472_v63 }
 0x48c   : > { %v1651_v10 = vpop.f32.mrb[0].mxu0 }
 0x48d   : > { %v1653_v11 = vpop.f32.mrb[1].mxu0  ;;  %v7797_v12 = vpop.f32.mrb[0].mxu1  ;;  %v1652_v13 = vadd.f32 %v1651_v10, %v1477_v7 }
 0x48e   : > { %v10080_v14 = vadd.f32 %v1653_v11, %v1481_v8  ;;  %v10082_v15 = vadd.f32 %v7797_v12, %v1485_v9  ;;  %v1655_v16 = vpop.f32.mrb[2].mxu0  ;;  %v1702_v17 = vpop.f32.mrb[1].mxu1 }
 0x48f   : > { %v1657_v18 = vpop.f32.mrb[3].mxu0  ;;  %v7798_v19 = vpop.f32.mrb[2].mxu1  ;;  %v10088_v21 = vmul.f32 0.17677669, %v1652_v13  ;;  %v1656_v22 = vadd.f32 %v1655_v16, %v1477_v7  ;;  %v10126_v32 = vadd.f32 %v1702_v17, %v1485_v9 }
 0x490   : > { %v1705_v20 = vpop.f32.mrb[3].mxu1  ;;  %2177 = vrot.lane.b32.xlu1 %v10080_v14, %s9302_s6  ;;  %2168 = vrot.lane.b32.xlu0 %v10080_v14, %s9303_s20  ;;  %v10096_v26 = vadd.f32 %v1657_v18, %v1481_v8 }
 0x491   : > { %v10094_v25 = vmul.f32 0.17677669, %v1656_v22  ;;  %v10136_v33 = vadd.f32 %v1705_v20, %v1485_v9 }
 0x494   : > { %v1661_v23 = vpop.f32.mrb[4].mxu0  ;;  %2186 = vrot.lane.b32.xlu0 %v10080_v14, %s9304_s14  ;;  %1722 = vrot.lane.b32.xlu1 %v10088_v21, %s9303_s20 }
 0x495   : > { %v1663_v24 = vpop.f32.mrb[5].mxu0  ;;  %v1662_v30 = vadd.f32 %v1661_v23, %v1477_v7 }
 0x496   : > { %v1665_v27 = vpop.f32.mrb[6].mxu0  ;;  %v10102_v29 = vadd.f32 %v1663_v24, %v1481_v8 }
 0x497   : > { %v1666_v28 = vpop.f32.mrb[7].mxu0  ;;  %v10120_v31 = vmul.f32 0.17677669, %v1662_v30 }
 0x498   : > { %1724 = vrot.lane.b32.xlu0 %v10094_v25, %s9303_s20  ;;  %2170 = vrot.lane.b32.xlu1 %v10096_v26, %s9303_s20 }
 0x49c   : > { %2172 = vrot.lane.b32.xlu0 %v10102_v29, %s9303_s20  ;;  %2179 = vrot.lane.b32.xlu1 %v10096_v26, %s9302_s6 }
 0x4a0   : > { %2190 = vrot.lane.b32.xlu0 %v10102_v29, %s9304_s14  ;;  %2188 = vrot.lane.b32.xlu1 %v10096_v26, %s9304_s14 }
 0x4a4   : > { %1733 = vrot.lane.b32.xlu0 %v10094_v25, %s9302_s6  ;;  %1731 = vrot.lane.b32.xlu1 %v10088_v21, %s9302_s6 }
 0x4a8   : > { %1742 = vrot.lane.b32.xlu0 %v10094_v25, %s9304_s14  ;;  %2181 = vrot.lane.b32.xlu1 %v10102_v29, %s9302_s6 }
 0x4ac   : > { %1735 = vrot.lane.b32.xlu0 %v10120_v31, %s9302_s6  ;;  %1740 = vrot.lane.b32.xlu1 %v10088_v21, %s9304_s14 }
 0x4b0   : > { %2614 = vrot.lane.b32.xlu0 %v10126_v32, %s9303_s20  ;;  %1726 = vrot.lane.b32.xlu1 %v10120_v31, %s9303_s20 }
 0x4b4   : > { %2632 = vrot.lane.b32.xlu0 %v10126_v32, %s9304_s14  ;;  %1744 = vrot.lane.b32.xlu1 %v10120_v31, %s9304_s14 }
 0x4b8   : > { %2616 = vrot.lane.b32.xlu1 %v10136_v33, %s9303_s20 }
 0x4bc   : > { %2623 = vrot.lane.b32.xlu1 %v10126_v32, %s9302_s6 }
 0x4c0   : > { %2625 = vrot.lane.b32.xlu1 %v10136_v33, %s9302_s6 }
 0x502   : > { %v2178_v40 = vpop.permute.xlu1 %2177  ;;  %v2169_v41 = vpop.permute.xlu0 %2168 }
 0x503   : > { %v2195_v44 = vcombine.low %v10080_v14, %v2178_v40  ;;  %v2196_v45 = vcombine.high %v10080_v14, %v2178_v40 }
 0x505   : > { %v2203_v51 = vrot.slane %v2195_v44, %v10145_v43  ;;  %v2210_v52 = vrot.slane %v2196_v45, %v10145_v43 }
 0x506   : > { %v2187_v46 = vpop.permute.xlu0 %2186  ;;  %v10149_v47 = vpop.permute.xlu1 %1722 }
 0x507   : > { %v2211_v48 = vcombine.low %v2169_v41, %v2187_v46  ;;  %v2212_v49 = vcombine.high %v2169_v41, %v2187_v46 }
 0x509   : > { %v2219_v53 = vrot.slane %v2211_v48, %v10145_v43  ;;  %v2226_v54 = vrot.slane %v2212_v49, %v10145_v43 }
 0x50a   : > { %v10158_v55 = vpop.permute.xlu0 %1724  ;;  %v2171_v56 = vpop.permute.xlu1 %2170 }
 0x50b   : > { %v2227_v57 = vcombine.low %v2203_v51, %v2219_v53  ;;  %v2228_v58 = vcombine.high %v2203_v51, %v2219_v53  ;;  %v2243_v59 = vcombine.low %v2210_v52, %v2226_v54  ;;  %v2244_v60 = vcombine.high %v2210_v52, %v2226_v54 }
 0x50d   : > { %v2235_v61 = vrot.slane %v2227_v57, %v10152_v50  ;;  %v2242_v62 = vrot.slane %v2228_v58, %v10152_v50  ;;  %v2251_v63 = vrot.slane %v2243_v59, %v10152_v50  ;;  %v2258_v0 = vrot.slane %v2244_v60, %v10152_v50 }
 0x50e   : > { %v2173_v1 = vpop.permute.xlu0 %2172  ;;  %v2180_v6 = vpop.permute.xlu1 %2179 }
 0x50f   : > { %v2399_v7 = vcombine.low %v2235_v61, %v2242_v62  ;;  %v7356_v8 = vcombine.high %v2235_v61, %v2242_v62  ;;  %v2415_v9 = vcombine.low %v2251_v63, %v2258_v0  ;;  %v7357_v10 = vcombine.high %v2251_v63, %v2258_v0 }
 0x510   : > { %v2263_v11 = vcombine.low %v10096_v26, %v2180_v6  ;;  %v2264_v19 = vcombine.high %v10096_v26, %v2180_v6 }
 0x511   : > { %v2406_v12 = vrot.slane %v2399_v7, %v10145_v43  ;;  %v2414_v13 = vrot.slane %v7356_v8, %v10145_v43  ;;  %v2422_v14 = vrot.slane %v2415_v9, %v10145_v43  ;;  %v2430_v16 = vrot.slane %v7357_v10, %v10145_v43 }
 0x512   : > { %v2191_v17 = vpop.permute.xlu0 %2190  ;;  %v2189_v18 = vpop.permute.xlu1 %2188  ;;  %v2271_v24 = vrot.slane %v2263_v11, %v10145_v43  ;;  %v2278_v40 = vrot.slane %v2264_v19, %v10145_v43 }
 0x513   : > { %v2279_v20 = vcombine.low %v2171_v56, %v2189_v18  ;;  %v2280_v22 = vcombine.high %v2171_v56, %v2189_v18  ;;  %v2347_v23 = vcombine.low %v2173_v1, %v2191_v17  ;;  %v2348_v30 = vcombine.high %v2173_v1, %v2191_v17 }
 0x514   : > { %v2431_v37 = vcombine.low %v2406_v12, %v2414_v13  ;;  %v2447_v38 = vcombine.low %v2422_v14, %v2430_v16  ;;  %v2432_v39 = vcombine.high %v2406_v12, %v2414_v13  ;;  %v2448_v42 = vcombine.high %v2422_v14, %v2430_v16 }
 0x515   : > { %v2287_v27 = vrot.slane %v2279_v20, %v10145_v43  ;;  %v2294_v28 = vrot.slane %v2280_v22, %v10145_v43  ;;  %v2355_v44 = vrot.slane %v2347_v23, %v10145_v43  ;;  %v2362_v51 = vrot.slane %v2348_v30, %v10145_v43 }
 0x516   : > { %v1734_v34 = vpop.permute.xlu0 %1733  ;;  %v10173_v36 = vpop.permute.xlu1 %1731  ;;  %v10181_v54 = vrot.slane %v2431_v37, %v10152_v50  ;;  %v10184_v56 = vrot.slane %v2447_v38, %v10152_v50  ;;  %v10187_v57 = vrot.slane %v2432_v39, %v10152_v50  ;;  %v10194_v60 = vrot.slane %v2448_v42, %v10152_v50 }
 0x517   : > { %v2295_v41 = vcombine.low %v2271_v24, %v2287_v27  ;;  %v2296_v26 = vcombine.high %v2271_v24, %v2287_v27  ;;  %v2311_v45 = vcombine.low %v2278_v40, %v2294_v28  ;;  %v2312_v46 = vcombine.high %v2278_v40, %v2294_v28 }
 0x518   : > { %v1817_v48 = vcombine.low %v10094_v25, %v1734_v34  ;;  %v1818_v49 = vcombine.high %v10094_v25, %v1734_v34  ;;  %v1749_v25 = vcombine.low %v10088_v21, %v10173_v36  ;;  %v1750_v16 = vcombine.high %v10088_v21, %v10173_v36 }
 0x519   : > { %v2303_v58 = vrot.slane %v2295_v41, %v10152_v50  ;;  %v2310_v59 = vrot.slane %v2296_v26, %v10152_v50  ;;  %v2319_v1 = vrot.slane %v2311_v45, %v10152_v50  ;;  %v2326_v6 = vrot.slane %v2312_v46, %v10152_v50 }
 0x51a   : > { %v1743_v52 = vpop.permute.xlu0 %1742  ;;  %v2182_v53 = vpop.permute.xlu1 %2181  ;;  %v1825_v7 = vrot.slane %v1817_v48, %v10145_v43  ;;  %v1832_v8 = vrot.slane %v1818_v49, %v10145_v43  ;;  %v10211_v17 = vrot.slane %v1749_v25, %v10145_v43 }
 0x51b   : > { %v1833_v61 = vcombine.low %v10158_v55, %v1743_v52  ;;  %v1834_v62 = vcombine.high %v10158_v55, %v1743_v52  ;;  %v2331_v63 = vcombine.low %v10102_v29, %v2182_v53  ;;  %v2332_v0 = vcombine.high %v10102_v29, %v2182_v53 }
 0x51c   : > { %v2467_v14 = vcombine.low %v2303_v58, %v2310_v59  ;;  %v7358_v29 = vcombine.high %v2303_v58, %v2310_v59  ;;  %v2483_v30 = vcombine.low %v2319_v1, %v2326_v6  ;;  %v7359_v34 = vcombine.high %v2319_v1, %v2326_v6 }
 0x51d   : > { %v1841_v9 = vrot.slane %v1833_v61, %v10145_v43  ;;  %v1848_v10 = vrot.slane %v1834_v62, %v10145_v43  ;;  %v2339_v11 = vrot.slane %v2331_v63, %v10145_v43  ;;  %v2346_v55 = vrot.slane %v2332_v0, %v10145_v43 }
 0x51e   : > { %v1736_v12 = vpop.permute.xlu0 %1735  ;;  %v1741_v13 = vpop.permute.xlu1 %1740  ;;  %v10228_v48 = vrot.slane %v2467_v14, %v10145_v43  ;;  %v10231_v49 = vrot.slane %v7358_v29, %v10145_v43  ;;  %v10235_v53 = vrot.slane %v2483_v30, %v10145_v43  ;;  %v10238_v58 = vrot.slane %v7359_v34, %v10145_v43 }
 0x51f   : > { %v1849_v18 = vcombine.low %v1825_v7, %v1841_v9  ;;  %v1850_v19 = vcombine.high %v1825_v7, %v1841_v9  ;;  %v1865_v20 = vcombine.low %v1832_v8, %v1848_v10  ;;  %v1866_v22 = vcombine.high %v1832_v8, %v1848_v10 }
 0x520   : > { %v2363_v23 = vcombine.low %v2339_v11, %v2355_v44  ;;  %v2364_v24 = vcombine.high %v2339_v11, %v2355_v44  ;;  %v2379_v27 = vcombine.low %v2346_v55, %v2362_v51  ;;  %v2380_v28 = vcombine.high %v2346_v55, %v2362_v51 }
 0x521   : > { %v1857_v37 = vrot.slane %v1849_v18, %v10152_v50  ;;  %v1864_v38 = vrot.slane %v1850_v19, %v10152_v50  ;;  %v10216_v21 = vrot.slane %v1865_v20, %v10152_v50  ;;  %v10219_v36 = vrot.slane %v1866_v22, %v10152_v50 }
 0x522   : > { %v1727_v39 = vpop.permute.xlu1 %1726  ;;  %v2371_v40 = vrot.slane %v2363_v23, %v10152_v50  ;;  %v2378_v41 = vrot.slane %v2364_v24, %v10152_v50  ;;  %v2615_v26 = vpop.permute.xlu0 %2614  ;;  %v2387_v42 = vrot.slane %v2379_v27, %v10152_v50  ;;  %v2394_v44 = vrot.slane %v2380_v28, %v10152_v50 }
 0x523   : > { %v1765_v45 = vcombine.low %v10149_v47, %v1741_v13  ;;  %v1766_v46 = vcombine.high %v10149_v47, %v1741_v13  ;;  %v1764_v51 = vrot.slane %v1750_v16, %v10145_v43  ;;  %v2021_v52 = vcombine.low %v1857_v37, %v1864_v38 }
 0x524   : > { %v1885_v59 = vcombine.low %v10120_v31, %v1736_v12  ;;  %v1886_v25 = vcombine.high %v10120_v31, %v1736_v12  ;;  %v7352_v61 = vcombine.high %v1857_v37, %v1864_v38  ;;  %v2037_v62 = vcombine.low %v10216_v21, %v10219_v36 }
 0x525   : > { %v7353_v63 = vcombine.high %v10216_v21, %v10219_v36  ;;  %v2535_v0 = vcombine.low %v2371_v40, %v2378_v41  ;;  %v7360_v1 = vcombine.high %v2371_v40, %v2378_v41  ;;  %v2551_v6 = vcombine.low %v2387_v42, %v2394_v44 }
 0x526   : > { %v1745_v47 = vpop.permute.xlu1 %1744  ;;  %v1773_v7 = vrot.slane %v1765_v45, %v10145_v43  ;;  %v1780_v8 = vrot.slane %v1766_v46, %v10145_v43  ;;  %v10249_v9 = vrot.slane %v2021_v52, %v10145_v43  ;;  %v7361_v10 = vcombine.high %v2387_v42, %v2394_v44  ;;  %v2633_v31 = vpop.permute.xlu0 %2632 }
 0x527   : > { %v1901_v11 = vcombine.low %v1727_v39, %v1745_v47  ;;  %v1902_v55 = vcombine.high %v1727_v39, %v1745_v47  ;;  %v1893_v16 = vrot.slane %v1885_v59, %v10145_v43  ;;  %v1900_v18 = vrot.slane %v1886_v25, %v10145_v43 }
 0x528   : > { %v1781_v12 = vcombine.low %v10211_v17, %v1773_v7  ;;  %v1782_v13 = vcombine.high %v10211_v17, %v1773_v7  ;;  %v1797_v14 = vcombine.low %v1764_v51, %v1780_v8  ;;  %v1798_v29 = vcombine.high %v1764_v51, %v1780_v8 }
 0x529   : > { %v1909_v19 = vrot.slane %v1901_v11, %v10145_v43  ;;  %v1916_v20 = vrot.slane %v1902_v55, %v10145_v43  ;;  %v10258_v22 = vrot.slane %v7352_v61, %v10145_v43  ;;  %v10261_v23 = vrot.slane %v2037_v62, %v10145_v43 }
 0x52a   : > { %v2657_v24 = vcombine.low %v2615_v26, %v2633_v31  ;;  %v2658_v27 = vcombine.high %v2615_v26, %v2633_v31  ;;  %v10263_v37 = vpop.permute.xlu1 %2616  ;;  %v1789_v38 = vrot.slane %v1781_v12, %v10152_v50  ;;  %v1796_v39 = vrot.slane %v1782_v13, %v10152_v50 }
 0x52b   : > { %v1917_v28 = vcombine.low %v1893_v16, %v1909_v19  ;;  %v1918_v17 = vcombine.high %v1893_v16, %v1909_v19  ;;  %v1933_v30 = vcombine.low %v1900_v18, %v1916_v20  ;;  %v1934_v34 = vcombine.high %v1900_v18, %v1916_v20 }
 0x52c   : > { %v10268_v40 = vrot.slane %v1797_v14, %v10152_v50  ;;  %v10271_v41 = vrot.slane %v1798_v29, %v10152_v50  ;;  %v2542_v46 = vrot.slane %v2535_v0, %v10145_v43  ;;  %v2550_v51 = vrot.slane %v7360_v1, %v10145_v43 }
 0x52d   : > { %v1925_v42 = vrot.slane %v1917_v28, %v10152_v50  ;;  %v1932_v26 = vrot.slane %v1918_v17, %v10152_v50  ;;  %v1941_v44 = vrot.slane %v1933_v30, %v10152_v50  ;;  %v1948_v45 = vrot.slane %v1934_v34, %v10152_v50 }
 0x52e   : > { %v2558_v52 = vrot.slane %v2551_v6, %v10145_v43  ;;  %v2566_v59 = vrot.slane %v7361_v10, %v10145_v43  ;;  %v2665_v25 = vrot.slane %v2657_v24, %v10145_v43  ;;  %v10283_v47 = vrot.slane %v2658_v27, %v10145_v43  ;;  %v2624_v55 = vpop.permute.xlu1 %2623 }
 0x52f   : > { %v2089_v61 = vcombine.low %v1925_v42, %v1932_v26  ;;  %v7354_v62 = vcombine.high %v1925_v42, %v1932_v26  ;;  %v1953_v7 = vcombine.low %v1789_v38, %v1796_v39  ;;  %v7350_v8 = vcombine.high %v1789_v38, %v1796_v39 }
 0x530   : > { %v2499_v31 = vcombine.low %v10228_v48, %v10231_v49  ;;  %v2515_v0 = vcombine.low %v10235_v53, %v10238_v58  ;;  %v1969_v1 = vcombine.low %v10268_v40, %v10271_v41  ;;  %v7351_v6 = vcombine.high %v10268_v40, %v10271_v41 }
 0x531   : > { %v2105_v10 = vcombine.low %v1941_v44, %v1948_v45  ;;  %v7355_v11 = vcombine.high %v1941_v44, %v1948_v45  ;;  %v2500_v14 = vcombine.high %v10228_v48, %v10231_v49  ;;  %v2516_v29 = vcombine.high %v10235_v53, %v10238_v58 }
 0x532   : > { %v10294_v12 = vrot.slane %v2499_v31, %v10152_v50  ;;  %v2523_v13 = vrot.slane %v2515_v0, %v10152_v50  ;;  %v10302_v16 = vrot.slane %v2089_v61, %v10145_v43  ;;  %v10305_v18 = vrot.slane %v7354_v62, %v10145_v43 }
 0x533   : > { %v2463_v19 = vcombine.low %v10181_v54, %v10184_v56  ;;  %v2465_v20 = vcombine.low %v10187_v57, %v10194_v60  ;;  %v10313_v27 = vrot.slane %v2500_v14, %v10152_v50  ;;  %v10316_v48 = vrot.slane %v2516_v29, %v10152_v50 }
 0x534   : > { %v2531_v24 = vcombine.low %v10294_v12, %v2523_v13  ;;  %v2641_v49 = vcombine.low %v10126_v32, %v2624_v55  ;;  %v10320_v53 = vrot.slane %v2105_v10, %v10145_v43  ;;  %v10323_v58 = vrot.slane %v7355_v11, %v10145_v43 }
 0x535   : > { %v2642_v28 = vcombine.high %v10126_v32, %v2624_v55  ;;  %v2567_v17 = vcombine.low %v2542_v46, %v2550_v51  ;;  %v2533_v34 = vcombine.low %v10313_v27, %v10316_v48  ;;  %v2583_v39 = vcombine.low %v2558_v52, %v2566_v59 }
 0x536   : > { %v2603_v30 = vpack.c.bf16 %v2531_v24, %v2463_v19  ;;  %v2649_v38 = vrot.slane %v2641_v49, %v10145_v43  ;;  %v1960_v40 = vrot.slane %v1953_v7, %v10145_v43  ;;  %v2568_v26 = vcombine.high %v2542_v46, %v2550_v51 }
 0x537   : > { %v2656_v41 = vrot.slane %v2642_v28, %v10145_v43  ;;  %v10332_v42 = vrot.slane %v2567_v17, %v10152_v50  ;;  %v2607_v44 = vpack.c.bf16 %v2533_v34, %v2465_v20  ;;  %v1968_v62 = vrot.slane %v7350_v8, %v10145_v43 }
 0x538   : > { %7971 = vmatprep.subr.msk.bf16.mxu1 %vm3057_vm0, %v2603_v30  ;;  %v3065_v32 = vsel %vm3057_vm0, %v2603_v30, 0  ;;  %v2673_v45 = vcombine.low %v2649_v38, %v2665_v25  ;;  %v2674_v61 = vcombine.high %v2649_v38, %v2665_v25  ;;  %v2122_v31 = vcombine.high %v10302_v16, %v10305_v18 }
 0x539   : > { %v2138_v7 = vcombine.high %v10320_v53, %v10323_v58  ;;  %7800 = vmatpush3.bf16.xpose.msra.mxu1 %v3065_v32  ;;  %v2591_v0 = vrot.slane %v2583_v39, %v10152_v50  ;;  %7975 = vmatprep.subr.msk.bf16.mxu0 %vm3057_vm0, %v2607_v44  ;;  %v3185_v46 = vsel %vm3057_vm0, %v2607_v44, 0  ;;  %v2689_v51 = vcombine.low %v2656_v41, %v10283_v47 }
 0x53a   : > { %v10346_v10 = vrot.slane %v2568_v26, %v10152_v50  ;;  %v2584_v25 = vcombine.high %v2558_v52, %v2566_v59  ;;  %7816 = vmatpush3.bf16.xpose.msra.mxu0 %v3185_v46  ;;  %v2681_v8 = vrot.slane %v2673_v45, %v10152_v50  ;;  %v2688_v11 = vrot.slane %v2674_v61, %v10152_v50 }
 0x53b   : > { %v2690_v55 = vcombine.high %v2656_v41, %v10283_v47  ;;  %v2599_v14 = vcombine.low %v10332_v42, %v2591_v0  ;;  %v1976_v29 = vrot.slane %v1969_v1, %v10145_v43  ;;  %v1984_v19 = vrot.slane %v7351_v6, %v10145_v43 }
 0x53c   : > { %v10355_v20 = vrot.slane %v2584_v25, %v10152_v50  ;;  %v2532_v24 = vcombine.high %v10294_v12, %v2523_v13  ;;  %v2052_v52 = vrot.slane %v7353_v63, %v10145_v43  ;;  %v2121_v59 = vcombine.low %v10302_v16, %v10305_v18 }
 0x53d   : > { %v2137_v47 = vcombine.low %v10320_v53, %v10323_v58  ;;  %v2604_v49 = vpack.c.bf16 %v2599_v14, %v2599_v14  ;;  %v10367_v1 = vrot.slane %v2122_v31, %v10152_v50  ;;  %v10370_v6 = vrot.slane %v2138_v7, %v10152_v50 }
 0x53e   : > { %v2601_v12 = vcombine.low %v10346_v10, %v10355_v20  ;;  %v2464_v21 = vcombine.high %v10181_v54, %v10184_v56  ;;  %v2697_v36 = vrot.slane %v2689_v51, %v10152_v50  ;;  %v2704_v63 = vrot.slane %v2690_v55, %v10152_v50 }
 0x53f   : > { %v2845_v13 = vcombine.low %v2681_v8, %v2688_v11  ;;  %7972 = vmatprep.subr.msk.bf16.mxu1 %vm3057_vm0, %v2604_v49  ;;  %v3068_v16 = vsel %vm3057_vm0, %v2604_v49, 0  ;;  %v1985_v58 = vcombine.low %v1960_v40, %v1968_v62  ;;  %v2001_v28 = vcombine.low %v1976_v29, %v1984_v19 }
 0x540   : > { %v2608_v18 = vpack.c.bf16 %v2601_v12, %v2601_v12  ;;  %v2605_v53 = vpack.c.bf16 %v2532_v24, %v2464_v21  ;;  %v7362_v17 = vcombine.high %v2681_v8, %v2688_v11  ;;  %v2053_v30 = vcombine.low %v10249_v9, %v10258_v22 }
 0x541   : > { %7802 = vmatpush3.bf16.xpose.msra.mxu1 %v3068_v16  ;;  %v2069_v54 = vcombine.low %v10261_v23, %v2052_v52  ;;  %v1986_v56 = vcombine.high %v1960_v40, %v1968_v62  ;;  %v1993_v38 = vrot.slane %v1985_v58, %v10152_v50  ;;  %v2009_v39 = vrot.slane %v2001_v28, %v10152_v50 }
 0x542   : > { %7976 = vmatprep.subr.msk.bf16.mxu0 %vm3057_vm0, %v2608_v18  ;;  %v3188_v34 = vsel %vm3057_vm0, %v2608_v18, 0  ;;  %7973 = vmatprep.subr.msk.bf16.mxu1 %vm3057_vm0, %v2605_v53  ;;  %v2002_v41 = vcombine.high %v1976_v29, %v1984_v19  ;;  %v2061_v26 = vrot.slane %v2053_v30, %v10152_v50  ;;  %v2054_v40 = vcombine.high %v10249_v9, %v10258_v22 }
 0x543   : > { %7818 = vmatpush3.bf16.xpose.msra.mxu0 %v3188_v34  ;;  %v2077_v44 = vrot.slane %v2069_v54, %v10152_v50  ;;  %v2000_v32 = vrot.slane %v1986_v56, %v10152_v50  ;;  %v2017_v45 = vcombine.low %v1993_v38, %v2009_v39  ;;  %v2070_v62 = vcombine.high %v10261_v23, %v2052_v52 }
 0x544   : > { %v2016_v61 = vrot.slane %v2002_v41, %v10152_v50  ;;  %v2129_v31 = vrot.slane %v2121_v59, %v10152_v50  ;;  %v2155_v7 = vcombine.low %v10367_v1, %v10370_v6  ;;  %v2068_v51 = vrot.slane %v2054_v40, %v10152_v50 }
 0x545   : > { %v2085_v46 = vcombine.low %v2061_v26, %v2077_v44  ;;  %v2145_v25 = vrot.slane %v2137_v47, %v10152_v50  ;;  %v2861_v8 = vcombine.low %v2697_v36, %v2704_v63  ;;  %v7363_v11 = vcombine.high %v2697_v36, %v2704_v63 }
 0x546   : > { %v2019_v55 = vcombine.low %v2000_v32, %v2016_v61  ;;  %v2084_v9 = vrot.slane %v2070_v62, %v10152_v50  ;;  %v2600_v29 = vcombine.high %v10332_v42, %v2591_v0  ;;  %v10403_v23 = vrot.slane %v2845_v13, %v10145_v43 }
 0x547   : > { %v2157_v22 = vpack.c.bf16 %v2085_v46, %v2017_v45  ;;  %v2153_v14 = vcombine.low %v2129_v31, %v2145_v25  ;;  %v10406_v19 = vrot.slane %v7362_v17, %v10145_v43  ;;  %v2018_v52 = vcombine.high %v1993_v38, %v2009_v39 }
 0x548   : > { %v2087_v24 = vcombine.low %v2068_v51, %v2084_v9  ;;  %v2162_v47 = vpack.c.bf16 %v2155_v7, %v2155_v7  ;;  %v10410_v49 = vrot.slane %v2861_v8, %v10145_v43  ;;  %v10413_v12 = vrot.slane %v7363_v11, %v10145_v43 }
 0x549   : > { %7803 = vmatprep.mubr.msk.bf16.mxu1 %vm3057_vm0, %v2157_v22  ;;  %v2158_v59 = vpack.c.bf16 %v2153_v14, %v2153_v14  ;;  %v2086_v42 = vcombine.high %v2061_v26, %v2077_v44  ;;  %v3125_v0 = vsel %vm3057_vm0, %v2605_v53, 0  ;;  %v2606_v36 = vpack.c.bf16 %v2600_v29, %v2600_v29 }
 0x54a   : > { %v2161_v21 = vpack.c.bf16 %v2087_v24, %v2019_v55  ;;  %v2878_v13 = vcombine.high %v10403_v23, %v10406_v19  ;;  %v2894_v18 = vcombine.high %v10410_v49, %v10413_v12  ;;  %v2534_v53 = vcombine.high %v10313_v27, %v10316_v48 }
 0x54b   : > { %7804 = vmatmul.mubr.msk.bf16.vlgmr.msra.gmra.mrb[4].mxu1 %vm3057_vm0, %v2158_v59  ;;  %v2159_v63 = vpack.c.bf16 %v2086_v42, %v2018_v52  ;;  %v2466_v28 = vcombine.high %v10187_v57, %v10194_v60  ;;  %v3128_v54 = vsel %vm3057_vm0, %v2606_v36, 0  ;;  %v2154_v34 = vcombine.high %v2129_v31, %v2145_v25 }
 0x54c   : > { %7819 = vmatprep.mubr.msk.bf16.mxu0 %vm3057_vm0, %v2161_v21  ;;  %7808 = vmatpush3.bf16.xpose.msra.mxu1 %v3125_v0  ;;  %v10424_v16 = vrot.slane %v2878_v13, %v10152_v50  ;;  %v10431_v58 = vrot.slane %v2894_v18, %v10152_v50  ;;  %v2020_v27 = vcombine.high %v2000_v32, %v2016_v61 }
 0x54d   : > { %7820 = vmatmul.mubr.msk.bf16.vlgmr.msra.gmra.mrb[8].mxu0 %vm3057_vm0, %v2162_v47  ;;  %7974 = vmatprep.subr.msk.bf16.mxu1 %vm3057_vm0, %v2606_v36  ;;  %v2609_v56 = vpack.c.bf16 %v2534_v53, %v2466_v28  ;;  %v2602_v48 = vcombine.high %v10346_v10, %v10355_v20  ;;  %v2088_v38 = vcombine.high %v2068_v51, %v2084_v9 }
 0x54e   : > { %7811 = vmatprep.mubr.msk.bf16.mxu1 %vm3057_vm0, %v2159_v63  ;;  %v2911_v17 = vcombine.low %v10424_v16, %v10431_v58  ;;  %v2912_v30 = vcombine.high %v10424_v16, %v10431_v58  ;;  %v2160_v39 = vpack.c.bf16 %v2154_v34, %v2154_v34  ;;  %v2156_v44 = vcombine.high %v10367_v1, %v10370_v6  ;;  %v2626_v63 = vpop.permute.xlu1 %2625 }
 0x54f   : > { %v2163_v57 = vpack.c.bf16 %v2088_v38, %v2020_v27  ;;  %v3245_v60 = vsel %vm3057_vm0, %v2609_v56, 0  ;;  %v2610_v41 = vpack.c.bf16 %v2602_v48, %v2602_v48 }
 0x550   : > { %v2164_v10 = vpack.c.bf16 %v2156_v44, %v2156_v44 }
 0x551   : > { %v3248_v26 = vsel %vm3057_vm0, %v2610_v41, 0 }
 0x554   : > { %7810 = vmatpush3.bf16.xpose.msra.mxu1 %v3128_v54 }
 0x555   : > { %7977 = vmatprep.subr.msk.bf16.mxu1 %vm3057_vm0, %v2609_v56 }
 0x55b   : > { %7812 = vmatmul.mubr.msk.bf16.vlgmr.msra.gmra.mrb[8].mxu1 %vm3057_vm0, %v2160_v39 }
 0x55c   : > { %7824 = vmatpush3.bf16.xpose.msra.mxu1 %v3245_v60  ;;  %7827 = vmatprep.mubr.msk.bf16.mxu1 %vm3057_vm0, %v2163_v57 }
 0x55d   : > { %7978 = vmatprep.subr.msk.bf16.mxu1 %vm3057_vm0, %v2610_v41 }
 0x564   : > { %7826 = vmatpush3.bf16.xpose.msra.mxu1 %v3248_v26 }
 0x56b   : > { %7828 = vmatmul.mubr.msk.bf16.vlgmr.msra.gmra.mrb[12].mxu1 %vm3057_vm0, %v2164_v10 }
 0x61e   : > { %v7805_v20 = vpop.f32.mrb[4].mxu1 }
 0x61f   : > { %v3104_v32 = vpop.f32.mrb[5].mxu1  ;;  %v3305_v40 = vsel %vm3298_vm1, %v7805_v20, -inf }
 0x620   : > { %v10452_v45 = vpop.f32.mrb[8].mxu0  ;;  %3306 = vmax.xlane.f32.xlu0 %v3305_v40  ;;  %v7806_v61 = vpop.f32.mrb[6].mxu1  ;;  %v3299_v25 = vsel %vm3298_vm1, %v3104_v32, -inf }
 0x621   : > { %v10454_v62 = vpop.f32.mrb[9].mxu0  ;;  %v3107_v31 = vpop.f32.mrb[7].mxu1  ;;  %v3323_v1 = vsel %vm3298_vm1, %v10452_v45, -inf }
 0x622   : > { %v7822_v7 = vpop.f32.mrb[10].mxu0  ;;  %v3302_v46 = vsel %vm3298_vm1, %v3107_v31, -inf  ;;  %v3317_v8 = vsel %vm3298_vm1, %v10454_v62, -inf }
 0x623   : > { %v10457_v51 = vpop.f32.mrb[11].mxu0  ;;  %3303 = vmax.xlane.f32.xlu1 %v3302_v46 }
 0x624   : > { %3324 = vmax.xlane.f32.xlu0 %v3323_v1  ;;  %v3320_v6 = vsel %vm3298_vm1, %v10457_v51, -inf }
 0x627   : > { %3321 = vmax.xlane.f32.xlu1 %v3320_v6 }
 0x628   : > { %3300 = vmax.xlane.f32.xlu0 %v3299_v25 }
 0x62c   : > { %3318 = vmax.xlane.f32.xlu0 %v3317_v8 }
 0x62e   : > { %v7813_v11 = vpop.f32.mrb[8].mxu1 }
 0x62f   : > { %v3164_v55 = vpop.f32.mrb[9].mxu1  ;;  %v3314_v9 = vsel %vm3298_vm1, %v7813_v11, -inf }
 0x630   : > { %3315 = vmax.xlane.f32.xlu1 %v3314_v9  ;;  %v7814_v22 = vpop.f32.mrb[10].mxu1  ;;  %v3308_v14 = vsel %vm3298_vm1, %v3164_v55, -inf }
 0x631   : > { %3309 = vmax.xlane.f32.xlu0 %v3308_v14  ;;  %v3167_v29 = vpop.f32.mrb[11].mxu1 }
 0x632   : > { %v3311_v24 = vsel %vm3298_vm1, %v3167_v29, -inf }
 0x635   : > { %3312 = vmax.xlane.f32.xlu0 %v3311_v24 }
 0x63e   : > { %v10469_v52 = vpop.f32.mrb[12].mxu1 }
 0x63f   : > { %v10471_v59 = vpop.f32.mrb[13].mxu1  ;;  %v3332_v47 = vsel %vm3298_vm1, %v10469_v52, -inf }
 0x640   : > { %3333 = vmax.xlane.f32.xlu1 %v3332_v47  ;;  %v7830_v21 = vpop.f32.mrb[14].mxu1  ;;  %v3326_v42 = vsel %vm3298_vm1, %v10471_v59, -inf }
 0x641   : > { %3327 = vmax.xlane.f32.xlu0 %v3326_v42  ;;  %v10477_v0 = vpop.f32.mrb[15].mxu1  ;;  %v2709_v21 = vcombine.low %v10136_v33, %v2626_v63  ;;  %v2710_v42 = vcombine.high %v10136_v33, %v2626_v63 }
 0x642   : > { %v3329_v36 = vsel %vm3298_vm1, %v10477_v0, -inf }
 0x644   : > { %3330 = vmax.xlane.f32.xlu1 %v3329_v36 }
 0x655   : > { %2634 = vrot.lane.b32.xlu1 %v10136_v33, %s9304_s14 }
 0x657   : > { %2618 = vrot.lane.b32.xlu0 %v10082_v15, %s9303_s20 }
 0x6ad   : > { %v3307_v13 = vpop.xlane.xlu0 %3306 }
 0x6ae   : > { %v3337_v18 = vsub.f32 %v7805_v20, %v3307_v13 }
 0x6b0   : > { %v3351_v53 = vmul.f32 1.442695, %v3337_v18  ;;  %v3304_v28 = vpop.xlane.xlu1 %3303 }
 0x6b1   : > { %v3336_v54 = vsub.f32 %v3107_v31, %v3304_v28  ;;  %v10485_v56 = vpop.xlane.xlu0 %3324  ;;  %v2724_v28 = vrot.slane %v2710_v42, %v10145_v43 }
 0x6b2   : > { %8489 = vpow2.f32 %v3351_v53  ;;  %v3343_v34 = vsub.f32 %v10452_v45, %v10485_v56  ;;  %v2717_v53 = vrot.slane %v2709_v21, %v10145_v43 }
 0x6b3   : > { %v3349_v27 = vmul.f32 1.442695, %v3336_v54 }
 0x6b4   : > { %v10489_v57 = vpop.xlane.xlu1 %3321  ;;  %v3363_v58 = vmul.f32 1.442695, %v3343_v34 }
 0x6b5   : > { %8491 = vpow2.f32 %v3349_v27  ;;  %v3301_v48 = vpop.xlane.xlu0 %3300 }
 0x6b6   : > { %v3335_v38 = vsub.f32 %v3104_v32, %v3301_v48 }
 0x6b8   : > { %v3347_v39 = vmul.f32 1.442695, %v3335_v38 }
 0x6b9   : > { %v10491_v60 = vpop.xlane.xlu0 %3318 }
 0x6ba   : > { %8493 = vpow2.f32 %v3347_v39 }
 0x6bc   : > { %v10493_v41 = vpop.eup %8489 }
 0x6bd   : > { %v3316_v26 = vpop.xlane.xlu1 %3315  ;;  %v3377_v44 = vsel %vm3298_vm1, %v10493_v41, 0.0 }
 0x6be   : > { %v3340_v10 = vsub.f32 %v7813_v11, %v3316_v26  ;;  %v3310_v20 = vpop.xlane.xlu0 %3309  ;;  %3378 = vadd.xlane.f32.xlu0 %v3377_v44 }
 0x6bf   : > { %v10497_v40 = vpop.eup %8491  ;;  %v3338_v61 = vsub.f32 %v3164_v55, %v3310_v20  ;;  %v2893_v20 = vcombine.low %v10410_v49, %v10413_v12 }
 0x6c0   : > { %v3357_v31 = vmul.f32 1.442695, %v3340_v10  ;;  %v3374_v32 = vsel %vm3298_vm1, %v10497_v40, 0.0  ;;  %v2877_v10 = vcombine.low %v10403_v23, %v10406_v19 }
 0x6c1   : > { %v3353_v7 = vmul.f32 1.442695, %v3338_v61  ;;  %3375 = vadd.xlane.f32.xlu1 %v3374_v32 }
 0x6c2   : > { %8495 = vpow2.f32 %v3357_v31  ;;  %v3313_v46 = vpop.xlane.xlu0 %3312 }
 0x6c3   : > { %8497 = vpow2.f32 %v3353_v7  ;;  %v3339_v1 = vsub.f32 %v3167_v29, %v3313_v46 }
 0x6c4   : > { %v10501_v6 = vpop.eup %8493 }
 0x6c5   : > { %v3355_v25 = vmul.f32 1.442695, %v3339_v1  ;;  %v3371_v8 = vsel %vm3298_vm1, %v10501_v6, 0.0 }
 0x6c6   : > { %3372 = vadd.xlane.f32.xlu0 %v3371_v8 }
 0x6c7   : > { %8499 = vpow2.f32 %v3355_v25 }
 0x6cc   : > { %v10505_v11 = vpop.eup %8495 }
 0x6cd   : > { %v10507_v55 = vpop.eup %8497  ;;  %v10509_v9 = vpop.xlane.xlu1 %3333  ;;  %v3386_v22 = vsel %vm3298_vm1, %v10505_v11, 0.0 }
 0x6ce   : > { %3387 = vadd.xlane.f32.xlu1 %v3386_v22  ;;  %v3380_v14 = vsel %vm3298_vm1, %v10507_v55, 0.0  ;;  %v2885_v22 = vrot.slane %v2877_v10, %v10152_v50 }
 0x6cf   : > { %3381 = vadd.xlane.f32.xlu0 %v3380_v14  ;;  %v2901_v14 = vrot.slane %v2893_v20, %v10152_v50 }
 0x6d1   : > { %v10515_v29 = vpop.eup %8499  ;;  %v10517_v24 = vpop.xlane.xlu1 %3330 }
 0x6d2   : > { %v3383_v47 = vsel %vm3298_vm1, %v10515_v29, 0.0  ;;  %v3345_v16 = vsub.f32 %v10477_v0, %v10517_v24 }
 0x6d3   : > { %3384 = vadd.xlane.f32.xlu1 %v3383_v47 }
 0x6d5   : > { %v2635_v36 = vpop.permute.xlu1 %2634 }
 0x6d6   : > { %v2725_v13 = vcombine.low %v10263_v37, %v2635_v36  ;;  %v2726_v18 = vcombine.high %v10263_v37, %v2635_v36 }
 0x6d8   : > { %v2733_v54 = vrot.slane %v2725_v13, %v10145_v43  ;;  %v2740_v27 = vrot.slane %v2726_v18, %v10145_v43  ;;  %v2909_v13 = vcombine.low %v2885_v22, %v2901_v14  ;;  %v2910_v18 = vcombine.high %v2885_v22, %v2901_v14 }
 0x6da   : > { %v2741_v48 = vcombine.low %v2717_v53, %v2733_v54  ;;  %v2742_v38 = vcombine.high %v2717_v53, %v2733_v54  ;;  %v2757_v39 = vcombine.low %v2724_v28, %v2740_v27  ;;  %v2758_v26 = vcombine.high %v2724_v28, %v2740_v27 }
 0x6dc   : > { %v2749_v44 = vrot.slane %v2741_v48, %v10152_v50  ;;  %v2756_v33 = vrot.slane %v2742_v38, %v10152_v50  ;;  %v2765_v63 = vrot.slane %v2757_v39, %v10152_v50  ;;  %v2772_v37 = vrot.slane %v2758_v26, %v10152_v50 }
 0x6de   : > { %v2913_v61 = vcombine.low %v2749_v44, %v2756_v33  ;;  %v7364_v31 = vcombine.high %v2749_v44, %v2756_v33  ;;  %v2929_v32 = vcombine.low %v2765_v63, %v2772_v37  ;;  %v7365_v7 = vcombine.high %v2765_v63, %v2772_v37  ;;  %v3328_v33 = vpop.xlane.xlu0 %3327 }
 0x6df   : > { %v3342_v44 = vsub.f32 %v10457_v51, %v10489_v57  ;;  %v3341_v63 = vsub.f32 %v10454_v62, %v10491_v60  ;;  %v3367_v51 = vmul.f32 1.442695, %v3345_v16 }
 0x6e0   : > { %v2920_v46 = vrot.slane %v2913_v61, %v10145_v43  ;;  %v2928_v1 = vrot.slane %v7364_v31, %v10145_v43  ;;  %v2936_v25 = vrot.slane %v2929_v32, %v10145_v43  ;;  %v2944_v8 = vrot.slane %v7365_v7, %v10145_v43 }
 0x6e1   : > { %v3361_v37 = vmul.f32 1.442695, %v3342_v44  ;;  %v3359_v10 = vmul.f32 1.442695, %v3341_v63 }
 0x6e2   : > { %v2945_v23 = vcombine.low %v2920_v46, %v2928_v1  ;;  %v2961_v19 = vcombine.low %v2936_v25, %v2944_v8  ;;  %v2946_v47 = vcombine.high %v2920_v46, %v2928_v1  ;;  %v2962_v49 = vcombine.high %v2936_v25, %v2944_v8  ;;  %v2619_v32 = vpop.permute.xlu0 %2618 }
 0x6e3   : > { %8501 = vpow2.f32 %v3361_v37 }
 0x6e4   : > { %2627 = vrot.lane.b32.xlu1 %v10082_v15, %s9302_s6  ;;  %v2953_v12 = vrot.slane %v2945_v23, %v10152_v50  ;;  %v2969_v21 = vrot.slane %v2961_v19, %v10152_v50  ;;  %v2960_v42 = vrot.slane %v2946_v47, %v10152_v50  ;;  %v2976_v36 = vrot.slane %v2962_v49, %v10152_v50 }
 0x6e5   : > { %2636 = vrot.lane.b32.xlu0 %v10082_v15, %s9304_s14  ;;  %8503 = vpow2.f32 %v3359_v10 }
 0x6e6   : > { %v2977_v53 = vcombine.low %v2953_v12, %v2969_v21  ;;  %v2978_v28 = vcombine.high %v2953_v12, %v2969_v21  ;;  %v2979_v54 = vcombine.low %v2960_v42, %v2976_v36  ;;  %v2980_v27 = vcombine.high %v2960_v42, %v2976_v36 }
 0x6e8   : > { %v3049_v48 = vpack.c.bf16 %v2977_v53, %v2909_v13  ;;  %v3051_v38 = vpack.c.bf16 %v2978_v28, %v2910_v18  ;;  %v10554_v39 = vpack.c.bf16 %v2979_v54, %v2911_v17  ;;  %v10559_v26 = vpack.c.bf16 %v2980_v27, %v2912_v30 }
 0x6e9   : > { %v3344_v17 = vsub.f32 %v10471_v59, %v3328_v33  ;;  %v3346_v30 = vsub.f32 %v10469_v52, %v10509_v9 }
 0x6ea   : > { %7831 = vmatprep.subr.bf16.mxu0 %v3049_v48  ;;  %7839 = vmatprep.subr.bf16.mxu1 %v3051_v38 }
 0x6eb   : > { %7832 = vmatpush3.bf16.msra.mxu0 %v3049_v48  ;;  %7840 = vmatpush3.bf16.msra.mxu1 %v3051_v38  ;;  %v3365_v20 = vmul.f32 1.442695, %v3344_v17  ;;  %v3369_v62 = vmul.f32 1.442695, %v3346_v30 }
 0x6ed   : > { %8505 = vpow2.f32 %v3365_v20  ;;  %v10573_v59 = vpop.eup %8501 }
 0x6ee   : > { %8507 = vpow2.f32 %v3363_v58  ;;  %v3392_v0 = vsel %vm3298_vm1, %v10573_v59, 0.0 }
 0x6ef   : > { %8509 = vpow2.f32 %v3367_v51  ;;  %v10575_v57 = vpop.eup %8503 }
 0x6f0   : > { %8511 = vpow2.f32 %v3369_v62  ;;  %v3389_v56 = vsel %vm3298_vm1, %v10575_v57, 0.0 }
 0x6f7   : > { %v10579_v60 = vpop.eup %8505 }
 0x6f8   : > { %v10581_v45 = vpop.eup %8507  ;;  %v3398_v52 = vsel %vm3298_vm1, %v10579_v60, 0.0 }
 0x6f9   : > { %v10587_v34 = vpop.eup %8509  ;;  %v3395_v9 = vsel %vm3298_vm1, %v10581_v45, 0.0 }
 0x6fa   : > { %v3401_v24 = vsel %vm3298_vm1, %v10587_v34, 0.0  ;;  %v10593_v61 = vpop.eup %8511 }
 0x6fb   : > { %v3404_v31 = vsel %vm3298_vm1, %v10593_v61, 0.0 }
 0x704   : > { %3393 = vadd.xlane.f32.xlu0 %v3392_v0 }
 0x708   : > { %3399 = vadd.xlane.f32.xlu0 %v3398_v52  ;;  %3390 = vadd.xlane.f32.xlu1 %v3389_v56 }
 0x70c   : > { %3396 = vadd.xlane.f32.xlu1 %v3395_v9  ;;  %3402 = vadd.xlane.f32.xlu0 %v3401_v24 }
 0x710   : > { %3405 = vadd.xlane.f32.xlu0 %v3404_v31 }
 0x74b   : > { %v3379_v7 = vpop.xlane.xlu0 %3378 }
 0x74e   : > { %v3376_v46 = vpop.xlane.xlu1 %3375 }
 0x74f   : > { %8513 = vrcp.f32 %v3376_v46 }
 0x753   : > { %v3373_v1 = vpop.xlane.xlu0 %3372 }
 0x754   : > { %8515 = vrcp.f32 %v3373_v1 }
 0x759   : > { %v8514_v8 = vpop.eup %8513 }
 0x75a   : > { %v3420_v19 = vmul.f32 %v8514_v8, %v10497_v40 }
 0x75b   : > { %v3388_v25 = vpop.xlane.xlu1 %3387 }
 0x75c   : > { %v3382_v22 = vpop.xlane.xlu0 %3381 }
 0x75d   : > { %8517 = vrcp.f32 %v3382_v22 }
 0x75e   : > { %v8516_v14 = vpop.eup %8515 }
 0x75f   : > { %v3419_v23 = vmul.f32 %v8516_v14, %v10501_v6 }
 0x760   : > { %v2637_v47 = vpop.permute.xlu0 %2636  ;;  %v3385_v49 = vpop.xlane.xlu1 %3384 }
 0x761   : > { %8519 = vrcp.f32 %v3385_v49  ;;  %v3431_v12 = vpack.c.bf16 %v3420_v19, %v3419_v23  ;;  %v2793_v21 = vcombine.low %v2619_v32, %v2637_v47  ;;  %v2794_v42 = vcombine.high %v2619_v32, %v2637_v47 }
 0x762   : > { %8521 = vrcp.f32 %v3379_v7 }
 0x763   : > { %7835 = vmatprep.mubr.msk.bf16.mxu0 %vm3298_vm1, %v3431_v12  ;;  %v2801_v53 = vrot.slane %v2793_v21, %v10145_v43  ;;  %v2808_v28 = vrot.slane %v2794_v42, %v10145_v43  ;;  %8523 = vrcp.f32 %v3388_v25 }
 0x764   : > { %v2628_v36 = vpop.permute.xlu1 %2627 }
 0x765   : > { %v2777_v13 = vcombine.low %v10082_v15, %v2628_v36  ;;  %v2778_v18 = vcombine.high %v10082_v15, %v2628_v36 }
 0x767   : > { %v2785_v6 = vrot.slane %v2777_v13, %v10145_v43  ;;  %v2792_v40 = vrot.slane %v2778_v18, %v10145_v43  ;;  %v8518_v54 = vpop.eup %8517 }
 0x768   : > { %v3422_v10 = vmul.f32 %v8518_v54, %v10507_v55 }
 0x769   : > { %v2809_v27 = vcombine.low %v2785_v6, %v2801_v53  ;;  %v2810_v48 = vcombine.high %v2785_v6, %v2801_v53  ;;  %v2825_v38 = vcombine.low %v2792_v40, %v2808_v28  ;;  %v2826_v44 = vcombine.high %v2792_v40, %v2808_v28 }
 0x76b   : > { %v8520_v33 = vpop.eup %8519  ;;  %v2817_v63 = vrot.slane %v2809_v27, %v10152_v50  ;;  %v2824_v15 = vrot.slane %v2810_v48, %v10152_v50  ;;  %v2833_v37 = vrot.slane %v2825_v38, %v10152_v50  ;;  %v2840_v17 = vrot.slane %v2826_v44, %v10152_v50 }
 0x76c   : > { %v3423_v20 = vmul.f32 %v8520_v33, %v10515_v29  ;;  %v8522_v29 = vpop.eup %8521 }
 0x76d   : > { %v2981_v16 = vcombine.low %v2817_v63, %v2824_v15  ;;  %v7366_v58 = vcombine.high %v2817_v63, %v2824_v15  ;;  %v2997_v30 = vcombine.low %v2833_v37, %v2840_v17  ;;  %v7367_v51 = vcombine.high %v2833_v37, %v2840_v17  ;;  %v8524_v1 = vpop.eup %8523 }
 0x76e   : > { %v3433_v62 = vpack.c.bf16 %v3423_v20, %v3422_v10  ;;  %v3421_v23 = vmul.f32 %v8522_v29, %v10493_v41  ;;  %v3424_v19 = vmul.f32 %v8524_v1, %v10505_v11 }
 0x76f   : > { %v2988_v0 = vrot.slane %v2981_v16, %v10145_v43  ;;  %v2996_v52 = vrot.slane %v7366_v58, %v10145_v43  ;;  %v3004_v56 = vrot.slane %v2997_v30, %v10145_v43  ;;  %v3012_v9 = vrot.slane %v7367_v51, %v10145_v43 }
 0x770   : > { %7843 = vmatprep.mubr.msk.bf16.mxu1 %vm3298_vm1, %v3433_v62  ;;  %v3432_v41 = vpack.c.bf16 %v3421_v23, %v3421_v23  ;;  %v3434_v11 = vpack.c.bf16 %v3424_v19, %v3424_v19 }
 0x771   : > { %v3013_v24 = vcombine.low %v2988_v0, %v2996_v52  ;;  %v3029_v31 = vcombine.low %v3004_v56, %v3012_v9  ;;  %v3014_v55 = vcombine.high %v2988_v0, %v2996_v52  ;;  %v3030_v32 = vcombine.high %v3004_v56, %v3012_v9 }
 0x773   : > { %v3021_v7 = vrot.slane %v3013_v24, %v10152_v50  ;;  %v3037_v46 = vrot.slane %v3029_v31, %v10152_v50  ;;  %v3028_v22 = vrot.slane %v3014_v55, %v10152_v50  ;;  %v3044_v14 = vrot.slane %v3030_v32, %v10152_v50 }
 0x775   : > { %v3045_v25 = vcombine.low %v3021_v7, %v3037_v46  ;;  %v3046_v8 = vcombine.high %v3021_v7, %v3037_v46  ;;  %v3047_v42 = vcombine.low %v3028_v22, %v3044_v14  ;;  %v3048_v36 = vcombine.high %v3028_v22, %v3044_v14 }
 0x777   : > { %v3050_v47 = vpack.c.bf16 %v3045_v25, %v3045_v25  ;;  %v3052_v49 = vpack.c.bf16 %v3046_v8, %v3046_v8  ;;  %v3054_v13 = vpack.c.bf16 %v3047_v42, %v3047_v42  ;;  %v3056_v18 = vpack.c.bf16 %v3048_v36, %v3048_v36 }
 0x779   : > { %7979 = vmatprep.subr.msk.bf16.mxu0 %vm3445_vm2, %v3050_v47  ;;  %7980 = vmatprep.subr.msk.bf16.mxu1 %vm3445_vm2, %v3052_v49  ;;  %v3447_v12 = vsel %vm3445_vm2, %v3050_v47, 0  ;;  %v3504_v21 = vsel %vm3445_vm2, %v3052_v49, 0  ;;  %v3561_v53 = vsel %vm3445_vm2, %v3054_v13, 0  ;;  %v3618_v28 = vsel %vm3445_vm2, %v3056_v18, 0 }
 0x77a   : > { %7834 = vmatpush3.bf16.msra.mxu0 %v3447_v12  ;;  %7842 = vmatpush3.bf16.msra.mxu1 %v3504_v21 }
 0x77b   : > { %7847 = vmatprep.subr.bf16.mxu0 %v10554_v39  ;;  %7855 = vmatprep.subr.bf16.mxu1 %v10559_v26 }
 0x77d   : > { %7836 = vmatmul.mubr.msk.bf16.vlgmr.msra.gmra.mrb[12].mxu0 %vm3298_vm1, %v3432_v41  ;;  %7844 = vmatmul.mubr.msk.bf16.vlgmr.msra.gmra.mrb[16].mxu1 %vm3298_vm1, %v3434_v11 }
 0x77e   : > { %7848 = vmatpush3.bf16.msra.mxu0 %v10554_v39  ;;  %7856 = vmatpush3.bf16.msra.mxu1 %v10559_v26 }
 0x77f   : > { %7981 = vmatprep.subr.msk.bf16.mxu0 %vm3445_vm2, %v3054_v13  ;;  %7982 = vmatprep.subr.msk.bf16.mxu1 %vm3445_vm2, %v3056_v18 }
 0x782   : > { %7850 = vmatpush3.bf16.msra.mxu0 %v3561_v53  ;;  %7858 = vmatpush3.bf16.msra.mxu1 %v3618_v28 }
 0x791   : > { %v3394_v6 = vpop.xlane.xlu0 %3393 }
 0x792   : > { %8525 = vrcp.f32 %v3394_v6 }
 0x795   : > { %v3400_v40 = vpop.xlane.xlu0 %3399  ;;  %v3391_v54 = vpop.xlane.xlu1 %3390 }
 0x796   : > { %8527 = vrcp.f32 %v3391_v54 }
 0x797   : > { %8529 = vrcp.f32 %v3400_v40 }
 0x799   : > { %v3403_v27 = vpop.xlane.xlu0 %3402  ;;  %v3397_v39 = vpop.xlane.xlu1 %3396 }
 0x79a   : > { %8531 = vrcp.f32 %v3403_v27 }
 0x79b   : > { %8533 = vrcp.f32 %v3397_v39 }
 0x79c   : > { %v8526_v48 = vpop.eup %8525 }
 0x79d   : > { %v3406_v26 = vpop.xlane.xlu0 %3405  ;;  %v3426_v63 = vmul.f32 %v8526_v48, %v10573_v59 }
 0x79e   : > { %8535 = vrcp.f32 %v3406_v26 }
 0x7a0   : > { %v8528_v38 = vpop.eup %8527 }
 0x7a1   : > { %v8530_v44 = vpop.eup %8529  ;;  %v3425_v33 = vmul.f32 %v8528_v38, %v10575_v57  ;;  %v8275_v57 = vld [vmem:[#allocation13] sm:$0xff]  }
 0x7a2   : > { %v3428_v10 = vmul.f32 %v8530_v44, %v10579_v60  ;;  %v8276_v60 = vld [vmem:[#allocation13 + $0x8] sm:$0xff]   ;;  %7863 = vmatprep.subr.bf16.mxu0 %v8275_v57 }
 0x7a3   : > { %v3435_v37 = vpack.c.bf16 %v3426_v63, %v3425_v33 }
 0x7a4   : > { %v8532_v15 = vpop.eup %8531 }
 0x7a5   : > { %v8534_v17 = vpop.eup %8533  ;;  %v3429_v20 = vmul.f32 %v8532_v15, %v10587_v34  ;;  %7851 = vmatprep.mubr.msk.bf16.mxu0 %vm3298_vm1, %v3435_v37  ;;  %v8278_v34 = vld [vmem:[#allocation13 + $0x18] sm:$0xff]  }
 0x7a6   : > { %v3427_v16 = vmul.f32 %v8534_v17, %v10581_v45  ;;  %v8277_v45 = vld [vmem:[#allocation13 + $0x10] sm:$0xff]  }
 0x7a7   : > { %v3437_v58 = vpack.c.bf16 %v3429_v20, %v3428_v10 }
 0x7a8   : > { %v8536_v30 = vpop.eup %8535  ;;  %v3436_v51 = vpack.c.bf16 %v3427_v16, %v3427_v16 }
 0x7a9   : > { %v3430_v62 = vmul.f32 %v8536_v30, %v10593_v61  ;;  %7859 = vmatprep.mubr.msk.bf16.mxu1 %vm3298_vm1, %v3437_v58 }
 0x7aa   : > { %7852 = vmatmul.mubr.msk.bf16.vlgmr.msra.gmra.mrb[16].mxu0 %vm3298_vm1, %v3436_v51 }
 0x7ab   : > { %v3438_v59 = vpack.c.bf16 %v3430_v62, %v3430_v62  ;;  %7864 = vmatpush3.bf16.msra.mxu0 %v8275_v57 }
 0x7ac   : > { %7865 = vmatprep.subr.bf16.mxu0 %v8276_v60 }
 0x7ad   : > { %7860 = vmatmul.mubr.msk.bf16.vlgmr.msra.gmra.mrb[20].mxu1 %vm3298_vm1, %v3438_v59 }
 0x7ae   : > { %4496 = vmatprep.mubr.bf16.mxu1 %v9301_v35 }
 0x7af   : > { %7866 = vmatpush3.bf16.msra.mxu0 %v8276_v60 }
 0x7b0   : > { %7867 = vmatprep.subr.bf16.mxu0 %v8277_v45 }
 0x7b3   : > { %7868 = vmatpush3.bf16.msra.mxu0 %v8277_v45 }
 0x7b4   : > { %7869 = vmatprep.subr.bf16.mxu0 %v8278_v34 }
 0x7b7   : > { %7870 = vmatpush3.bf16.msra.mxu0 %v8278_v34 }
 0x850   : > { %v7837_v61 = vpop.f32.mrb[12].mxu0  ;;  %v7845_v0 = vpop.f32.mrb[16].mxu1 }
 0x851   : > { %v3483_v52 = vpop.f32.mrb[13].mxu0  ;;  %v3540_v56 = vpop.f32.mrb[17].mxu1 }
 0x852   : > { %v7838_v9 = vpop.f32.mrb[14].mxu0  ;;  %v7846_v24 = vpop.f32.mrb[18].mxu1 }
 0x853   : > { %v3486_v31 = vpop.f32.mrb[15].mxu0  ;;  %v3543_v55 = vpop.f32.mrb[19].mxu1 }
 0x87d   : > { %v7853_v32 = vpop.f32.mrb[16].mxu0 }
 0x87e   : > { %v3804_v29 = vcombine.low %v7837_v61, %v7853_v32  ;;  %v3805_v7 = vcombine.high %v7837_v61, %v7853_v32  ;;  %v3597_v46 = vpop.f32.mrb[17].mxu0 }
 0x87f   : > { %v3668_v1 = vcombine.low %v3483_v52, %v3597_v46  ;;  %v3669_v25 = vcombine.high %v3483_v52, %v3597_v46  ;;  %v7854_v8 = vpop.f32.mrb[18].mxu0 }
 0x880   : > { %v3600_v22 = vpop.f32.mrb[19].mxu0  ;;  %v7861_v14 = vpop.f32.mrb[20].mxu1  ;;  %v3812_v41 = vrot.slane %v3804_v29, %v10145_v43  ;;  %v3819_v11 = vrot.slane %v3805_v7, %v10145_v43 }
 0x881   : > { %v3736_v23 = vcombine.low %v3486_v31, %v3600_v22  ;;  %v3737_v19 = vcombine.high %v3486_v31, %v3600_v22  ;;  %v3654_v47 = vpop.f32.mrb[21].mxu1  ;;  %v3820_v49 = vcombine.low %v7845_v0, %v7861_v14  ;;  %v3821_v12 = vcombine.high %v7845_v0, %v7861_v14  ;;  %v8279_v0 = vld [vmem:[#allocation13 + $0x20] sm:$0xff]  }
 0x882   : > { %v3684_v21 = vcombine.low %v3540_v56, %v3654_v47  ;;  %v3685_v42 = vcombine.high %v3540_v56, %v3654_v47  ;;  %v7862_v36 = vpop.f32.mrb[22].mxu1  ;;  %v3676_v13 = vrot.slane %v3668_v1, %v10145_v43  ;;  %v3683_v18 = vrot.slane %v3669_v25, %v10145_v43  ;;  %7871 = vmatprep.subr.bf16.mxu0 %v8279_v0 }
 0x883   : > { %v3657_v53 = vpop.f32.mrb[23].mxu1  ;;  %v3828_v28 = vrot.slane %v3820_v49, %v10145_v43  ;;  %v3835_v6 = vrot.slane %v3821_v12, %v10145_v43  ;;  %v3744_v27 = vrot.slane %v3736_v23, %v10145_v43  ;;  %v3751_v39 = vrot.slane %v3737_v19, %v10145_v43  ;;  %7872 = vmatpush3.bf16.msra.mxu0 %v8279_v0 }
 0x884   : > { %v3692_v40 = vrot.slane %v3684_v21, %v10145_v43  ;;  %v3699_v54 = vrot.slane %v3685_v42, %v10145_v43  ;;  %v3752_v26 = vcombine.low %v3543_v55, %v3657_v53  ;;  %v3753_v48 = vcombine.high %v3543_v55, %v3657_v53 }
 0x885   : > { %v3836_v38 = vcombine.low %v3812_v41, %v3828_v28  ;;  %v3837_v44 = vcombine.high %v3812_v41, %v3828_v28  ;;  %v3852_v33 = vcombine.low %v3819_v11, %v3835_v6  ;;  %v3853_v63 = vcombine.high %v3819_v11, %v3835_v6 }
 0x886   : > { %v3700_v15 = vcombine.low %v3676_v13, %v3692_v40  ;;  %v3701_v37 = vcombine.high %v3676_v13, %v3692_v40  ;;  %v3716_v17 = vcombine.low %v3683_v18, %v3699_v54  ;;  %v3717_v10 = vcombine.high %v3683_v18, %v3699_v54 }
 0x887   : > { %v3844_v20 = vrot.slane %v3836_v38, %v10152_v50  ;;  %v3851_v16 = vrot.slane %v3837_v44, %v10152_v50  ;;  %v3860_v58 = vrot.slane %v3852_v33, %v10152_v50  ;;  %v3867_v30 = vrot.slane %v3853_v63, %v10152_v50  ;;  %v8280_v38 = vld [vmem:[#allocation13 + $0x28] sm:$0xff]  }
 0x888   : > { %v3708_v51 = vrot.slane %v3700_v15, %v10152_v50  ;;  %v3715_v62 = vrot.slane %v3701_v37, %v10152_v50  ;;  %v3724_v59 = vrot.slane %v3716_v17, %v10152_v50  ;;  %v3731_v57 = vrot.slane %v3717_v10, %v10152_v50  ;;  %7873 = vmatprep.subr.bf16.mxu0 %v8280_v38 }
 0x889   : > { %v4008_v60 = vcombine.low %v3844_v20, %v3851_v16  ;;  %v7388_v45 = vcombine.high %v3844_v20, %v3851_v16  ;;  %v4024_v34 = vcombine.low %v3860_v58, %v3867_v30  ;;  %v7389_v61 = vcombine.high %v3860_v58, %v3867_v30  ;;  %7874 = vmatpush3.bf16.msra.mxu0 %v8280_v38 }
 0x88a   : > { %v3872_v52 = vcombine.low %v3708_v51, %v3715_v62  ;;  %v7384_v56 = vcombine.high %v3708_v51, %v3715_v62  ;;  %v3888_v9 = vcombine.low %v3724_v59, %v3731_v57  ;;  %v7385_v24 = vcombine.high %v3724_v59, %v3731_v57 }
 0x88b   : > { %v3760_v31 = vrot.slane %v3752_v26, %v10145_v43  ;;  %v3767_v55 = vrot.slane %v3753_v48, %v10145_v43  ;;  %v4015_v32 = vrot.slane %v4008_v60, %v10145_v43  ;;  %v4023_v29 = vrot.slane %v7388_v45, %v10145_v43  ;;  %v8281_v60 = vld [vmem:[#allocation13 + $0x30] sm:$0xff]  }
 0x88c   : > { %v3879_v7 = vrot.slane %v3872_v52, %v10145_v43  ;;  %v3887_v46 = vrot.slane %v7384_v56, %v10145_v43  ;;  %v3895_v1 = vrot.slane %v3888_v9, %v10145_v43  ;;  %v3903_v25 = vrot.slane %v7385_v24, %v10145_v43  ;;  %7875 = vmatprep.subr.bf16.mxu0 %v8281_v60 }
 0x88d   : > { %v3768_v8 = vcombine.low %v3744_v27, %v3760_v31  ;;  %v3769_v22 = vcombine.high %v3744_v27, %v3760_v31  ;;  %v3784_v14 = vcombine.low %v3751_v39, %v3767_v55  ;;  %v3785_v23 = vcombine.high %v3751_v39, %v3767_v55  ;;  %v8282_v31 = vld [vmem:[#allocation13 + $0x38] sm:$0xff]   ;;  %7876 = vmatpush3.bf16.msra.mxu0 %v8281_v60 }
 0x88e   : > { %v4031_v19 = vrot.slane %v4024_v34, %v10145_v43  ;;  %v4039_v47 = vrot.slane %v7389_v61, %v10145_v43  ;;  %v4041_v49 = vcombine.high %v4015_v32, %v4023_v29  ;;  %v4040_v12 = vcombine.low %v4015_v32, %v4023_v29  ;;  %7877 = vmatprep.subr.bf16.mxu0 %v8282_v31  ;;  %v8283_v60 = vld [vmem:[#allocation19] ss:$16 sps:$4 sm:$0xff]  }
 0x88f   : > { %v3776_v21 = vrot.slane %v3768_v8, %v10152_v50  ;;  %v3783_v42 = vrot.slane %v3769_v22, %v10152_v50  ;;  %v3792_v36 = vrot.slane %v3784_v14, %v10152_v50  ;;  %v3799_v41 = vrot.slane %v3785_v23, %v10152_v50 }
 0x890   : > { %v4055_v11 = vrot.slane %v4041_v49, %v10152_v50  ;;  %v4057_v13 = vcombine.high %v4031_v19, %v4039_v47  ;;  %v10682_v18 = vrot.slane %v4040_v12, %v10152_v50  ;;  %v4056_v53 = vcombine.low %v4031_v19, %v4039_v47 }
 0x891   : > { %v3940_v28 = vcombine.low %v3776_v21, %v3783_v42  ;;  %v7386_v6 = vcombine.high %v3776_v21, %v3783_v42  ;;  %v3956_v40 = vcombine.low %v3792_v36, %v3799_v41  ;;  %v7387_v54 = vcombine.high %v3792_v36, %v3799_v41  ;;  %7878 = vmatpush3.bf16.msra.mxu0 %v8282_v31 }
 0x892   : > { %v4071_v27 = vrot.slane %v4057_v13, %v10152_v50  ;;  %v4064_v39 = vrot.slane %v4056_v53, %v10152_v50  ;;  %v3904_v26 = vcombine.low %v3879_v7, %v3887_v46  ;;  %v3920_v48 = vcombine.low %v3895_v1, %v3903_v25 }
 0x893   : > { %v3947_v44 = vrot.slane %v3940_v28, %v10145_v43  ;;  %v3955_v33 = vrot.slane %v7386_v6, %v10145_v43  ;;  %v3963_v63 = vrot.slane %v3956_v40, %v10145_v43  ;;  %v3971_v15 = vrot.slane %v7387_v54, %v10145_v43 }
 0x894   : > { %v4074_v37 = vcombine.low %v4055_v11, %v4071_v27  ;;  %v4073_v17 = vcombine.high %v10682_v18, %v4064_v39  ;;  %v4075_v10 = vcombine.high %v4055_v11, %v4071_v27  ;;  %v3912_v20 = vrot.slane %v3904_v26, %v10152_v50 }
 0x895   : > { %v3928_v16 = vrot.slane %v3920_v48, %v10152_v50  ;;  %v3972_v58 = vcombine.low %v3947_v44, %v3955_v33  ;;  %v3988_v30 = vcombine.low %v3963_v63, %v3971_v15  ;;  %v3905_v51 = vcombine.high %v3879_v7, %v3887_v46 }
 0x896   : > { %4095 = vrot.lane.b32.xlu1 %v4074_v37, %s9302_s6  ;;  %4083 = vrot.lane.b32.xlu0 %v4073_v17, %s9304_s14  ;;  %v3921_v62 = vcombine.high %v3895_v1, %v3903_v25  ;;  %v3973_v59 = vcombine.high %v3947_v44, %v3955_v33  ;;  %v3989_v57 = vcombine.high %v3963_v63, %v3971_v15  ;;  %v7390_v33 = vld [vmem:[#allocation14] ss:$0 sm:$0xff] }
 0x897   : > { %v3936_v45 = vcombine.low %v3912_v20, %v3928_v16  ;;  %v3937_v34 = vcombine.high %v3912_v20, %v3928_v16  ;;  %v3980_v61 = vrot.slane %v3972_v58, %v10152_v50  ;;  %v3996_v0 = vrot.slane %v3988_v30, %v10152_v50  ;;  %v8595_v20 = vld [vmem:[%s9994_s5] sm:$0xff] }
 0x898   : > { %v3919_v52 = vrot.slane %v3905_v51, %v10152_v50  ;;  %v3935_v56 = vrot.slane %v3921_v62, %v10152_v50  ;;  %v3987_v9 = vrot.slane %v3973_v59, %v10152_v50  ;;  %v4003_v24 = vrot.slane %v3989_v57, %v10152_v50  ;;  %v8596_v51 = vld [vmem:[%s9994_s5 + $0x8] sm:$0xff]  ;;  %v8597_v59 = vld [vmem:[%s10004_s11] sm:$0xff]  ;;  %s11333_s5 = sld [smem:[#allocation73_spill]] }
 0x899   : > { %v4005_v55 = vcombine.high %v3980_v61, %v3996_v0  ;;  %v4004_v32 = vcombine.low %v3980_v61, %v3996_v0  ;;  %v4072_v29 = vcombine.low %v10682_v18, %v4064_v39  ;;  %v8288_v61 = vld [vmem:[#allocation19 + $0xc] ss:$16 sps:$4 sm:$0xff]   ;;  %v8291_v0 = vld [vmem:[#allocation19 + $0x24] ss:$16 sps:$4 sm:$0xff]  }
 0x89a   : > { %4107 = vrot.lane.b32.xlu0 %v4075_v10, %s9303_s20  ;;  %v3938_v7 = vcombine.low %v3919_v52, %v3935_v56  ;;  %v4006_v46 = vcombine.low %v3987_v9, %v4003_v24  ;;  %v3939_v1 = vcombine.high %v3919_v52, %v3935_v56  ;;  %v4007_v25 = vcombine.high %v3987_v9, %v4003_v24  ;;  %v8294_v52 = vld [vmem:[#allocation19 + $0x2c] ss:$16 sps:$4 sm:$0xff]   ;;  %v8289_v56 = vld [vmem:[#allocation19 + $0x20] ss:$16 sps:$4 sm:$0xff]   ;;  %v8292_v9 = vld [vmem:[#allocation19 + $0x28] ss:$16 sps:$4 sm:$0xff]  }
 0x89b   : > { %v8228_v8 = vpack.i.bf16 %v4005_v55, %v3937_v34  ;;  %v8286_v34 = vld [vmem:[#allocation19 + $0x8] ss:$16 sps:$4 sm:$0xff]   ;;  %4515 = vmatprep.subr.bf16.mxu0 %v8288_v61 }
 0x89c   : > { %v8233_v22 = vpack.i.bf16 %v4006_v46, %v3938_v7  ;;  %v8238_v14 = vpack.i.bf16 %v4007_v25, %v3939_v1 }
 0x89d   : > { %8229 = vrot.lane.b32.xlu1 %v8228_v8, %s9304_s14 }
 0x8a1   : > { %8234 = vrot.lane.b32.xlu1 %v8233_v22, %s9302_s6 }
 0x8a5   : > { %8239 = vrot.lane.b32.xlu1 %v8238_v14, %s9303_s20 }
 0x908   : > { %v4096_v23 = vpop.permute.xlu1 %4095  ;;  %v4084_v47 = vpop.permute.xlu0 %4083 }
 0x909   : > { %v4114_v12 = vsel %vm3057_vm0, %v4072_v29, %v4084_v47  ;;  %v8298_v47 = vld [vmem:[#allocation19 + $0x48] ss:$16 sps:$4 sm:$0xff]  }
 0x90a   : > { %v4118_v13 = vsel %vm4115_vm3, %v4114_v12, %v4096_v23  ;;  %v8295_v23 = vld [vmem:[#allocation19 + $0x40] ss:$16 sps:$4 sm:$0xff]   ;;  %v8303_v12 = vld [vmem:[#allocation19 + $0x64] ss:$16 sps:$4 sm:$0xff]  }
 0x90c   : > { %v4108_v11 = vpop.permute.xlu0 %4107 }
 0x90d   : > { %v4122_v54 = vsel %vm4119_vm4, %v4118_v13, %v4108_v11  ;;  %v8312_v11 = vld [vmem:[#allocation19 + $0x8c] ss:$16 sps:$4 sm:$0xff]   ;;  %v8307_v13 = vld [vmem:[#allocation19 + $0x80] ss:$16 sps:$4 sm:$0xff]  }
 0x90e   : > { %v4124_v44 = vpack.c.bf16 %v4122_v54, %v4122_v54  ;;  %v8321_v54 = vld [vmem:[#allocation19 + $0xc4] ss:$16 sps:$4 sm:$0xff]  }
 0x90f   : > { %v8230_v19 = vpop.permute.xlu1 %8229 }
 0x910   : > { %v8232_v21 = vunpack.i.h.bf16 %v8230_v19  ;;  %v8231_v42 = vunpack.i.l.bf16 %v8230_v19  ;;  %v8297_v19 = vld [vmem:[#allocation19 + $0x44] ss:$16 sps:$4 sm:$0xff]  }
 0x912   : > { %v4112_v53 = vsel %vm3057_vm0, %v3936_v45, %v8231_v42  ;;  %v4113_v28 = vsel %vm3057_vm0, %v4004_v32, %v8232_v21  ;;  %v8285_v45 = vld [vmem:[#allocation19 + $0x4] ss:$16 sps:$4 sm:$0xff]   ;;  %v8301_v21 = vld [vmem:[#allocation19 + $0x60] ss:$16 sps:$4 sm:$0xff]   ;;  %v8306_v42 = vld [vmem:[#allocation19 + $0x6c] ss:$16 sps:$4 sm:$0xff]  }
 0x913   : > { %v8235_v49 = vpop.permute.xlu1 %8234  ;;  %4464 = vmatprep.subr.bf16.mxu1 %v8285_v45 }
 0x914   : > { %v8237_v36 = vunpack.i.h.bf16 %v8235_v49  ;;  %v8236_v41 = vunpack.i.l.bf16 %v8235_v49  ;;  %4465 = vmatpush1.bf16.msra.mxu1 %v8283_v60  ;;  %v8300_v49 = vld [vmem:[#allocation19 + $0x4c] ss:$16 sps:$4 sm:$0xff]  }
 0x915   : > { %4466 = vmatprep.subr.bf16.mxu1 %v8291_v0  ;;  %v7399_v60 = vld [vmem:[#allocation16] ss:$0 sm:$0xff] }
 0x916   : > { %v4116_v27 = vsel %vm4115_vm3, %v4112_v53, %v8236_v41  ;;  %v4117_v39 = vsel %vm4115_vm3, %v4113_v28, %v8237_v36  ;;  %v8304_v36 = vld [vmem:[#allocation19 + $0x68] ss:$16 sps:$4 sm:$0xff]   ;;  %v8309_v41 = vld [vmem:[#allocation19 + $0x84] ss:$16 sps:$4 sm:$0xff]   ;;  %v8318_v28 = vld [vmem:[#allocation19 + $0xac] ss:$16 sps:$4 sm:$0xff]  }
 0x917   : > { %v8240_v18 = vpop.permute.xlu1 %8239  ;;  %v8315_v53 = vld [vmem:[#allocation19 + $0xa4] ss:$16 sps:$4 sm:$0xff]  }
 0x918   : > { %v8242_v6 = vunpack.i.h.bf16 %v8240_v18  ;;  %v8241_v40 = vunpack.i.l.bf16 %v8240_v18  ;;  %4467 = vmatpush1.bf16.msra.mxu1 %v8289_v56  ;;  %v8310_v18 = vld [vmem:[#allocation19 + $0x88] ss:$16 sps:$4 sm:$0xff]  }
 0x919   : > { %4468 = vmatprep.subr.bf16.mxu1 %v8297_v19  ;;  %v8337_v19 = vld [vmem:[#allocation20 + $0x8] sm:$0xff]  }
 0x91a   : > { %v4120_v26 = vsel %vm4119_vm4, %v4116_v27, %v8241_v40  ;;  %v4121_v48 = vsel %vm4119_vm4, %v4117_v39, %v8242_v6  ;;  %v8313_v6 = vld [vmem:[#allocation19 + $0xa0] ss:$16 sps:$4 sm:$0xff]   ;;  %v8316_v40 = vld [vmem:[#allocation19 + $0xa8] ss:$16 sps:$4 sm:$0xff]   ;;  %v8324_v27 = vld [vmem:[#allocation19 + $0xcc] ss:$16 sps:$4 sm:$0xff]  }
 0x91b   : > { %v4123_v38 = vpack.c.bf16 %v4121_v48, %v4120_v26  ;;  %v8319_v39 = vld [vmem:[#allocation19 + $0xc0] ss:$16 sps:$4 sm:$0xff]   ;;  %v8322_v26 = vld [vmem:[#allocation19 + $0xc8] ss:$16 sps:$4 sm:$0xff]   ;;  %v8327_v48 = vld [vmem:[#allocation19 + $0xe4] ss:$16 sps:$4 sm:$0xff]  }
 0x91c   : > { %4469 = vmatpush1.bf16.msra.mxu1 %v8295_v23  ;;  %v8336_v23 = vld [vmem:[#allocation20 + $0xc8] sm:$0xff]  }
 0x91d   : > { %7879 = vmatprep.mubr.bf16.mxu0 %v4123_v38  ;;  %4470 = vmatprep.subr.bf16.mxu1 %v8303_v12  ;;  %v8330_v38 = vld [vmem:[#allocation19 + $0xec] ss:$16 sps:$4 sm:$0xff]   ;;  %v8340_v12 = vld [vmem:[#allocation20 + $0xd0] sm:$0xff]  }
 0x91e   : > { %7880 = vmatmul.mubr.bf16.vlgmr.msra.gmra.mrb[20].mxu0 %v4124_v44  ;;  %v8325_v44 = vld [vmem:[#allocation19 + $0xe0] ss:$16 sps:$4 sm:$0xff]  }
 0x91f   : > { %4547 = vmatprep.mubr.bf16.mxu0 %v9301_v35  ;;  %4516 = vmatpush1.bf16.msra.mxu0 %v8286_v34 }
 0x920   : > { %4517 = vmatprep.subr.bf16.mxu0 %v8294_v52  ;;  %4471 = vmatpush1.bf16.msra.mxu1 %v8301_v21  ;;  %v7400_v52 = vld [vmem:[#allocation17] ss:$0 sm:$0xff]  ;;  %v8341_v21 = vld [vmem:[#allocation20 + $0x10] sm:$0xff]  }
 0x921   : > { %4472 = vmatprep.subr.bf16.mxu1 %v8309_v41  ;;  %v8344_v41 = vld [vmem:[#allocation20 + $0xd8] sm:$0xff]  }
 0x923   : > { %4518 = vmatpush1.bf16.msra.mxu0 %v8292_v9 }
 0x924   : > { %4519 = vmatprep.subr.bf16.mxu0 %v8300_v49  ;;  %4473 = vmatpush1.bf16.msra.mxu1 %v8307_v13  ;;  %v8339_v49 = vld [vmem:[#allocation20 + $0x50] sm:$0xff]   ;;  %v8346_v13 = vld [vmem:[#allocation20 + $0x98] sm:$0xff]  }
 0x925   : > { %4474 = vmatprep.subr.bf16.mxu1 %v8315_v53  ;;  %v8348_v53 = vld [vmem:[#allocation20 + $0xe0] sm:$0xff]  }
 0x927   : > { %4520 = vmatpush1.bf16.msra.mxu0 %v8298_v47  ;;  %v8338_v47 = vld [vmem:[#allocation20 + $0x88] sm:$0xff]  }
 0x928   : > { %4521 = vmatprep.subr.bf16.mxu0 %v8306_v42  ;;  %4475 = vmatpush1.bf16.msra.mxu1 %v8313_v6  ;;  %v8342_v42 = vld [vmem:[#allocation20 + $0x90] sm:$0xff]   ;;  %v8350_v6 = vld [vmem:[#allocation20 + $0xa0] sm:$0xff]  }
 0x929   : > { %4476 = vmatprep.subr.bf16.mxu1 %v8321_v54  ;;  %v8352_v54 = vld [vmem:[#allocation20 + $0xe8] sm:$0xff]  }
 0x92b   : > { %4522 = vmatpush1.bf16.msra.mxu0 %v8304_v36  ;;  %v8343_v36 = vld [vmem:[#allocation20 + $0x58] sm:$0xff]  }
 0x92c   : > { %4523 = vmatprep.subr.bf16.mxu0 %v8312_v11  ;;  %4477 = vmatpush1.bf16.msra.mxu1 %v8319_v39  ;;  %v8345_v11 = vld [vmem:[#allocation20 + $0x18] sm:$0xff]   ;;  %v8354_v39 = vld [vmem:[#allocation20 + $0xa8] sm:$0xff]  }
 0x92d   : > { %4478 = vmatprep.subr.bf16.mxu1 %v8327_v48  ;;  %v8356_v48 = vld [vmem:[#allocation20 + $0xf0] sm:$0xff]  }
 0x92f   : > { %4524 = vmatpush1.bf16.msra.mxu0 %v8310_v18  ;;  %v8347_v18 = vld [vmem:[#allocation20 + $0x60] sm:$0xff]  }
 0x930   : > { %4525 = vmatprep.subr.bf16.mxu0 %v8318_v28  ;;  %4479 = vmatpush1.bf16.msra.mxu1 %v8325_v44  ;;  %v8349_v28 = vld [vmem:[#allocation20 + $0x20] sm:$0xff]   ;;  %v8358_v44 = vld [vmem:[#allocation20 + $0xb0] sm:$0xff]  }
 0x933   : > { %4526 = vmatpush1.bf16.msra.mxu0 %v8316_v40  ;;  %v8351_v40 = vld [vmem:[#allocation20 + $0x68] sm:$0xff]  }
 0x934   : > { %4527 = vmatprep.subr.bf16.mxu0 %v8324_v27  ;;  %v8353_v27 = vld [vmem:[#allocation20 + $0x28] sm:$0xff]  }
 0x937   : > { %4528 = vmatpush1.bf16.msra.mxu0 %v8322_v26  ;;  %v8355_v26 = vld [vmem:[#allocation20 + $0x70] sm:$0xff]  }
 0x938   : > { %4529 = vmatprep.subr.bf16.mxu0 %v8330_v38  ;;  %v8357_v38 = vld [vmem:[#allocation20 + $0x30] sm:$0xff]  }
 0x9f1   : > { %v7881_v63 = vpop.f32.mrb[20].mxu0 }
 0x9f2   : > { %v4213_v15 = vpop.f32.mrb[21].mxu0  ;;  %v4222_v30 = vadd.f32 %v7881_v63, %v7390_v33 }
 0x9f3   : > { %v4214_v37 = vadd.f32 %v7390_v33, %v4213_v15  ;;  %v7882_v17 = vpop.f32.mrb[22].mxu0 }
 0x9f4   : > { %v4216_v10 = vpop.f32.mrb[23].mxu0  ;;  %v10725_v57 = vadd.f32 %v8597_v59, %v4222_v30 }
 0x9f5   : > { %v10717_v16 = vadd.f32 %v8595_v20, %v4214_v37  ;;  %v4217_v58 = vadd.f32 %v7390_v33, %v4216_v10  ;;  %v8328_v33 = vld [vmem:[#allocation19 + $0xe8] ss:$16 sps:$4 sm:$0xff]  }
 0x9f6   : > { %4530 = vmatpush1.bf16.msra.mxu0 %v8328_v33  ;;  %v8359_v33 = vld [vmem:[#allocation20 + $0x78] sm:$0xff]  }
 0x9f7   : > { %v10720_v62 = vadd.f32 %v8596_v51, %v4217_v58  ;;  %4230 = vadd.xlane.f32.xlu1 %v10717_v16 }
 0x9f9   : > { %4232 = vadd.xlane.f32.xlu0 %v10720_v62 }
 0x9fd   : > { %4234 = vadd.xlane.f32.xlu0 %v10725_v57 }
 0xa84   : > { %v4231_v24 = vpop.xlane.xlu1 %4230 }
 0xa85   : > { %v4236_v31 = vmul.f32 0.0078125, %v4231_v24 }
 0xa86   : > { %v4233_v55 = vpop.xlane.xlu0 %4232 }
 0xa87   : > { %v10729_v32 = vsub.f32 %v10717_v16, %v4236_v31  ;;  %v4237_v29 = vmul.f32 0.0078125, %v4233_v55 }
 0xa89   : > { %v10732_v7 = vsub.f32 %v10720_v62, %v4237_v29  ;;  %v4242_v46 = vmul.f32 %v10729_v32, %v10729_v32 }
 0xa8a   : > { %v4235_v1 = vpop.xlane.xlu0 %4234 }
 0xa8b   : > { %v4238_v25 = vmul.f32 0.0078125, %v4235_v1  ;;  %4245 = vadd.xlane.f32.xlu0 %v4242_v46  ;;  %v4243_v8 = vmul.f32 %v10732_v7, %v10732_v7 }
 0xa8d   : > { %v10739_v22 = vsub.f32 %v10725_v57, %v4238_v25  ;;  %4247 = vadd.xlane.f32.xlu1 %v4243_v8  ;;  %v8332_v25 = vld [vmem:[#allocation20 + $0xc0] sm:$0xff]  }
 0xa8e   : > { %v8333_v8 = vld [vmem:[#allocation20] sm:$0xff]   ;;  %7673 = vmatprep.subr.bf16.mxu0 %v8332_v25 }
 0xa8f   : > { %v4244_v14 = vmul.f32 %v10739_v22, %v10739_v22 }
 0xa91   : > { %4249 = vadd.xlane.f32.xlu0 %v4244_v14  ;;  %v8334_v14 = vld [vmem:[#allocation20 + $0x80] sm:$0xff]  }
 0xb18   : > { %v4246_v63 = vpop.xlane.xlu0 %4245 }
 0xb19   : > { %v4251_v15 = vmul.f32 0.0078125, %v4246_v63  ;;  %v8360_v63 = vld [vmem:[#allocation20 + $0xf8] sm:$0xff]  }
 0xb1a   : > { %v4248_v37 = vpop.xlane.xlu1 %4247 }
 0xb1b   : > { %v4254_v17 = vadd.f32 1e-12, %v4251_v15  ;;  %v4252_v10 = vmul.f32 0.0078125, %v4248_v37  ;;  %v8361_v15 = vld [vmem:[#allocation20 + $0x38] sm:$0xff]  }
 0xb1c   : > { %v8362_v37 = vld [vmem:[#allocation20 + $0xb8] sm:$0xff]  }
 0xb1d   : > { %8537 = vrsqrt.f32 %v4254_v17  ;;  %v4255_v20 = vadd.f32 1e-12, %v4252_v10  ;;  %v1198_v17 = vld [vmem:[%s11327_s9] sm:$0xf]  ;;  %v4298_v10 = vsub.s32 3, %v10066_v2 }
 0xb1e   : > { %v4250_v58 = vpop.xlane.xlu0 %4249 }
 0xb1f   : > { %8539 = vrsqrt.f32 %v4255_v20  ;;  %v4253_v30 = vmul.f32 0.0078125, %v4250_v58  ;;  %v10753_v20 = vrot.slane %v1198_v17, %v10069_v3  ;;  %v10756_v58 = vrot.slane %v1198_v17, %v10075_v5 }
 0xb21   : > { %v4256_v51 = vadd.f32 1e-12, %v4253_v30  ;;  %v10759_v30 = vrot.slane %v1198_v17, %v10072_v4 }
 0xb23   : > { %8541 = vrsqrt.f32 %v4256_v51  ;;  %v10763_v51 = vrot.slane %v1198_v17, %v4298_v10 }
 0xb27   : > { %v8538_v59 = vpop.eup %8537 }
 0xb28   : > { %v4260_v45 = vmul.f32 %v8538_v59, %v10729_v32 }
 0xb29   : > { %v8540_v34 = vpop.eup %8539 }
 0xb2a   : > { %v4261_v61 = vmul.f32 %v8540_v34, %v10732_v7  ;;  %v4269_v0 = vmul.f32 %v7399_v60, %v4260_v45  ;;  %v8331_v7 = vld [vmem:[#allocation20 + $0x40] sm:$0xff]  }
 0xb2b   : > { %7645 = vmatprep.subr.bf16.mxu1 %v8331_v7 }
 0xb2c   : > { %v4270_v56 = vmul.f32 %v7399_v60, %v4261_v61  ;;  %v4278_v24 = vadd.f32 %v7400_v52, %v4269_v0 }
 0xb2d   : > { %v8542_v9 = vpop.eup %8541 }
 0xb2e   : > { %v4279_v31 = vadd.f32 %v7400_v52, %v4270_v56  ;;  %v4262_v55 = vmul.f32 %v8542_v9, %v10739_v22  ;;  %v8335_v22 = vld [vmem:[#allocation20 + $0x48] sm:$0xff]  }
 0xb30   : > { %v4281_v29 = vpack.c.bf16 %v4279_v31, %v4278_v24  ;;  %v4271_v46 = vmul.f32 %v7399_v60, %v4262_v55 }
 0xb32   : > { %4497 = vmatmul.mubr.bf16.vlgmr.msra.gmra.mrb[24].mxu1 %v4281_v29  ;;  %4548 = vmatmul.mubr.bf16.vlgmr.msra.gmra.mrb[24].mxu0 %v4281_v29  ;;  %v4280_v32 = vadd.f32 %v7400_v52, %v4271_v46 }
 0xb33   : > { %4506 = vmatprep.mubr.bf16.mxu1 %v9301_v35  ;;  %4557 = vmatprep.mubr.bf16.mxu0 %v9301_v35 }
 0xb34   : > { %v4282_v1 = vpack.c.bf16 %v4280_v32, %v4280_v32  ;;  %7646 = vmatpush3.bf16.msra.mxu1 %v8333_v8  ;;  %7674 = vmatpush3.bf16.msra.mxu0 %v8334_v14 }
 0xb35   : > { %7647 = vmatprep.subr.bf16.mxu1 %v8335_v22  ;;  %7675 = vmatprep.subr.bf16.mxu0 %v8336_v23 }
 0xb38   : > { %7648 = vmatpush3.bf16.msra.mxu1 %v8337_v19  ;;  %7676 = vmatpush3.bf16.msra.mxu0 %v8338_v47 }
 0xb39   : > { %7649 = vmatprep.subr.bf16.mxu1 %v8339_v49  ;;  %7677 = vmatprep.subr.bf16.mxu0 %v8340_v12 }
 0xb3a   : > { %4507 = vmatmul.mubr.bf16.gmra.mrb[28].mxu1 %v4282_v1  ;;  %4558 = vmatmul.mubr.bf16.gmra.mrb[28].mxu0 %v4282_v1 }
 0xb3c   : > { %7650 = vmatpush3.bf16.msra.mxu1 %v8341_v21  ;;  %7678 = vmatpush3.bf16.msra.mxu0 %v8342_v42 }
 0xb3d   : > { %7651 = vmatprep.subr.bf16.mxu1 %v8343_v36  ;;  %7679 = vmatprep.subr.bf16.mxu0 %v8344_v41 }
 0xb40   : > { %7652 = vmatpush3.bf16.msra.mxu1 %v8345_v11  ;;  %7680 = vmatpush3.bf16.msra.mxu0 %v8346_v13 }
 0xb41   : > { %7653 = vmatprep.subr.bf16.mxu1 %v8347_v18  ;;  %7681 = vmatprep.subr.bf16.mxu0 %v8348_v53 }
 0xb44   : > { %7654 = vmatpush3.bf16.msra.mxu1 %v8349_v28  ;;  %7682 = vmatpush3.bf16.msra.mxu0 %v8350_v6 }
 0xb45   : > { %7655 = vmatprep.subr.bf16.mxu1 %v8351_v40  ;;  %7683 = vmatprep.subr.bf16.mxu0 %v8352_v54 }
 0xb48   : > { %7656 = vmatpush3.bf16.msra.mxu1 %v8353_v27  ;;  %7684 = vmatpush3.bf16.msra.mxu0 %v8354_v39 }
 0xb49   : > { %7657 = vmatprep.subr.bf16.mxu1 %v8355_v26  ;;  %7685 = vmatprep.subr.bf16.mxu0 %v8356_v48 }
 0xb4c   : > { %7658 = vmatpush3.bf16.msra.mxu1 %v8357_v38  ;;  %7686 = vmatpush3.bf16.msra.mxu0 %v8358_v44 }
 0xb4d   : > { %7659 = vmatprep.subr.bf16.mxu1 %v8359_v33  ;;  %7687 = vmatprep.subr.bf16.mxu0 %v8360_v63 }
 0xb50   : > { %7660 = vmatpush3.bf16.msra.mxu1 %v8361_v15  ;;  %7688 = vmatpush3.bf16.msra.mxu0 %v8362_v37 }
 0xc05   : > { %v4498_v59 = vpop.f32.mrb[24].mxu1  ;;  %v4549_v60 = vpop.f32.mrb[24].mxu0 }
 0xc06   : > { %v10766_v45 = vadd.f32 %v4498_v59, %v10753_v20  ;;  %v10769_v34 = vadd.f32 %v4549_v60, %v10756_v58  ;;  %v4500_v61 = vpop.f32.mrb[25].mxu1  ;;  %v4551_v0 = vpop.f32.mrb[25].mxu0 }
 0xc07   : > { %v10772_v52 = vadd.f32 %v4500_v61, %v10759_v30  ;;  %v10775_v56 = vadd.f32 %v4551_v0, %v10763_v51  ;;  %v4502_v9 = vpop.f32.mrb[26].mxu1  ;;  %v4553_v24 = vpop.f32.mrb[26].mxu0 }
 0xc08   : > { %v4566_v31 = vmul.f32 %v10766_v45, %v10766_v45  ;;  %v4568_v55 = vmul.f32 %v10769_v34, %v10769_v34  ;;  %v10782_v29 = vadd.f32 %v4502_v9, %v10753_v20  ;;  %v10785_v46 = vadd.f32 %v4553_v24, %v10756_v58  ;;  %v4504_v32 = vpop.f32.mrb[27].mxu1  ;;  %v4555_v1 = vpop.f32.mrb[27].mxu0 }
 0xc09   : > { %v4567_v7 = vmul.f32 %v10772_v52, %v10772_v52  ;;  %v4569_v25 = vmul.f32 %v10775_v56, %v10775_v56  ;;  %v10792_v8 = vadd.f32 %v4504_v32, %v10759_v30  ;;  %v10795_v14 = vadd.f32 %v4555_v1, %v10763_v51 }
 0xc0a   : > { %v4578_v22 = vmul.f32 %v4566_v31, %v10766_v45  ;;  %v4580_v23 = vmul.f32 %v4568_v55, %v10769_v34  ;;  %v4570_v19 = vmul.f32 %v10782_v29, %v10782_v29  ;;  %v4572_v47 = vmul.f32 %v10785_v46, %v10785_v46 }
 0xc0b   : > { %v4579_v49 = vmul.f32 %v4567_v7, %v10772_v52  ;;  %v4581_v12 = vmul.f32 %v4569_v25, %v10775_v56  ;;  %v4571_v21 = vmul.f32 %v10792_v8, %v10792_v8  ;;  %v4573_v42 = vmul.f32 %v10795_v14, %v10795_v14 }
 0xc0c   : > { %v4590_v36 = vmul.f32 0.044715, %v4578_v22  ;;  %v4592_v41 = vmul.f32 0.044715, %v4580_v23  ;;  %v4582_v11 = vmul.f32 %v4570_v19, %v10782_v29  ;;  %v4584_v13 = vmul.f32 %v4572_v47, %v10785_v46 }
 0xc0d   : > { %v4591_v18 = vmul.f32 0.044715, %v4579_v49  ;;  %v4593_v53 = vmul.f32 0.044715, %v4581_v12  ;;  %v4583_v28 = vmul.f32 %v4571_v21, %v10792_v8  ;;  %v4585_v6 = vmul.f32 %v4573_v42, %v10795_v14  ;;  %v4508_v40 = vpop.f32.mrb[28].mxu1  ;;  %v4559_v54 = vpop.f32.mrb[28].mxu0 }
 0xc0e   : > { %v4602_v27 = vadd.f32 %v4590_v36, %v10766_v45  ;;  %v4604_v39 = vadd.f32 %v4592_v41, %v10769_v34  ;;  %v4594_v26 = vmul.f32 0.044715, %v4582_v11  ;;  %v4596_v48 = vmul.f32 0.044715, %v4584_v13  ;;  %v4510_v38 = vpop.f32.mrb[29].mxu1  ;;  %v4561_v44 = vpop.f32.mrb[29].mxu0 }
 0xc0f   : > { %v4603_v33 = vadd.f32 %v4591_v18, %v10772_v52  ;;  %v4605_v63 = vadd.f32 %v4593_v53, %v10775_v56  ;;  %v4595_v15 = vmul.f32 0.044715, %v4583_v28  ;;  %v4597_v37 = vmul.f32 0.044715, %v4585_v6  ;;  %v4512_v17 = vpop.f32.mrb[30].mxu1  ;;  %v4563_v59 = vpop.f32.mrb[30].mxu0 }
 0xc10   : > { %v4614_v60 = vmul.f32 0.7978846, %v4602_v27  ;;  %v4616_v61 = vmul.f32 0.7978846, %v4604_v39  ;;  %v4606_v0 = vadd.f32 %v4594_v26, %v10782_v29  ;;  %v4608_v9 = vadd.f32 %v4596_v48, %v10785_v46  ;;  %v4513_v24 = vpop.f32.mrb[31].mxu1  ;;  %v4564_v31 = vpop.f32.mrb[31].mxu0 }
 0xc11   : > { %v4615_v55 = vmul.f32 0.7978846, %v4603_v33  ;;  %v4617_v32 = vmul.f32 0.7978846, %v4605_v63  ;;  %v4607_v1 = vadd.f32 %v4595_v15, %v10792_v8  ;;  %v4609_v7 = vadd.f32 %v4597_v37, %v10795_v14 }
 0xc12   : > { %8543 = vtanh.f32 %v4614_v60  ;;  %v4618_v25 = vmul.f32 0.7978846, %v4606_v0  ;;  %v10822_v22 = vadd.f32 %v4508_v40, %v10753_v20  ;;  %v4620_v23 = vmul.f32 0.7978846, %v4608_v9 }
 0xc13   : > { %8545 = vtanh.f32 %v4616_v61  ;;  %v4619_v19 = vmul.f32 0.7978846, %v4607_v1  ;;  %v10825_v47 = vadd.f32 %v4559_v54, %v10756_v58  ;;  %v10830_v12 = vadd.f32 %v4510_v38, %v10759_v30 }
 0xc14   : > { %8547 = vtanh.f32 %v4615_v55  ;;  %v4574_v49 = vmul.f32 %v10822_v22, %v10822_v22  ;;  %v10833_v21 = vadd.f32 %v4561_v44, %v10763_v51  ;;  %v4621_v42 = vmul.f32 0.7978846, %v4609_v7 }
 0xc15   : > { %8549 = vtanh.f32 %v4617_v32  ;;  %v4576_v20 = vmul.f32 %v10825_v47, %v10825_v47  ;;  %v4575_v58 = vmul.f32 %v10830_v12, %v10830_v12 }
 0xc16   : > { %8551 = vtanh.f32 %v4618_v25  ;;  %v4586_v36 = vmul.f32 %v4574_v49, %v10822_v22  ;;  %v4577_v41 = vmul.f32 %v10833_v21, %v10833_v21 }
 0xc17   : > { %8553 = vtanh.f32 %v4620_v23  ;;  %v4588_v30 = vmul.f32 %v4576_v20, %v10825_v47  ;;  %v4587_v11 = vmul.f32 %v4575_v58, %v10830_v12 }
 0xc18   : > { %8555 = vtanh.f32 %v4619_v19  ;;  %v4598_v51 = vmul.f32 0.044715, %v4586_v36  ;;  %v4589_v13 = vmul.f32 %v4577_v41, %v10833_v21 }
 0xc19   : > { %8557 = vtanh.f32 %v4621_v42  ;;  %v4600_v18 = vmul.f32 0.044715, %v4588_v30  ;;  %v4599_v28 = vmul.f32 0.044715, %v4587_v11 }
 0xc1a   : > { %v4610_v53 = vadd.f32 %v4598_v51, %v10822_v22  ;;  %v4601_v6 = vmul.f32 0.044715, %v4589_v13 }
 0xc1b   : > { %v4612_v40 = vadd.f32 %v4600_v18, %v10825_v47  ;;  %v4611_v39 = vadd.f32 %v4599_v28, %v10830_v12 }
 0xc1c   : > { %v8544_v54 = vpop.eup %8543  ;;  %v4622_v27 = vmul.f32 0.7978846, %v4610_v53  ;;  %v4613_v26 = vadd.f32 %v4601_v6, %v10833_v21 }
 0xc1d   : > { %v8546_v48 = vpop.eup %8545  ;;  %v4638_v38 = vadd.f32 1.0, %v8544_v54  ;;  %v4624_v44 = vmul.f32 0.7978846, %v4612_v40  ;;  %v4623_v15 = vmul.f32 0.7978846, %v4611_v39 }
 0xc1e   : > { %v8548_v33 = vpop.eup %8547  ;;  %v4640_v63 = vadd.f32 1.0, %v8546_v48  ;;  %8559 = vtanh.f32 %v4622_v27  ;;  %v4625_v37 = vmul.f32 0.7978846, %v4613_v26 }
 0xc1f   : > { %v8550_v17 = vpop.eup %8549  ;;  %8561 = vtanh.f32 %v4624_v44  ;;  %v4639_v59 = vadd.f32 1.0, %v8548_v33  ;;  %v4650_v9 = vmul.f32 0.5, %v4638_v38 }
 0xc20   : > { %v8552_v60 = vpop.eup %8551  ;;  %8563 = vtanh.f32 %v4623_v15  ;;  %v4641_v61 = vadd.f32 1.0, %v8550_v17  ;;  %v4652_v55 = vmul.f32 0.5, %v4640_v63 }
 0xc21   : > { %v8554_v0 = vpop.eup %8553  ;;  %v4642_v24 = vadd.f32 1.0, %v8552_v60  ;;  %8565 = vtanh.f32 %v4625_v37  ;;  %v4651_v23 = vmul.f32 0.5, %v4639_v59  ;;  %v4662_v20 = vmul.f32 %v4650_v9, %v10766_v45 }
 0xc22   : > { %v8556_v31 = vpop.eup %8555  ;;  %v4644_v32 = vadd.f32 1.0, %v8554_v0  ;;  %v4653_v42 = vmul.f32 0.5, %v4641_v61  ;;  %v4664_v41 = vmul.f32 %v4652_v55, %v10769_v34  ;;  %v7433_v0 = vld [vmem:[#allocation22] ss:$0 sm:$0xff] }
 0xc23   : > { %v8558_v1 = vpop.eup %8557  ;;  %v4654_v7 = vmul.f32 0.5, %v4642_v24  ;;  %v4643_v25 = vadd.f32 1.0, %v8556_v31  ;;  %v4663_v13 = vmul.f32 %v4651_v23, %v10772_v52 }
 0xc24   : > { %v4656_v19 = vmul.f32 0.5, %v4644_v32  ;;  %v4645_v49 = vadd.f32 1.0, %v8558_v1  ;;  %v4665_v6 = vmul.f32 %v4653_v42, %v10775_v56 }
 0xc25   : > { %v4666_v36 = vmul.f32 %v4654_v7, %v10782_v29  ;;  %v4655_v58 = vmul.f32 0.5, %v4643_v25 }
 0xc26   : > { %v4668_v30 = vmul.f32 %v4656_v19, %v10785_v46  ;;  %v4657_v51 = vmul.f32 0.5, %v4645_v49 }
 0xc27   : > { %v4674_v11 = vpack.c.bf16 %v4666_v36, %v4662_v20  ;;  %v4667_v18 = vmul.f32 %v4655_v58, %v10792_v8 }
 0xc28   : > { %v8560_v53 = vpop.eup %8559  ;;  %v4676_v28 = vpack.c.bf16 %v4668_v30, %v4664_v41  ;;  %v4669_v40 = vmul.f32 %v4657_v51, %v10795_v14 }
 0xc29   : > { %v8562_v45 = vpop.eup %8561  ;;  %v4675_v54 = vpack.c.bf16 %v4667_v18, %v4663_v13  ;;  %v4646_v29 = vadd.f32 1.0, %v8560_v53 }
 0xc2a   : > { %v8564_v27 = vpop.eup %8563  ;;  %v4677_v39 = vpack.c.bf16 %v4669_v40, %v4665_v6  ;;  %v4648_v34 = vadd.f32 1.0, %v8562_v45  ;;  %v8363_v40 = vld [vmem:[#allocation26] ss:$12 sps:$4 sm:$0xff]   ;;  %v8365_v45 = vld [vmem:[#allocation26 + $0x4] ss:$12 sps:$4 sm:$0xff]  }
 0xc2b   : > { %v8566_v26 = vpop.eup %8565  ;;  %4912 = vmatprep.mubr.bf16.mxu1 %v4675_v54  ;;  %v4647_v46 = vadd.f32 1.0, %v8564_v27  ;;  %v4658_v48 = vmul.f32 0.5, %v4646_v29  ;;  %v9307_v54 = vmov 0.0   ;;  %v8369_v29 = vld [vmem:[#allocation26 + $0x1c] ss:$12 sps:$4 sm:$0xff]   ;;  %5151 = vmatprep.subr.bf16.mxu1 %v8365_v45 }
 0xc2c   : > { %4960 = vmatprep.mubr.bf16.mxu0 %v4677_v39  ;;  %4913 = vmatmul.mubr.bf16.vlgmr.msra.gmra.mrb[32].mxu1 %v4674_v11  ;;  %v4649_v52 = vadd.f32 1.0, %v8566_v26  ;;  %v4660_v8 = vmul.f32 0.5, %v4648_v34  ;;  %v8367_v27 = vld [vmem:[#allocation26 + $0x18] ss:$12 sps:$4 sm:$0xff]   ;;  %v8370_v39 = vld [vmem:[#allocation26 + $0x20] ss:$12 sps:$4 sm:$0xff]  }
 0xc2d   : > { %4961 = vmatmul.mubr.bf16.vlgmr.msra.gmra.mrb[32].mxu0 %v4676_v28  ;;  %v4659_v38 = vmul.f32 0.5, %v4647_v46  ;;  %v4670_v56 = vmul.f32 %v4658_v48, %v10822_v22  ;;  %7883 = vmatprep.subr.bf16.mxu0 %v9307_v54  ;;  %v8373_v34 = vld [vmem:[#allocation26 + $0x34] ss:$12 sps:$4 sm:$0xff]  }
 0xc2e   : > { %v4661_v44 = vmul.f32 0.5, %v4649_v52  ;;  %v4672_v33 = vmul.f32 %v4660_v8, %v10825_v47  ;;  %5152 = vmatpush1.bf16.msra.mxu1 %v8363_v40  ;;  %v8374_v8 = vld [vmem:[#allocation26 + $0x38] ss:$12 sps:$4 sm:$0xff]  }
 0xc2f   : > { %v4671_v14 = vmul.f32 %v4659_v38, %v10830_v12  ;;  %v4678_v17 = vpack.c.bf16 %v4670_v56, %v4670_v56  ;;  %5153 = vmatprep.subr.bf16.mxu1 %v8369_v29  ;;  %v8375_v38 = vld [vmem:[#allocation26 + $0x48] ss:$12 sps:$4 sm:$0xff]   ;;  %v8381_v56 = vld [vmem:[#allocation26 + $0x64] ss:$12 sps:$4 sm:$0xff]  }
 0xc30   : > { %v4673_v63 = vmul.f32 %v4661_v44, %v10833_v21  ;;  %v4680_v59 = vpack.c.bf16 %v4672_v33, %v4672_v33  ;;  %v8377_v44 = vld [vmem:[#allocation26 + $0x4c] ss:$12 sps:$4 sm:$0xff]  }
 0xc31   : > { %v4679_v15 = vpack.c.bf16 %v4671_v14, %v4671_v14  ;;  %v8378_v14 = vld [vmem:[#allocation26 + $0x50] ss:$12 sps:$4 sm:$0xff]   ;;  %v8379_v33 = vld [vmem:[#allocation26 + $0x60] ss:$12 sps:$4 sm:$0xff]  }
 0xc32   : > { %v4681_v37 = vpack.c.bf16 %v4673_v63, %v4673_v63  ;;  %5154 = vmatpush1.bf16.msra.mxu1 %v8367_v27  ;;  %v8385_v63 = vld [vmem:[#allocation26 + $0x7c] ss:$12 sps:$4 sm:$0xff]  }
 0xc33   : > { %4920 = vmatprep.mubr.bf16.mxu1 %v4679_v15  ;;  %5155 = vmatprep.subr.bf16.mxu1 %v8373_v34  ;;  %v8382_v15 = vld [vmem:[#allocation26 + $0x68] ss:$12 sps:$4 sm:$0xff]  }
 0xc34   : > { %4968 = vmatprep.mubr.bf16.mxu0 %v4681_v37  ;;  %4921 = vmatmul.mubr.bf16.gmra.mrb[36].mxu1 %v4678_v17  ;;  %v8383_v37 = vld [vmem:[#allocation26 + $0x78] ss:$12 sps:$4 sm:$0xff]   ;;  %v8389_v17 = vld [vmem:[#allocation26 + $0x94] ss:$12 sps:$4 sm:$0xff]  }
 0xc35   : > { %4969 = vmatmul.mubr.bf16.gmra.mrb[36].mxu0 %v4680_v59  ;;  %5183 = vmatprep.mubr.bf16.mxu1 %v9301_v35  ;;  %v8386_v59 = vld [vmem:[#allocation26 + $0x80] ss:$12 sps:$4 sm:$0xff]  }
 0xc36   : > { %7899 = vmatprep.mubr.msk.bf16.mxu0 %vm9308_vm5, %v9307_v54 }
 0xcff   : > { %v7661_v60 = vpop.f32.mrb[32].mxu1 }
 0xd00   : > { %v7689_v61 = vpop.f32.mrb[32].mxu0  ;;  %v7662_v22 = vpop.f32.mrb[33].mxu1 }
 0xd01   : > { %v7663_v9 = vadd.f32 %v7662_v22, %v7661_v60  ;;  %v7690_v12 = vpop.f32.mrb[33].mxu0  ;;  %v7664_v47 = vpop.f32.mrb[34].mxu1  ;;  %v8387_v60 = vld [vmem:[#allocation26 + $0x90] ss:$12 sps:$4 sm:$0xff]   ;;  %v8391_v22 = vld [vmem:[#allocation26 + $0xa8] ss:$12 sps:$4 sm:$0xff]  }
 0xd02   : > { %v7691_v24 = vadd.f32 %v7690_v12, %v7689_v61  ;;  %v7692_v21 = vpop.f32.mrb[34].mxu0  ;;  %v7665_v31 = vpop.f32.mrb[35].mxu1  ;;  %v8393_v61 = vld [vmem:[#allocation26 + $0xac] ss:$12 sps:$4 sm:$0xff]  }
 0xd03   : > { %v4915_v55 = vadd.f32 %v7663_v9, %v7433_v0  ;;  %v7666_v32 = vadd.f32 %v7665_v31, %v7664_v47  ;;  %v7693_v1 = vpop.f32.mrb[35].mxu0  ;;  %v8394_v9 = vld [vmem:[#allocation26 + $0xb0] ss:$12 sps:$4 sm:$0xff]  }
 0xd04   : > { %v7694_v7 = vadd.f32 %v7693_v1, %v7692_v21  ;;  %v7466_v31 = vld [vmem:[#allocation23] ss:$0 sm:$0xff] }
 0xd05   : > { %v4963_v25 = vadd.f32 %v7691_v24, %v4915_v55  ;;  %v4918_v23 = vadd.f32 %v7666_v32, %v7433_v0  ;;  %v7467_v32 = vld [vmem:[#allocation25] ss:$0 sm:$0xff] }
 0xd07   : > { %v4976_v19 = vadd.f32 %v4963_v25, %v10717_v16  ;;  %v4966_v49 = vadd.f32 %v7694_v7, %v4918_v23  ;;  %v7667_v42 = vpop.f32.mrb[36].mxu1  ;;  %v10891_v23 = vld [vmem:[#allocation28] sm:$0x7] }
 0xd08   : > { %v7695_v20 = vpop.f32.mrb[36].mxu0  ;;  %v7668_v36 = vpop.f32.mrb[37].mxu1 }
 0xd09   : > { %4979 = vst [vmem:[%s10865_s13] sm:$0xff] %v4976_v19  ;;  %v4977_v58 = vadd.f32 %v4966_v49, %v10720_v62  ;;  %v7669_v41 = vadd.f32 %v7668_v36, %v7667_v42  ;;  %v7696_v30 = vpop.f32.mrb[37].mxu0  ;;  %v7670_v51 = vpop.f32.mrb[38].mxu1  ;;  %v8366_v62 = vld [vmem:[#allocation26 + $0x8] ss:$12 sps:$4 sm:$0xff]   ;;  %v5011_v19 = vrot.slane %v10891_v23, %v10069_v3  ;;  %v5015_v49 = vrot.slane %v10891_v23, %v10072_v4 }
 0xd0a   : > { %v7697_v11 = vadd.f32 %v7696_v30, %v7695_v20  ;;  %v7698_v13 = vpop.f32.mrb[38].mxu0  ;;  %v7671_v18 = vpop.f32.mrb[39].mxu1  ;;  %7884 = vmatpush3.bf16.msra.mxu0 %v8366_v62 }
 0xd0b   : > { %4980 = vst [vmem:[%s10865_s13 + $0x8] sm:$0xff] %v4977_v58  ;;  %v4923_v16 = vadd.f32 %v7669_v41, %v7433_v0  ;;  %v7699_v53 = vpop.f32.mrb[39].mxu0  ;;  %7885 = vmatprep.subr.bf16.mxu0 %v9307_v54  ;;  %v8390_v0 = vld [vmem:[#allocation26 + $0x98] ss:$12 sps:$4 sm:$0xff]  }
 0xd0d   : > { %v4971_v28 = vadd.f32 %v7697_v11, %v4923_v16 }
 0xd0e   : > { %7886 = vmatpush3.bf16.msra.mxu0 %v8370_v39 }
 0xd0f   : > { %v10871_v6 = vadd.f32 %v4971_v28, %v10725_v57  ;;  %v8371_v57 = vld [vmem:[#allocation26 + $0x30] ss:$12 sps:$4 sm:$0xff]   ;;  %7887 = vmatprep.subr.bf16.mxu0 %v9307_v54 }
 0xd10   : > { %5156 = vmatpush1.bf16.msra.mxu1 %v8371_v57 }
 0xd11   : > { %4981 = vadd.xlane.f32.xlu1 %v10871_v6  ;;  %5157 = vmatprep.subr.bf16.mxu1 %v8377_v44 }
 0xd12   : > { %7888 = vmatpush3.bf16.msra.mxu0 %v8374_v8 }
 0xd13   : > { %7889 = vmatprep.subr.bf16.mxu0 %v9307_v54 }
 0xd14   : > { %5158 = vmatpush1.bf16.msra.mxu1 %v8375_v38 }
 0xd15   : > { %5159 = vmatprep.subr.bf16.mxu1 %v8381_v56 }
 0xd16   : > { %7890 = vmatpush3.bf16.msra.mxu0 %v8378_v14 }
 0xd17   : > { %7891 = vmatprep.subr.bf16.mxu0 %v9307_v54 }
 0xd18   : > { %5160 = vmatpush1.bf16.msra.mxu1 %v8379_v33 }
 0xd19   : > { %5161 = vmatprep.subr.bf16.mxu1 %v8385_v63 }
 0xd1a   : > { %7892 = vmatpush3.bf16.msra.mxu0 %v8382_v15 }
 0xd1b   : > { %7893 = vmatprep.subr.bf16.mxu0 %v9307_v54 }
 0xd1c   : > { %5162 = vmatpush1.bf16.msra.mxu1 %v8383_v37 }
 0xd1d   : > { %5163 = vmatprep.subr.bf16.mxu1 %v8389_v17 }
 0xd1e   : > { %7894 = vmatpush3.bf16.msra.mxu0 %v8386_v59 }
 0xd1f   : > { %7895 = vmatprep.subr.bf16.mxu0 %v9307_v54 }
 0xd20   : > { %5164 = vmatpush1.bf16.msra.mxu1 %v8387_v60 }
 0xd21   : > { %5165 = vmatprep.subr.bf16.mxu1 %v8393_v61 }
 0xd22   : > { %7896 = vmatpush3.bf16.msra.mxu0 %v8390_v0 }
 0xd23   : > { %7897 = vmatprep.subr.bf16.mxu0 %v9307_v54 }
 0xd24   : > { %5166 = vmatpush1.bf16.msra.mxu1 %v8391_v22 }
 0xd25   : > { %7903 = vmatprep.subr.bf16.mxu1 %v9307_v54 }
 0xd26   : > { %7898 = vmatpush3.bf16.msra.mxu0 %v8394_v9 }
 0xd27   : > { %7927 = vmatprep.subr.bf16.mxu0 %v9307_v54 }
 0xd9e   : > { %v4982_v26 = vpop.xlane.xlu1 %4981 }
 0xd9f   : > { %v4983_v46 = vmul.f32 0.0078125, %v4982_v26 }
 0xda1   : > { %v4984_v48 = vsub.f32 %v10871_v6, %v4983_v46 }
 0xda3   : > { %v4985_v52 = vmul.f32 %v4984_v48, %v4984_v48 }
 0xda5   : > { %4986 = vadd.xlane.f32.xlu0 %v4985_v52 }
 0xe32   : > { %v4987_v12 = vpop.xlane.xlu0 %4986 }
 0xe33   : > { %v4988_v47 = vmul.f32 0.0078125, %v4987_v12 }
 0xe35   : > { %v4989_v24 = vadd.f32 1e-12, %v4988_v47 }
 0xe37   : > { %8567 = vrsqrt.f32 %v4989_v24 }
 0xe41   : > { %v8568_v21 = vpop.eup %8567 }
 0xe42   : > { %v4991_v55 = vmul.f32 %v8568_v21, %v4984_v48 }
 0xe44   : > { %v4998_v1 = vmul.f32 %v7466_v31, %v4991_v55 }
 0xe46   : > { %v5005_v7 = vadd.f32 %v7467_v32, %v4998_v1 }
 0xe48   : > { %v5006_v25 = vpack.c.bf16 %v5005_v7, %v5005_v7 }
 0xe4a   : > { %5184 = vmatmul.mubr.bf16.vlgmr.msra.gmra.mrb[40].mxu1 %v5006_v25  ;;  %7900 = vmatmul.mubr.bf16.vlgmr.msra.gmra.mrb[40].mxu0 %v5006_v25 }
 0xe4b   : > { %7905 = vmatprep.mubr.msk.bf16.mxu1 %vm9308_vm5, %v9307_v54  ;;  %7929 = vmatprep.mubr.msk.bf16.mxu0 %vm9308_vm5, %v9307_v54 }
 0xf1d   : > { %v5185_v42 = vpop.f32.mrb[40].mxu1  ;;  %v10897_v20 = vpop.f32.mrb[40].mxu0 }
 0xf1e   : > { %v5187_v36 = vpop.f32.mrb[41].mxu1  ;;  %v7901_v58 = vpop.f32.mrb[41].mxu0  ;;  %v5186_v41 = vadd.f32 %v5185_v42, %v5011_v19 }
 0xf1f   : > { %v5188_v30 = vadd.f32 %v5187_v36, %v5015_v49  ;;  %v5189_v51 = vpop.f32.mrb[42].mxu1  ;;  %v5229_v11 = vpop.f32.mrb[42].mxu0 }
 0xf20   : > { %v5190_v13 = vpop.f32.mrb[43].mxu1  ;;  %v7902_v18 = vpop.f32.mrb[43].mxu0  ;;  %v5232_v16 = vmul.f32 0.17677669, %v5186_v41 }
 0xf21   : > { %5387 = vrot.lane.b32.xlu0 %v5188_v30, %s9302_s6  ;;  %5384 = vrot.lane.b32.xlu1 %v5188_v30, %s9303_s20 }
 0xf25   : > { %5390 = vrot.lane.b32.xlu1 %v5188_v30, %s9304_s14  ;;  %5240 = vrot.lane.b32.xlu0 %v5232_v16, %s9304_s14 }
 0xf29   : > { %5234 = vrot.lane.b32.xlu1 %v5232_v16, %s9303_s20 }
 0xf2d   : > { %5237 = vrot.lane.b32.xlu1 %v5232_v16, %s9302_s6 }
 0xf93   : > { %v5388_v53 = vpop.permute.xlu0 %5387  ;;  %v5385_v28 = vpop.permute.xlu1 %5384 }
 0xf94   : > { %v5393_v40 = vcombine.low %v5188_v30, %v5388_v53  ;;  %v5394_v45 = vcombine.high %v5188_v30, %v5388_v53 }
 0xf96   : > { %v5401_v39 = vrot.slane %v5393_v40, %v10145_v43  ;;  %v5408_v34 = vrot.slane %v5394_v45, %v10145_v43 }
 0xf97   : > { %v5391_v62 = vpop.permute.xlu1 %5390  ;;  %v5241_v63 = vpop.permute.xlu0 %5240 }
 0xf98   : > { %v5409_v29 = vcombine.low %v5385_v28, %v5391_v62  ;;  %v5410_v27 = vcombine.high %v5385_v28, %v5391_v62 }
 0xf9a   : > { %v5417_v57 = vrot.slane %v5409_v29, %v10145_v43  ;;  %v5424_v26 = vrot.slane %v5410_v27, %v10145_v43 }
 0xf9b   : > { %v5235_v46 = vpop.permute.xlu1 %5234 }
 0xf9c   : > { %v5425_v48 = vcombine.low %v5401_v39, %v5417_v57  ;;  %v5426_v52 = vcombine.high %v5401_v39, %v5417_v57  ;;  %v5441_v8 = vcombine.low %v5408_v34, %v5424_v26  ;;  %v5442_v38 = vcombine.high %v5408_v34, %v5424_v26 }
 0xf9d   : > { %v5259_v15 = vcombine.low %v5235_v46, %v5241_v63  ;;  %v5260_v37 = vcombine.high %v5235_v46, %v5241_v63 }
 0xf9e   : > { %v5433_v44 = vrot.slane %v5425_v48, %v10152_v50  ;;  %v5440_v56 = vrot.slane %v5426_v52, %v10152_v50  ;;  %v5449_v14 = vrot.slane %v5441_v8, %v10152_v50  ;;  %v5456_v33 = vrot.slane %v5442_v38, %v10152_v50 }
 0xf9f   : > { %v5238_v17 = vpop.permute.xlu1 %5237  ;;  %v5267_v31 = vrot.slane %v5259_v15, %v10145_v43  ;;  %v5274_v55 = vrot.slane %v5260_v37, %v10145_v43 }
 0xfa0   : > { %v5461_v59 = vcombine.low %v5433_v44, %v5440_v56  ;;  %v7494_v60 = vcombine.high %v5433_v44, %v5440_v56  ;;  %v5477_v61 = vcombine.low %v5449_v14, %v5456_v33  ;;  %v7495_v0 = vcombine.high %v5449_v14, %v5456_v33 }
 0xfa1   : > { %v5243_v22 = vcombine.low %v5232_v16, %v5238_v17  ;;  %v5244_v9 = vcombine.high %v5232_v16, %v5238_v17 }
 0xfa2   : > { %v5468_v12 = vrot.slane %v5461_v59, %v10145_v43  ;;  %v5476_v47 = vrot.slane %v7494_v60, %v10145_v43  ;;  %v5484_v24 = vrot.slane %v5477_v61, %v10145_v43  ;;  %v5492_v21 = vrot.slane %v7495_v0, %v10145_v43 }
 0xfa3   : > { %v5251_v32 = vrot.slane %v5243_v22, %v10145_v43  ;;  %v5258_v1 = vrot.slane %v5244_v9, %v10145_v43 }
 0xfa4   : > { %v5493_v7 = vcombine.low %v5468_v12, %v5476_v47  ;;  %v5509_v25 = vcombine.low %v5484_v24, %v5492_v21  ;;  %v5494_v57 = vcombine.high %v5468_v12, %v5476_v47  ;;  %v5510_v52 = vcombine.high %v5484_v24, %v5492_v21 }
 0xfa5   : > { %v5275_v19 = vcombine.low %v5251_v32, %v5267_v31  ;;  %v5276_v49 = vcombine.high %v5251_v32, %v5267_v31  ;;  %v5291_v42 = vcombine.low %v5258_v1, %v5274_v55  ;;  %v5292_v36 = vcombine.high %v5258_v1, %v5274_v55 }
 0xfa6   : > { %v5501_v58 = vrot.slane %v5493_v7, %v10152_v50  ;;  %v5517_v41 = vrot.slane %v5509_v25, %v10152_v50  ;;  %v5508_v14 = vrot.slane %v5494_v57, %v10152_v50  ;;  %v5524_v33 = vrot.slane %v5510_v52, %v10152_v50 }
 0xfa7   : > { %v5283_v30 = vrot.slane %v5275_v19, %v10152_v50  ;;  %v5290_v51 = vrot.slane %v5276_v49, %v10152_v50  ;;  %v5299_v11 = vrot.slane %v5291_v42, %v10152_v50  ;;  %v5306_v13 = vrot.slane %v5292_v36, %v10152_v50 }
 0xfa8   : > { %v5525_v18 = vcombine.low %v5501_v58, %v5517_v41  ;;  %v5526_v48 = vcombine.high %v5501_v58, %v5517_v41  ;;  %v5527_v37 = vcombine.low %v5508_v14, %v5524_v33  ;;  %v5528_v47 = vcombine.high %v5508_v14, %v5524_v33 }
 0xfa9   : > { %v5311_v16 = vcombine.low %v5283_v30, %v5290_v51  ;;  %v7492_v53 = vcombine.high %v5283_v30, %v5290_v51  ;;  %v5327_v28 = vcombine.low %v5299_v11, %v5306_v13  ;;  %v7493_v40 = vcombine.high %v5299_v11, %v5306_v13 }
 0xfaa   : > { %v5529_v45 = vpack.c.bf16 %v5525_v18, %v5525_v18  ;;  %v5530_v56 = vpack.c.bf16 %v5526_v48, %v5526_v48  ;;  %v5531_v61 = vpack.c.bf16 %v5527_v37, %v5527_v37  ;;  %v5532_v21 = vpack.c.bf16 %v5528_v47, %v5528_v47 }
 0xfab   : > { %v5318_v62 = vrot.slane %v5311_v16, %v10145_v43  ;;  %v5326_v29 = vrot.slane %v7492_v53, %v10145_v43  ;;  %v5334_v27 = vrot.slane %v5327_v28, %v10145_v43  ;;  %v5342_v39 = vrot.slane %v7493_v40, %v10145_v43 }
 0xfac   : > { %v5687_v34 = vsel %vm3057_vm0, %v5529_v45, 0  ;;  %v5733_v15 = vsel %vm3057_vm0, %v5530_v56, 0  ;;  %v5779_v12 = vsel %vm3057_vm0, %v5531_v61, 0  ;;  %v5825_v55 = vsel %vm3057_vm0, %v5532_v21, 0 }
 0xfad   : > { %v5343_v26 = vcombine.low %v5318_v62, %v5326_v29  ;;  %v5359_v46 = vcombine.low %v5334_v27, %v5342_v39  ;;  %7904 = vmatpush3.bf16.xpose.msra.mxu1 %v5687_v34  ;;  %v5344_v17 = vcombine.high %v5318_v62, %v5326_v29  ;;  %v5360_v59 = vcombine.high %v5334_v27, %v5342_v39 }
 0xfae   : > { %7909 = vmatprep.subr.bf16.mxu1 %v9307_v54  ;;  %v5019_v11 = vrot.slane %v10891_v23, %v10075_v5 }
 0xfaf   : > { %v5351_v8 = vrot.slane %v5343_v26, %v10152_v50  ;;  %v5367_v38 = vrot.slane %v5359_v46, %v10152_v50  ;;  %v5358_v22 = vrot.slane %v5344_v17, %v10152_v50  ;;  %v5374_v9 = vrot.slane %v5360_v59, %v10152_v50 }
 0xfb0   : > { %v5227_v18 = vadd.f32 %v10897_v20, %v5019_v11 }
 0xfb1   : > { %v5375_v44 = vcombine.low %v5351_v8, %v5367_v38  ;;  %v5376_v60 = vcombine.high %v5351_v8, %v5367_v38  ;;  %v5377_v24 = vcombine.low %v5358_v22, %v5374_v9  ;;  %v5378_v32 = vcombine.high %v5358_v22, %v5374_v9 }
 0xfb3   : > { %v5379_v63 = vpack.c.bf16 %v5375_v44, %v5375_v44  ;;  %v5380_v0 = vpack.c.bf16 %v5376_v60, %v5376_v60  ;;  %v5381_v31 = vpack.c.bf16 %v5377_v24, %v5377_v24  ;;  %v5382_v1 = vpack.c.bf16 %v5378_v32, %v5378_v32 }
 0xfb5   : > { %7906 = vmatmul.mubr.msk.bf16.vlgmr.msra.gmra.mrb[44].mxu1 %vm3057_vm0, %v5379_v63 }
 0xfb6   : > { %7910 = vmatpush3.bf16.xpose.msra.mxu1 %v5733_v15  ;;  %7911 = vmatprep.mubr.msk.bf16.mxu1 %vm9308_vm5, %v9307_v54 }
 0xfb7   : > { %7915 = vmatprep.subr.bf16.mxu1 %v9307_v54 }
 0xfbd   : > { %7912 = vmatmul.mubr.msk.bf16.vlgmr.msra.gmra.mrb[48].mxu1 %vm3057_vm0, %v5380_v0 }
 0xfbe   : > { %7916 = vmatpush3.bf16.xpose.msra.mxu1 %v5779_v12  ;;  %7917 = vmatprep.mubr.msk.bf16.mxu1 %vm9308_vm5, %v9307_v54 }
 0xfbf   : > { %7921 = vmatprep.subr.bf16.mxu1 %v9307_v54 }
 0xfc5   : > { %7918 = vmatmul.mubr.msk.bf16.vlgmr.msra.gmra.mrb[52].mxu1 %vm3057_vm0, %v5381_v31 }
 0xfc6   : > { %7922 = vmatpush3.bf16.xpose.msra.mxu1 %v5825_v55  ;;  %7923 = vmatprep.mubr.msk.bf16.mxu1 %vm9308_vm5, %v9307_v54 }
 0xfc7   : > { %7933 = vmatprep.subr.bf16.mxu1 %v9307_v54 }
 0xfcd   : > { %7924 = vmatmul.mubr.msk.bf16.vlgmr.msra.gmra.mrb[56].mxu1 %vm3057_vm0, %v5382_v1 }
 0xfce   : > { %7935 = vmatprep.mubr.msk.bf16.mxu1 %vm9308_vm5, %v9307_v54 }
0x1088   : > { %v5723_v7 = vpop.f32.mrb[44].mxu1 }
0x1089   : > { %v7907_v25 = vpop.f32.mrb[45].mxu1  ;;  %v5868_v19 = vsel %vm5867_vm6, %v5723_v7, -inf }
0x108a   : > { %5869 = vmax.xlane.f32.xlu1 %v5868_v19  ;;  %v5726_v49 = vpop.f32.mrb[46].mxu1 }
0x108b   : > { %v7908_v42 = vpop.f32.mrb[47].mxu1 }
0x1090   : > { %v5769_v36 = vpop.f32.mrb[48].mxu1 }
0x1091   : > { %v7913_v58 = vpop.f32.mrb[49].mxu1  ;;  %v5871_v41 = vsel %vm5867_vm6, %v5769_v36, -inf }
0x1092   : > { %5872 = vmax.xlane.f32.xlu0 %v5871_v41  ;;  %v5772_v30 = vpop.f32.mrb[50].mxu1 }
0x1093   : > { %v7914_v51 = vpop.f32.mrb[51].mxu1 }
0x1098   : > { %v5815_v13 = vpop.f32.mrb[52].mxu1 }
0x1099   : > { %v7919_v16 = vpop.f32.mrb[53].mxu1  ;;  %v5874_v53 = vsel %vm5867_vm6, %v5815_v13, -inf }
0x109a   : > { %5875 = vmax.xlane.f32.xlu0 %v5874_v53  ;;  %v5818_v28 = vpop.f32.mrb[54].mxu1 }
0x109b   : > { %5534 = vrot.lane.b32.xlu1 %v5227_v18, %s9303_s20  ;;  %v7920_v40 = vpop.f32.mrb[55].mxu1 }
0x10a0   : > { %v5861_v45 = vpop.f32.mrb[56].mxu1 }
0x10a1   : > { %v7925_v62 = vpop.f32.mrb[57].mxu1  ;;  %v5877_v29 = vsel %vm5867_vm6, %v5861_v45, -inf }
0x10a2   : > { %5878 = vmax.xlane.f32.xlu0 %v5877_v29  ;;  %v5864_v27 = vpop.f32.mrb[58].mxu1 }
0x10a3   : > { %v7926_v39 = vpop.f32.mrb[59].mxu1 }
0x1117   : > { %v5870_v34 = vpop.xlane.xlu1 %5869 }
0x1118   : > { %v5880_v23 = vsub.f32 %v5723_v7, %v5870_v34 }
0x111a   : > { %v5884_v57 = vmul.f32 1.442695, %v5880_v23 }
0x111b   : > { %v5535_v61 = vpop.permute.xlu1 %5534 }
0x111c   : > { %8569 = vpow2.f32 %v5884_v57 }
0x111f   : > { %v5873_v20 = vpop.xlane.xlu0 %5872 }
0x1120   : > { %v5881_v26 = vsub.f32 %v5769_v36, %v5873_v20 }
0x1122   : > { %v5886_v46 = vmul.f32 1.442695, %v5881_v26 }
0x1124   : > { %8571 = vpow2.f32 %v5886_v46 }
0x1126   : > { %v10965_v48 = vpop.eup %8569 }
0x1127   : > { %v5892_v52 = vsel %vm5867_vm6, %v10965_v48, 0.0  ;;  %v5876_v44 = vpop.xlane.xlu0 %5875 }
0x1128   : > { %5893 = vadd.xlane.f32.xlu1 %v5892_v52  ;;  %v5882_v56 = vsub.f32 %v5815_v13, %v5876_v44 }
0x112a   : > { %v5888_v14 = vmul.f32 1.442695, %v5882_v56 }
0x112c   : > { %8573 = vpow2.f32 %v5888_v14 }
0x112e   : > { %v10969_v8 = vpop.eup %8571 }
0x112f   : > { %v5895_v38 = vsel %vm5867_vm6, %v10969_v8, 0.0  ;;  %v5879_v33 = vpop.xlane.xlu0 %5878 }
0x1130   : > { %5896 = vadd.xlane.f32.xlu0 %v5895_v38  ;;  %v5883_v63 = vsub.f32 %v5861_v45, %v5879_v33 }
0x1132   : > { %v5890_v15 = vmul.f32 1.442695, %v5883_v63 }
0x1134   : > { %8575 = vpow2.f32 %v5890_v15 }
0x1136   : > { %v10975_v37 = vpop.eup %8573 }
0x1137   : > { %v5898_v17 = vsel %vm5867_vm6, %v10975_v37, 0.0 }
0x1139   : > { %5540 = vrot.lane.b32.xlu1 %v5227_v18, %s9304_s14 }
0x113e   : > { %v10979_v59 = vpop.eup %8575 }
0x113f   : > { %v5901_v60 = vsel %vm5867_vm6, %v10979_v59, 0.0 }
0x1146   : > { %5537 = vrot.lane.b32.xlu0 %v5227_v18, %s9302_s6 }
0x115d   : > { %5899 = vadd.xlane.f32.xlu1 %v5898_v17 }
0x1165   : > { %5902 = vadd.xlane.f32.xlu0 %v5901_v60 }
0x11b5   : > { %v5894_v0 = vpop.xlane.xlu1 %5893 }
0x11b6   : > { %8577 = vrcp.f32 %v5894_v0 }
0x11b9   : > { %v5541_v22 = vpop.permute.xlu1 %5540 }
0x11ba   : > { %v5559_v12 = vcombine.low %v5535_v61, %v5541_v22  ;;  %v5560_v47 = vcombine.high %v5535_v61, %v5541_v22 }
0x11bc   : > { %v5567_v55 = vrot.slane %v5559_v12, %v10145_v43  ;;  %v5574_v32 = vrot.slane %v5560_v47, %v10145_v43 }
0x11bd   : > { %v5897_v9 = vpop.xlane.xlu0 %5896 }
0x11be   : > { %8579 = vrcp.f32 %v5897_v9 }
0x11c0   : > { %v8578_v39 = vpop.eup %8577 }
0x11c1   : > { %v5538_v24 = vpop.permute.xlu0 %5537  ;;  %v5908_v56 = vmul.f32 %v8578_v39, %v10965_v48 }
0x11c2   : > { %v5543_v21 = vcombine.low %v5227_v18, %v5538_v24  ;;  %v5544_v31 = vcombine.high %v5227_v18, %v5538_v24 }
0x11c3   : > { %v5912_v0 = vpack.c.bf16 %v5908_v56, %v5908_v56  ;;  %v8401_v56 = vld [vmem:[%s11328_s16 + $0x30] sm:$0xff]  }
0x11c4   : > { %v5551_v1 = vrot.slane %v5543_v21, %v10145_v43  ;;  %v5558_v7 = vrot.slane %v5544_v31, %v10145_v43 }
0x11c6   : > { %v5575_v25 = vcombine.low %v5551_v1, %v5567_v55  ;;  %v5576_v19 = vcombine.high %v5551_v1, %v5567_v55  ;;  %v5591_v49 = vcombine.low %v5558_v7, %v5574_v32  ;;  %v5592_v42 = vcombine.high %v5558_v7, %v5574_v32  ;;  %v8395_v1 = vld [vmem:[%s11328_s16] sm:$0xff]   ;;  %v8398_v7 = vld [vmem:[%s11328_s16 + $0x18] sm:$0xff]  }
0x11c8   : > { %v5583_v36 = vrot.slane %v5575_v25, %v10152_v50  ;;  %v5590_v58 = vrot.slane %v5576_v19, %v10152_v50  ;;  %v5599_v41 = vrot.slane %v5591_v49, %v10152_v50  ;;  %v5606_v30 = vrot.slane %v5592_v42, %v10152_v50  ;;  %v8580_v26 = vpop.eup %8579  ;;  %v8399_v25 = vld [vmem:[%s11328_s16 + $0x20] sm:$0xff]   ;;  %v8400_v19 = vld [vmem:[%s11328_s16 + $0x28] sm:$0xff]  }
0x11c9   : > { %v5909_v14 = vmul.f32 %v8580_v26, %v10969_v8 }
0x11ca   : > { %v5611_v51 = vcombine.low %v5583_v36, %v5590_v58  ;;  %v7496_v11 = vcombine.high %v5583_v36, %v5590_v58  ;;  %v5627_v13 = vcombine.low %v5599_v41, %v5606_v30  ;;  %v7497_v18 = vcombine.high %v5599_v41, %v5606_v30 }
0x11cb   : > { %v5913_v22 = vpack.c.bf16 %v5909_v14, %v5909_v14 }
0x11cc   : > { %v5618_v16 = vrot.slane %v5611_v51, %v10145_v43  ;;  %v5626_v53 = vrot.slane %v7496_v11, %v10145_v43  ;;  %v5634_v28 = vrot.slane %v5627_v13, %v10145_v43  ;;  %v5642_v40 = vrot.slane %v7497_v18, %v10145_v43 }
0x11ce   : > { %v5643_v45 = vcombine.low %v5618_v16, %v5626_v53  ;;  %v5659_v62 = vcombine.low %v5634_v28, %v5642_v40  ;;  %v5644_v29 = vcombine.high %v5618_v16, %v5626_v53  ;;  %v5660_v27 = vcombine.high %v5634_v28, %v5642_v40 }
0x11d0   : > { %v5651_v34 = vrot.slane %v5643_v45, %v10152_v50  ;;  %v5667_v23 = vrot.slane %v5659_v62, %v10152_v50  ;;  %v5658_v57 = vrot.slane %v5644_v29, %v10152_v50  ;;  %v5674_v20 = vrot.slane %v5660_v27, %v10152_v50 }
0x11d2   : > { %v5675_v46 = vcombine.low %v5651_v34, %v5667_v23  ;;  %v5676_v52 = vcombine.high %v5651_v34, %v5667_v23  ;;  %v5677_v38 = vcombine.low %v5658_v57, %v5674_v20  ;;  %v5678_v44 = vcombine.high %v5658_v57, %v5674_v20 }
0x11d4   : > { %v5679_v33 = vpack.c.bf16 %v5675_v46, %v5675_v46  ;;  %v5680_v63 = vpack.c.bf16 %v5676_v52, %v5676_v52  ;;  %v5681_v60 = vpack.c.bf16 %v5677_v38, %v5677_v38  ;;  %v5682_v61 = vpack.c.bf16 %v5678_v44, %v5678_v44 }
0x11d6   : > { %v5920_v15 = vsel %vm3445_vm2, %v5679_v33, 0  ;;  %v5966_v17 = vsel %vm3445_vm2, %v5680_v63, 0  ;;  %v6012_v48 = vsel %vm3445_vm2, %v5681_v60, 0  ;;  %v6058_v8 = vsel %vm3445_vm2, %v5682_v61, 0 }
0x11d7   : > { %7928 = vmatpush3.bf16.msra.mxu0 %v5920_v15  ;;  %7934 = vmatpush3.bf16.msra.mxu1 %v5966_v17 }
0x11d8   : > { %7939 = vmatprep.subr.bf16.mxu0 %v9307_v54  ;;  %7945 = vmatprep.subr.bf16.mxu1 %v9307_v54 }
0x11da   : > { %7930 = vmatmul.mubr.msk.bf16.vlgmr.msra.gmra.mrb[44].mxu0 %vm5867_vm6, %v5912_v0  ;;  %7936 = vmatmul.mubr.msk.bf16.vlgmr.msra.gmra.mrb[60].mxu1 %vm5867_vm6, %v5913_v22 }
0x11db   : > { %7940 = vmatpush3.bf16.msra.mxu0 %v6012_v48  ;;  %7946 = vmatpush3.bf16.msra.mxu1 %v6058_v8 }
0x11dc   : > { %7941 = vmatprep.mubr.msk.bf16.mxu0 %vm9308_vm5, %v9307_v54  ;;  %7947 = vmatprep.mubr.msk.bf16.mxu1 %vm9308_vm5, %v9307_v54 }
0x11dd   : > { %7951 = vmatprep.subr.bf16.mxu0 %v9307_v54 }
0x11ea   : > { %v5900_v9 = vpop.xlane.xlu1 %5899 }
0x11eb   : > { %8581 = vrcp.f32 %v5900_v9 }
0x11f2   : > { %v5903_v12 = vpop.xlane.xlu0 %5902 }
0x11f3   : > { %8583 = vrcp.f32 %v5903_v12  ;;  %v8402_v12 = vld [vmem:[%s11328_s16 + $0x38] sm:$0xff]  }
0x11f5   : > { %v8582_v47 = vpop.eup %8581 }
0x11f6   : > { %v5910_v24 = vmul.f32 %v8582_v47, %v10975_v37  ;;  %v8396_v37 = vld [vmem:[%s11328_s16 + $0x8] sm:$0xff]  }
0x11f8   : > { %v5914_v21 = vpack.c.bf16 %v5910_v24, %v5910_v24 }
0x11fa   : > { %7942 = vmatmul.mubr.msk.bf16.vlgmr.msra.gmra.mrb[48].mxu0 %vm5867_vm6, %v5914_v21 }
0x11fb   : > { %7967 = vmatprep.mubr.msk.bf16.mxu0 %vm9308_vm5, %v9307_v54  ;;  %7952 = vmatpush3.bf16.msra.mxu0 %v8395_v1 }
0x11fc   : > { %7953 = vmatprep.subr.bf16.mxu0 %v9307_v54 }
0x11fd   : > { %v8584_v31 = vpop.eup %8583 }
0x11fe   : > { %v5911_v55 = vmul.f32 %v8584_v31, %v10979_v59  ;;  %v8397_v59 = vld [vmem:[%s11328_s16 + $0x10] sm:$0xff]  }
0x11ff   : > { %7954 = vmatpush3.bf16.msra.mxu0 %v8396_v37 }
0x1200   : > { %v5915_v32 = vpack.c.bf16 %v5911_v55, %v5911_v55  ;;  %7955 = vmatprep.subr.bf16.mxu0 %v9307_v54 }
0x1202   : > { %7948 = vmatmul.mubr.msk.bf16.vlgmr.msra.gmra.mrb[64].mxu1 %vm5867_vm6, %v5915_v32 }
0x1203   : > { %6586 = vmatprep.mubr.bf16.mxu1 %v9301_v35  ;;  %7956 = vmatpush3.bf16.msra.mxu0 %v8397_v59 }
0x1204   : > { %7957 = vmatprep.subr.bf16.mxu0 %v9307_v54 }
0x1207   : > { %7958 = vmatpush3.bf16.msra.mxu0 %v8398_v7 }
0x1208   : > { %7959 = vmatprep.subr.bf16.mxu0 %v9307_v54 }
0x120b   : > { %7960 = vmatpush3.bf16.msra.mxu0 %v8399_v25 }
0x120c   : > { %7961 = vmatprep.subr.bf16.mxu0 %v9307_v54 }
0x120f   : > { %7962 = vmatpush3.bf16.msra.mxu0 %v8400_v19 }
0x1210   : > { %7963 = vmatprep.subr.bf16.mxu0 %v9307_v54 }
0x1213   : > { %7964 = vmatpush3.bf16.msra.mxu0 %v8401_v56  ;;  %v8426_v56 = vld [vmem:[#allocation29 + $0x6c] ss:$16 sps:$4 sm:$0xff]  }
0x1214   : > { %7965 = vmatprep.subr.bf16.mxu0 %v9307_v54 }
0x1217   : > { %7966 = vmatpush3.bf16.msra.mxu0 %v8402_v12  ;;  %v8447_v12 = vld [vmem:[#allocation29 + $0xe4] ss:$16 sps:$4 sm:$0xff]  }
0x12ad   : > { %v5956_v49 = vpop.f32.mrb[44].mxu0  ;;  %v6002_v42 = vpop.f32.mrb[60].mxu1 }
0x12ae   : > { %v7931_v36 = vpop.f32.mrb[45].mxu0  ;;  %v7937_v58 = vpop.f32.mrb[61].mxu1 }
0x12af   : > { %v5959_v41 = vpop.f32.mrb[46].mxu0  ;;  %v6005_v30 = vpop.f32.mrb[62].mxu1 }
0x12b0   : > { %v7932_v51 = vpop.f32.mrb[47].mxu0  ;;  %v7938_v11 = vpop.f32.mrb[63].mxu1 }
0x12cd   : > { %v6048_v13 = vpop.f32.mrb[48].mxu0 }
0x12ce   : > { %v6100_v18 = vcombine.low %v5956_v49, %v6048_v13  ;;  %v6101_v16 = vcombine.high %v5956_v49, %v6048_v13  ;;  %v7943_v53 = vpop.f32.mrb[49].mxu0 }
0x12cf   : > { %v6051_v28 = vpop.f32.mrb[50].mxu0  ;;  %v8403_v53 = vld [vmem:[#allocation29] ss:$16 sps:$4 sm:$0xff]  }
0x12d0   : > { %v7944_v40 = vpop.f32.mrb[51].mxu0  ;;  %v6108_v34 = vrot.slane %v6100_v18, %v10145_v43  ;;  %v6115_v23 = vrot.slane %v6101_v16, %v10145_v43  ;;  %v8405_v28 = vld [vmem:[#allocation29 + $0x4] ss:$16 sps:$4 sm:$0xff]  }
0x12d1   : > { %v8406_v40 = vld [vmem:[#allocation29 + $0x8] ss:$16 sps:$4 sm:$0xff]   ;;  %6554 = vmatprep.subr.bf16.mxu1 %v8405_v28 }
0x12d2   : > { %6555 = vmatpush1.bf16.msra.mxu1 %v8403_v53  ;;  %v8463_v53 = vld [vmem:[#allocation31 + $0x58] sm:$0xff]  }
0x12d3   : > { %v8464_v28 = vld [vmem:[#allocation31 + $0xd8] sm:$0xff]  }
0x12d5   : > { %v6094_v45 = vpop.f32.mrb[64].mxu1 }
0x12d6   : > { %v6116_v62 = vcombine.low %v6002_v42, %v6094_v45  ;;  %v6117_v29 = vcombine.high %v6002_v42, %v6094_v45  ;;  %v7949_v27 = vpop.f32.mrb[65].mxu1  ;;  %v8408_v45 = vld [vmem:[#allocation29 + $0xc] ss:$16 sps:$4 sm:$0xff]  }
0x12d7   : > { %v6097_v39 = vpop.f32.mrb[66].mxu1  ;;  %6595 = vmatprep.subr.bf16.mxu0 %v8408_v45  ;;  %v8412_v27 = vld [vmem:[#allocation29 + $0x28] ss:$16 sps:$4 sm:$0xff]  }
0x12d8   : > { %v6124_v57 = vrot.slane %v6116_v62, %v10145_v43  ;;  %v6131_v20 = vrot.slane %v6117_v29, %v10145_v43  ;;  %v7950_v26 = vpop.f32.mrb[67].mxu1  ;;  %v8411_v62 = vld [vmem:[#allocation29 + $0x24] ss:$16 sps:$4 sm:$0xff]   ;;  %v8409_v29 = vld [vmem:[#allocation29 + $0x20] ss:$16 sps:$4 sm:$0xff]   ;;  %v8466_v45 = vld [vmem:[#allocation31 + $0x98] sm:$0xff]  }
0x12d9   : > { %6556 = vmatprep.subr.bf16.mxu1 %v8411_v62  ;;  %v8417_v39 = vld [vmem:[#allocation29 + $0x44] ss:$16 sps:$4 sm:$0xff]  }
0x12da   : > { %v6132_v46 = vcombine.low %v6108_v34, %v6124_v57  ;;  %v6133_v52 = vcombine.high %v6108_v34, %v6124_v57  ;;  %v6148_v38 = vcombine.low %v6115_v23, %v6131_v20  ;;  %v6149_v44 = vcombine.high %v6115_v23, %v6131_v20  ;;  %6557 = vmatpush1.bf16.msra.mxu1 %v8409_v29  ;;  %v8415_v34 = vld [vmem:[#allocation29 + $0x40] ss:$16 sps:$4 sm:$0xff]   ;;  %v8418_v23 = vld [vmem:[#allocation29 + $0x48] ss:$16 sps:$4 sm:$0xff]  }
0x12db   : > { %6558 = vmatprep.subr.bf16.mxu1 %v8417_v39  ;;  %v8467_v62 = vld [vmem:[#allocation31 + $0x60] sm:$0xff]   ;;  %v8471_v39 = vld [vmem:[#allocation31 + $0x68] sm:$0xff]  }
0x12dc   : > { %v6140_v14 = vrot.slane %v6132_v46, %v10152_v50  ;;  %v6147_v33 = vrot.slane %v6133_v52, %v10152_v50  ;;  %v6156_v63 = vrot.slane %v6148_v38, %v10152_v50  ;;  %v6163_v15 = vrot.slane %v6149_v44, %v10152_v50  ;;  %v8421_v52 = vld [vmem:[#allocation29 + $0x60] ss:$16 sps:$4 sm:$0xff]   ;;  %v8423_v38 = vld [vmem:[#allocation29 + $0x64] ss:$16 sps:$4 sm:$0xff]   ;;  %v8424_v44 = vld [vmem:[#allocation29 + $0x68] ss:$16 sps:$4 sm:$0xff]  }
0x12dd   : > { %v8469_v29 = vld [vmem:[#allocation31 + $0x20] sm:$0xff]  }
0x12de   : > { %v6168_v17 = vcombine.low %v6140_v14, %v6147_v33  ;;  %v7506_v60 = vcombine.high %v6140_v14, %v6147_v33  ;;  %v6184_v61 = vcombine.low %v6156_v63, %v6163_v15  ;;  %v7507_v0 = vcombine.high %v6156_v63, %v6163_v15  ;;  %6559 = vmatpush1.bf16.msra.mxu1 %v8415_v34  ;;  %v8429_v14 = vld [vmem:[#allocation29 + $0x84] ss:$16 sps:$4 sm:$0xff]   ;;  %v8432_v33 = vld [vmem:[#allocation29 + $0x8c] ss:$16 sps:$4 sm:$0xff]   ;;  %v8427_v63 = vld [vmem:[#allocation29 + $0x80] ss:$16 sps:$4 sm:$0xff]  }
0x12df   : > { %6560 = vmatprep.subr.bf16.mxu1 %v8423_v38  ;;  %v8430_v15 = vld [vmem:[#allocation29 + $0x88] ss:$16 sps:$4 sm:$0xff]  }
0x12e0   : > { %v6175_v22 = vrot.slane %v6168_v17, %v10145_v43  ;;  %v6183_v48 = vrot.slane %v7506_v60, %v10145_v43  ;;  %v6191_v8 = vrot.slane %v6184_v61, %v10145_v43  ;;  %v6199_v9 = vrot.slane %v7507_v0, %v10145_v43  ;;  %v8435_v17 = vld [vmem:[#allocation29 + $0xa4] ss:$16 sps:$4 sm:$0xff]   ;;  %v8438_v60 = vld [vmem:[#allocation29 + $0xac] ss:$16 sps:$4 sm:$0xff]   ;;  %v8433_v61 = vld [vmem:[#allocation29 + $0xa0] ss:$16 sps:$4 sm:$0xff]  }
0x12e1   : > { %v8436_v0 = vld [vmem:[#allocation29 + $0xa8] ss:$16 sps:$4 sm:$0xff]  }
0x12e2   : > { %v6201_v47 = vcombine.high %v6175_v22, %v6183_v48  ;;  %v6217_v24 = vcombine.high %v6191_v8, %v6199_v9  ;;  %v6200_v21 = vcombine.low %v6175_v22, %v6183_v48  ;;  %v6216_v31 = vcombine.low %v6191_v8, %v6199_v9  ;;  %6561 = vmatpush1.bf16.msra.mxu1 %v8421_v52  ;;  %v8441_v22 = vld [vmem:[#allocation29 + $0xc4] ss:$16 sps:$4 sm:$0xff]   ;;  %v8444_v48 = vld [vmem:[#allocation29 + $0xcc] ss:$16 sps:$4 sm:$0xff]   ;;  %v8439_v8 = vld [vmem:[#allocation29 + $0xc0] ss:$16 sps:$4 sm:$0xff]  }
0x12e3   : > { %6562 = vmatprep.subr.bf16.mxu1 %v8429_v14  ;;  %v8442_v9 = vld [vmem:[#allocation29 + $0xc8] ss:$16 sps:$4 sm:$0xff]  }
0x12e4   : > { %v6215_v55 = vrot.slane %v6201_v47, %v10152_v50  ;;  %v6231_v54 = vrot.slane %v6217_v24, %v10152_v50  ;;  %v6208_v32 = vrot.slane %v6200_v21, %v10152_v50  ;;  %v6224_v1 = vrot.slane %v6216_v31, %v10152_v50  ;;  %v8450_v47 = vld [vmem:[#allocation29 + $0xec] ss:$16 sps:$4 sm:$0xff]   ;;  %v8445_v24 = vld [vmem:[#allocation29 + $0xe0] ss:$16 sps:$4 sm:$0xff]   ;;  %v8448_v21 = vld [vmem:[#allocation29 + $0xe8] ss:$16 sps:$4 sm:$0xff]  }
0x12e5   : > { %v8473_v34 = vld [vmem:[#allocation31 + $0x28] sm:$0xff]   ;;  %v8479_v52 = vld [vmem:[#allocation31 + $0x78] sm:$0xff]  }
0x12e6   : > { %v6234_v37 = vcombine.low %v6215_v55, %v6231_v54  ;;  %v6233_v59 = vcombine.high %v6208_v32, %v6224_v1  ;;  %v6235_v43 = vcombine.high %v6215_v55, %v6231_v54  ;;  %v6232_v7 = vcombine.low %v6208_v32, %v6224_v1  ;;  %6563 = vmatpush1.bf16.msra.mxu1 %v8427_v63  ;;  %v7517_v1 = vld [vmem:[%s11330_s17] ss:$0 sm:$0xff]  ;;  %s9309_s17 = smov [#allocation32]  }
0x12e7   : > { %6564 = vmatprep.subr.bf16.mxu1 %v8435_v17  ;;  %v8480_v38 = vld [vmem:[#allocation31 + $0xf8] sm:$0xff]   ;;  %s9138_s0 = sshll.u32 %s9309_s17, 4  ;;  %s9139_s0 = int_to_ptr.vmem [resolvable:$false] %s9138_s0 }
0x12e8   : > { %6241 = vrot.lane.b32.xlu1 %v6234_v37, %s9302_s6  ;;  %6237 = vrot.lane.b32.xlu0 %v6233_v59, %s9304_s14  ;;  %s11329_s6 = sld [smem:[#allocation67_spill]]  ;;  %v7518_v59 = vld [vmem:[%s11331_s2] ss:$0 sm:$0xff]  ;;  %s9134_s14 = scalar_lea.vmem %s11098_s10, 256 }
0x12e9   : > { %v1350_v14 = vld [vmem:[%s11332_s3] sm:$0xf]  ;;  %p9135_p13 = scmp.ne.s32.totalorder %s11098_s10, %s9134_s14  ;;  %s9140_s13 = scalar_lea.vmem %s9139_s0, 512 }
0x12ea   : > { %6565 = vmatpush1.bf16.msra.mxu1 %v8433_v61  ;;  %v6385_v63 = vrot.slane %v1350_v14, %v10075_v5  ;;  %v6389_v17 = vrot.slane %v1350_v14, %v4298_v10  ;;  %p9141_p6 = scmp.lt.s32.totalorder %s11098_s10, %s9139_s0  ;;  %p9142_p11 = scmp.lt.s32.totalorder %s9140_s13, %s9134_s14 }
0x12eb   : > { %6566 = vmatprep.subr.bf16.mxu1 %v8441_v22  ;;  %p9136_p3 = pnand %p9135_p13, %p11334_p1 }
0x12ec   : > { %6245 = vrot.lane.b32.xlu1 %v6235_v43, %s9303_s20  ;;  %s6957_s20 = scalar_lea.sflag [#allocation4], %s9988_s23  ;;  %p9143_p5 = por %p9142_p11, %p9141_p6 }
0x12ed   : > { %p9137_p2 = pneg %p9136_p3 }
0x12ee   : > { %v7508_v41 = vld [vmem:[%s11329_s6] ss:$0 sm:$0xff]  ;;  %6567 = vmatpush1.bf16.msra.mxu1 %v8439_v8  ;;  %s11104_s6 = scalar_lea.hbm %s11333_s5, %s7592_s18 }
0x12ef   : > { %6568 = vmatprep.subr.bf16.mxu1 %v8447_v12  ;;  %p9144_p9 = pnand %p9143_p5, %p9137_p2 }
0x12f2   : > { %6569 = vmatpush1.bf16.msra.mxu1 %v8445_v24 }
0x135a   : > { %v6242_v25 = vpop.permute.xlu1 %6241  ;;  %v6238_v19 = vpop.permute.xlu0 %6237 }
0x135b   : > { %v6248_v49 = vsel %vm3057_vm0, %v6232_v7, %v6238_v19  ;;  %v8451_v19 = vld [vmem:[#allocation31 + $0x40] sm:$0xff]  }
0x135c   : > { %v6249_v36 = vsel %vm4115_vm3, %v6248_v49, %v6242_v25  ;;  %v8452_v49 = vld [vmem:[#allocation31 + $0xc0] sm:$0xff]   ;;  %7735 = vmatprep.subr.bf16.mxu1 %v8451_v19 }
0x135e   : > { %v6246_v42 = vpop.permute.xlu1 %6245 }
0x135f   : > { %v6250_v58 = vsel %vm4119_vm4, %v6249_v36, %v6246_v42  ;;  %v8453_v42 = vld [vmem:[#allocation31] sm:$0xff]  }
0x1360   : > { %v6251_v50 = vpack.c.bf16 %v6250_v58, %v6250_v58  ;;  %v8454_v36 = vld [vmem:[#allocation31 + $0x80] sm:$0xff]   ;;  %v8455_v58 = vld [vmem:[#allocation31 + $0x48] sm:$0xff]  }
0x1362   : > { %7968 = vmatmul.mubr.bf16.vlgmr.msra.gmra.mrb[52].mxu0 %v6251_v50  ;;  %v8456_v50 = vld [vmem:[#allocation31 + $0xc8] sm:$0xff]  }
0x1363   : > { %6627 = vmatprep.mubr.bf16.mxu0 %v9301_v35  ;;  %v8414_v35 = vld [vmem:[#allocation29 + $0x2c] ss:$16 sps:$4 sm:$0xff]   ;;  %6596 = vmatpush1.bf16.msra.mxu0 %v8406_v40 }
0x1364   : > { %6597 = vmatprep.subr.bf16.mxu0 %v8414_v35  ;;  %v8465_v40 = vld [vmem:[#allocation31 + $0x18] sm:$0xff]   ;;  %v8468_v35 = vld [vmem:[#allocation31 + $0xe0] sm:$0xff]  }
0x1367   : > { %6598 = vmatpush1.bf16.msra.mxu0 %v8412_v27  ;;  %v8470_v27 = vld [vmem:[#allocation31 + $0xa0] sm:$0xff]  }
0x1435   : > { %v6340_v30 = vpop.f32.mrb[52].mxu0 }
0x1436   : > { %v6341_v51 = vadd.f32 %v7508_v41, %v6340_v30  ;;  %v7969_v11 = vpop.f32.mrb[53].mxu0  ;;  %v8457_v41 = vld [vmem:[#allocation31 + $0x8] sm:$0xff]  }
0x1437   : > { %v6343_v13 = vpop.f32.mrb[54].mxu0  ;;  %v8458_v30 = vld [vmem:[#allocation31 + $0x88] sm:$0xff]   ;;  %v8460_v11 = vld [vmem:[#allocation31 + $0xd0] sm:$0xff]  }
0x1438   : > { %v11079_v18 = vadd.f32 %v6341_v51, %v10871_v6  ;;  %v7970_v16 = vpop.f32.mrb[55].mxu0  ;;  %v8420_v6 = vld [vmem:[#allocation29 + $0x4c] ss:$16 sps:$4 sm:$0xff]   ;;  %v8459_v51 = vld [vmem:[#allocation31 + $0x50] sm:$0xff]  }
0x1439   : > { %6599 = vmatprep.subr.bf16.mxu0 %v8420_v6  ;;  %v8461_v13 = vld [vmem:[#allocation31 + $0x10] sm:$0xff]   ;;  %v8472_v6 = vld [vmem:[#allocation31 + $0xe8] sm:$0xff]  }
0x143a   : > { %6347 = vadd.xlane.f32.xlu1 %v11079_v18  ;;  %6600 = vmatpush1.bf16.msra.mxu0 %v8418_v23  ;;  %v8462_v16 = vld [vmem:[#allocation31 + $0x90] sm:$0xff]   ;;  %v8474_v23 = vld [vmem:[#allocation31 + $0xa8] sm:$0xff]  }
0x143b   : > { %6601 = vmatprep.subr.bf16.mxu0 %v8426_v56  ;;  %v8482_v56 = vld [vmem:[#allocation31 + $0xb8] sm:$0xff]  }
0x143e   : > { %6602 = vmatpush1.bf16.msra.mxu0 %v8424_v44  ;;  %v8481_v44 = vld [vmem:[#allocation31 + $0x38] sm:$0xff]  }
0x143f   : > { %6603 = vmatprep.subr.bf16.mxu0 %v8432_v33  ;;  %v6377_v33 = vrot.slane %v1350_v14, %v10069_v3 }
0x1442   : > { %6604 = vmatpush1.bf16.msra.mxu0 %v8430_v15  ;;  %v6381_v15 = vrot.slane %v1350_v14, %v10072_v4 }
0x1443   : > { %6605 = vmatprep.subr.bf16.mxu0 %v8438_v60 }
0x1446   : > { %6606 = vmatpush1.bf16.msra.mxu0 %v8436_v0 }
0x1447   : > { %6607 = vmatprep.subr.bf16.mxu0 %v8444_v48 }
0x144a   : > { %6608 = vmatpush1.bf16.msra.mxu0 %v8442_v9 }
0x144b   : > { %6609 = vmatprep.subr.bf16.mxu0 %v8450_v47 }
0x144e   : > { %6610 = vmatpush1.bf16.msra.mxu0 %v8448_v21 }
0x144f   : > { %7757 = vmatprep.subr.bf16.mxu0 %v8452_v49 }
0x14c7   : > { %v6348_v57 = vpop.xlane.xlu1 %6347 }
0x14c8   : > { %v6349_v20 = vmul.f32 0.0078125, %v6348_v57  ;;  %v8475_v57 = vld [vmem:[#allocation31 + $0x70] sm:$0xff]  }
0x14ca   : > { %v6350_v26 = vsub.f32 %v11079_v18, %v6349_v20  ;;  %v8476_v20 = vld [vmem:[#allocation31 + $0xf0] sm:$0xff]  }
0x14cc   : > { %v6351_v46 = vmul.f32 %v6350_v26, %v6350_v26 }
0x14ce   : > { %6352 = vadd.xlane.f32.xlu0 %v6351_v46  ;;  %v8478_v46 = vld [vmem:[#allocation31 + $0xb0] sm:$0xff]  }
0x155b   : > { %v6353_v31 = vpop.xlane.xlu0 %6352 }
0x155c   : > { %v6354_v55 = vmul.f32 0.0078125, %v6353_v31 }
0x155e   : > { %v6355_v54 = vadd.f32 1e-12, %v6354_v55 }
0x1560   : > { %8585 = vrsqrt.f32 %v6355_v54 }
0x156a   : > { %v8586_v32 = vpop.eup %8585 }
0x156b   : > { %v6357_v37 = vmul.f32 %v8586_v32, %v6350_v26  ;;  %v8477_v26 = vld [vmem:[#allocation31 + $0x30] sm:$0xff]  }
0x156d   : > { %v6364_v43 = vmul.f32 %v7517_v1, %v6357_v37 }
0x156f   : > { %v6371_v7 = vadd.f32 %v7518_v59, %v6364_v43 }
0x1571   : > { %v6372_v25 = vpack.c.bf16 %v6371_v7, %v6371_v7 }
0x1573   : > { %6587 = vmatmul.mubr.bf16.vlgmr.msra.gmra.mrb[68].mxu1 %v6372_v25  ;;  %6628 = vmatmul.mubr.bf16.vlgmr.msra.gmra.mrb[56].mxu0 %v6372_v25 }
0x1574   : > { %7736 = vmatpush3.bf16.msra.mxu1 %v8453_v42  ;;  %7758 = vmatpush3.bf16.msra.mxu0 %v8454_v36 }
0x1575   : > { %7737 = vmatprep.subr.bf16.mxu1 %v8455_v58  ;;  %7759 = vmatprep.subr.bf16.mxu0 %v8456_v50 }
0x1578   : > { %7738 = vmatpush3.bf16.msra.mxu1 %v8457_v41  ;;  %7760 = vmatpush3.bf16.msra.mxu0 %v8458_v30 }
0x1579   : > { %7739 = vmatprep.subr.bf16.mxu1 %v8459_v51  ;;  %7761 = vmatprep.subr.bf16.mxu0 %v8460_v11 }
0x157c   : > { %7740 = vmatpush3.bf16.msra.mxu1 %v8461_v13  ;;  %7762 = vmatpush3.bf16.msra.mxu0 %v8462_v16 }
0x157d   : > { %7741 = vmatprep.subr.bf16.mxu1 %v8463_v53  ;;  %7763 = vmatprep.subr.bf16.mxu0 %v8464_v28 }
0x1580   : > { %7742 = vmatpush3.bf16.msra.mxu1 %v8465_v40  ;;  %7764 = vmatpush3.bf16.msra.mxu0 %v8466_v45 }
0x1581   : > { %7743 = vmatprep.subr.bf16.mxu1 %v8467_v62  ;;  %7765 = vmatprep.subr.bf16.mxu0 %v8468_v35 }
0x1584   : > { %7744 = vmatpush3.bf16.msra.mxu1 %v8469_v29  ;;  %7766 = vmatpush3.bf16.msra.mxu0 %v8470_v27 }
0x1585   : > { %7745 = vmatprep.subr.bf16.mxu1 %v8471_v39  ;;  %7767 = vmatprep.subr.bf16.mxu0 %v8472_v6 }
0x1588   : > { %7746 = vmatpush3.bf16.msra.mxu1 %v8473_v34  ;;  %7768 = vmatpush3.bf16.msra.mxu0 %v8474_v23 }
0x1589   : > { %7747 = vmatprep.subr.bf16.mxu1 %v8475_v57  ;;  %7769 = vmatprep.subr.bf16.mxu0 %v8476_v20 }
0x158c   : > { %7748 = vmatpush3.bf16.msra.mxu1 %v8477_v26  ;;  %7770 = vmatpush3.bf16.msra.mxu0 %v8478_v46 }
0x158d   : > { %7749 = vmatprep.subr.bf16.mxu1 %v8479_v52  ;;  %7771 = vmatprep.subr.bf16.mxu0 %v8480_v38 }
0x1590   : > { %7750 = vmatpush3.bf16.msra.mxu1 %v8481_v44  ;;  %7772 = vmatpush3.bf16.msra.mxu0 %v8482_v56 }
0x1646   : > { %v6588_v60 = vpop.f32.mrb[68].mxu1  ;;  %v6629_v61 = vpop.f32.mrb[56].mxu0 }
0x1647   : > { %v6589_v0 = vadd.f32 %v6588_v60, %v6377_v33  ;;  %v6630_v22 = vadd.f32 %v6629_v61, %v6385_v63  ;;  %v6590_v48 = vpop.f32.mrb[69].mxu1  ;;  %v6631_v8 = vpop.f32.mrb[57].mxu0 }
0x1648   : > { %v6591_v9 = vadd.f32 %v6590_v48, %v6381_v15  ;;  %v6632_v12 = vadd.f32 %v6631_v8, %v6389_v17  ;;  %v6592_v47 = vpop.f32.mrb[70].mxu1  ;;  %v6633_v24 = vpop.f32.mrb[58].mxu0 }
0x1649   : > { %v6636_v21 = vmul.f32 %v6589_v0, %v6589_v0  ;;  %v6638_v31 = vmul.f32 %v6630_v22, %v6630_v22  ;;  %v6593_v3 = vpop.f32.mrb[71].mxu1  ;;  %v6634_v55 = vpop.f32.mrb[59].mxu0 }
0x164a   : > { %v6637_v5 = vmul.f32 %v6591_v9, %v6591_v9  ;;  %v6639_v54 = vmul.f32 %v6632_v12, %v6632_v12 }
0x164b   : > { %v6640_v4 = vmul.f32 %v6636_v21, %v6589_v0  ;;  %v6642_v32 = vmul.f32 %v6638_v31, %v6630_v22 }
0x164c   : > { %v6641_v2 = vmul.f32 %v6637_v5, %v6591_v9  ;;  %v6643_v10 = vmul.f32 %v6639_v54, %v6632_v12 }
0x164d   : > { %v6644_v1 = vmul.f32 0.044715, %v6640_v4  ;;  %v6646_v37 = vmul.f32 0.044715, %v6642_v32 }
0x164e   : > { %v6645_v59 = vmul.f32 0.044715, %v6641_v2  ;;  %v6647_v43 = vmul.f32 0.044715, %v6643_v10 }
0x164f   : > { %v6648_v7 = vadd.f32 %v6644_v1, %v6589_v0  ;;  %v6650_v25 = vadd.f32 %v6646_v37, %v6630_v22 }
0x1650   : > { %v6649_v19 = vadd.f32 %v6645_v59, %v6591_v9  ;;  %v6651_v49 = vadd.f32 %v6647_v43, %v6632_v12 }
0x1651   : > { %v6652_v42 = vmul.f32 0.7978846, %v6648_v7  ;;  %v6654_v36 = vmul.f32 0.7978846, %v6650_v25 }
0x1652   : > { %v6653_v58 = vmul.f32 0.7978846, %v6649_v19  ;;  %v6655_v50 = vmul.f32 0.7978846, %v6651_v49 }
0x1653   : > { %8587 = vtanh.f32 %v6652_v42 }
0x1654   : > { %8589 = vtanh.f32 %v6654_v36 }
0x1655   : > { %8591 = vtanh.f32 %v6653_v58 }
0x1656   : > { %8593 = vtanh.f32 %v6655_v50 }
0x165d   : > { %v8588_v41 = vpop.eup %8587 }
0x165e   : > { %v8590_v30 = vpop.eup %8589  ;;  %v6660_v51 = vadd.f32 1.0, %v8588_v41 }
0x165f   : > { %v8592_v11 = vpop.eup %8591  ;;  %v6662_v13 = vadd.f32 1.0, %v8590_v30 }
0x1660   : > { %v8594_v16 = vpop.eup %8593  ;;  %v6661_v53 = vadd.f32 1.0, %v8592_v11  ;;  %v6664_v28 = vmul.f32 0.5, %v6660_v51 }
0x1661   : > { %v6663_v40 = vadd.f32 1.0, %v8594_v16  ;;  %v6666_v45 = vmul.f32 0.5, %v6662_v13 }
0x1662   : > { %v6665_v62 = vmul.f32 0.5, %v6661_v53  ;;  %v6668_v29 = vmul.f32 %v6664_v28, %v6589_v0 }
0x1663   : > { %v6667_v35 = vmul.f32 0.5, %v6663_v40  ;;  %v6670_v39 = vmul.f32 %v6666_v45, %v6630_v22 }
0x1664   : > { %v6669_v27 = vmul.f32 %v6665_v62, %v6591_v9  ;;  %v6672_v57 = vpack.c.bf16 %v6668_v29, %v6668_v29 }
0x1665   : > { %v6671_v6 = vmul.f32 %v6667_v35, %v6632_v12  ;;  %v6674_v20 = vpack.c.bf16 %v6670_v39, %v6670_v39 }
0x1666   : > { %v6673_v34 = vpack.c.bf16 %v6669_v27, %v6669_v27 }
0x1667   : > { %v6675_v23 = vpack.c.bf16 %v6671_v6, %v6671_v6 }
0x1668   : > { %6906 = vmatprep.mubr.bf16.mxu1 %v6673_v34 }
0x1669   : > { %6946 = vmatprep.mubr.bf16.mxu0 %v6675_v23  ;;  %6907 = vmatmul.mubr.bf16.vlgmr.msra.gmra.mrb[72].mxu1 %v6672_v57 }
0x166a   : > { %6947 = vmatmul.mubr.bf16.vlgmr.msra.gmra.mrb[60].mxu0 %v6674_v20 }
0x166b   : > { %9147 = shalt.err (!%p9144_p9)
}
0x166c   : > { %s9148_s11 = scalar_lea.hbm %s11104_s6, 256  ;;  %s9152_s9 = scalar_lea.hbm %s11333_s5, 512 }
0x166d   : > { %p9149_p0 = scmp.ne.s32.totalorder %s11104_s6, %s9148_s11  ;;  %p9153_p8 = scmp.lt.u32.totalorder %s11104_s6, %s11333_s5 }
0x166e   : > { %p9154_p10 = scmp.lt.u32.totalorder %s9152_s9, %s9148_s11  ;;  %p9156_p13 = scmp.lt.u32.totalorder %s9148_s11, %s11104_s6 }
0x166f   : > { %p9150_p7 = pnand %p9149_p0, %p11334_p1 }
0x1670   : > { %p9155_p4 = por %p9154_p10, %p9153_p8 }
0x1671   : > { %p9151_p12 = pneg %p9150_p7 }
0x1672   : > { %p9157_p3 = por %p9156_p13, %p9155_p4 }
0x1674   : > { %p9158_p2 = pnand %p9157_p3, %p9151_p12 }
0x1676   : > { %9161 = shalt.err (!%p9158_p2)
}
0x1677   : > { %s9310_s19 = smov 128   ;;  %s9311_s21 = smov 8  }
0x1678   : > { %8055 = dma.vmem_to_hbm [thread:$0]  (%p11334_p1), %s11098_s10, 256, %s11104_s6, %s6957_s20, %s9310_s19, %s9310_s19, %s9311_s21  }
0x1679   : > { %s11335_s0 = sld [smem:[#allocation72_spill]]  ;;  %s7588_s13 = sshll.u32 %s9474_s28, 7 }
0x167a   : > { %s1110_s10 = scalar_lea.vmem [#allocation33], %s7304_s22  ;;  %s11336_s2 = sld [smem:[#allocation74_spill]] }
0x167b   : > { %s6991_s6 = sshll.u32 %s1110_s10, 4  ;;  %s6962_s9 = scalar_lea.sflag [#allocation34], %s9988_s23  ;;  %s11142_s6 = int_to_ptr.vmem [resolvable:$true] %s6991_s6 }
0x167c   : > { %s9162_s3 = scalar_lea.vmem %s11142_s6, 128  ;;  %s9312_s28 = smov [#allocation33]  }
0x167d   : > { %p9163_p6 = scmp.ne.s32.totalorder %s11142_s6, %s9162_s3  ;;  %s9166_s22 = sshll.u32 %s9312_s28, 4  ;;  %s9167_s22 = int_to_ptr.vmem [resolvable:$false] %s9166_s22 }
0x167e   : > { %s9168_s18 = scalar_lea.vmem %s9167_s22, 256  ;;  %p9169_p9 = scmp.lt.s32.totalorder %s11142_s6, %s9167_s22 }
0x167f   : > { %v7551_v52 = vld [vmem:[%s11335_s0] ss:$0 sm:$0xff]  ;;  %p9164_p11 = pnand %p9163_p6, %p11334_p1  ;;  %p9170_p0 = scmp.lt.s32.totalorder %s9168_s18, %s9162_s3 }
0x1680   : > { %s11140_s26 = scalar_lea.hbm %s11336_s2, %s7588_s13 }
0x1681   : > { %p9165_p5 = pneg %p9164_p11  ;;  %p9171_p7 = por %p9170_p0, %p9169_p9 }
0x1683   : > { %p9172_p12 = pnand %p9171_p7, %p9165_p5 }
0x173c   : > { %v7751_v26 = vpop.f32.mrb[72].mxu1 }
0x173d   : > { %v7773_v46 = vpop.f32.mrb[60].mxu0  ;;  %v7752_v38 = vpop.f32.mrb[73].mxu1 }
0x173e   : > { %v7753_v44 = vadd.f32 %v7752_v38, %v7751_v26  ;;  %v7774_v56 = vpop.f32.mrb[61].mxu0  ;;  %v7754_v14 = vpop.f32.mrb[74].mxu1 }
0x173f   : > { %v7775_v33 = vadd.f32 %v7774_v56, %v7773_v46  ;;  %v7776_v63 = vpop.f32.mrb[62].mxu0  ;;  %v7755_v15 = vpop.f32.mrb[75].mxu1 }
0x1740   : > { %v6909_v17 = vadd.f32 %v7753_v44, %v7551_v52  ;;  %v7777_v60 = vpop.f32.mrb[63].mxu0 }
0x1742   : > { %v6949_v61 = vadd.f32 %v7775_v33, %v6909_v17 }
0x1744   : > { %v6954_v0 = vadd.f32 %v6949_v61, %v11079_v18 }
0x1746   : > { %6955 = vst [vmem:[%s1110_s10] sm:$0xff] %v6954_v0 }
0x1747   : > { %9175 = shalt.err (!%p9172_p12)
}
0x1748   : > { %s9176_s23 = scalar_lea.hbm %s11140_s26, 128  ;;  %s9180_s14 = scalar_lea.hbm %s11336_s2, 256 }
0x1749   : > { %p9177_p8 = scmp.ne.s32.totalorder %s11140_s26, %s9176_s23  ;;  %p9181_p13 = scmp.lt.u32.totalorder %s11140_s26, %s11336_s2 }
0x174a   : > { %p9182_p3 = scmp.lt.u32.totalorder %s9180_s14, %s9176_s23  ;;  %p9184_p6 = scmp.lt.u32.totalorder %s9176_s23, %s11140_s26 }
0x174b   : > { %p9178_p10 = pnand %p9177_p8, %p11334_p1 }
0x174c   : > { %p9183_p2 = por %p9182_p3, %p9181_p13 }
0x174d   : > { %p9179_p4 = pneg %p9178_p10 }
0x174e   : > { %p9185_p11 = por %p9184_p6, %p9183_p2 }
0x1750   : > { %p9186_p5 = pnand %p9185_p11, %p9179_p4 }
0x1752   : > { %9189 = shalt.err (!%p9186_p5)
}
0x1753   : > { %8056 = dma.vmem_to_hbm [thread:$0]  (%p11334_p1), %s11142_s6, 128, %s11140_s26, %s6962_s9  }
0x1754 PF: > { %s7003_s13 = sand.u32 1, %s9260_s7   ;;  %p11337_p9 = scmp.ne.s32.totalorder %s11302_s27, 0 }
0x1755   : > { %p11338_p0 = scmp.ge.s32.totalorder %s9272_s30, 2  ;;  %s7004_s10 = scalar_lea.sflag [#allocation4], %s7003_s13 }
0x1757   : > { %p8119_p7 = pnand %p11338_p0, %p11337_p9 }
0x1759   : > { %9251 = dma.done.wait (!%p8119_p7), %s7004_s10, 256  }
0x175a   : > { %9253 = vsyncadd (!%p8119_p7), %s7004_s10, 4294967040  ;;  %s7013_s20 = scalar_lea.sflag [#allocation34], %s7003_s13 }
0x175b   : > { %9255 = dma.done.wait (!%p8119_p7), %s7013_s20, 128  }
0x175c   : > { %9257 = vsyncadd (!%p8119_p7), %s7013_s20, 4294967168  ;;  %p55_p1 = scmp.ge.s32.totalorder %s9885_s1, 4   ;;  %s11339_s7 = smov %s9264_s4 }
0x175d   : > { %s11340_s4 = smov %s9268_s8  ;;  %s11341_s8 = smov %s9897_s25 }
0x175e   : > { %s11342_s30 = smov %s9885_s1  ;;  %57 = sbr.rel (!%p55_p1) target bundleno = 45 (0x2d), region = 267 }
0x1765   :  { %7018 = vsyncpa [#allocation3], 1 }
0x1766   :  { %7020 = vsyncpa [#allocation3 + $0x1], 1 }
0x1767   :  { %7021 = vsyncpa [#allocation6], 1 }
0x1768   :  { %7023 = vsyncpa [#allocation6 + $0x1], 1 }
0x1769   :  { %7024 = vsyncpa [#allocation9], 1 }
0x176a   :  { %7025 = vsyncpa [#allocation12], 1 }
0x176b   :  { %7026 = vsyncpa [#allocation15], 1 }
0x176c   :  { %7027 = vsyncpa [#allocation18], 1 }
0x176d   :  { %7028 = vsyncpa [#allocation21], 1 }
0x176e   :  { %7029 = vsyncpa [#allocation24], 1 }
0x176f   :  { %7030 = vsyncpa [#allocation27], 1 }
0x1770   :  { %7031 = vsyncpa [#allocation30], 1 }
0x1771   :  { %7032 = vsyncpa [#allocation4], 1 }
0x1772   :  { %7034 = vsyncpa [#allocation4 + $0x1], 1 }
0x1773   :  { %7035 = vsyncpa [#allocation34], 1 }
0x1774   :  { %7037 = vsyncpa [#allocation34 + $0x1], 1 }

</bundles_post_ra>
